<compile_context>
chip_gen: v7x
topology: tpu7x:2x2x1
jax: 0.10.0
libtpu: 0.0.40
codegen_flags: <defaults>
</compile_context>

<pallas_src>
import jax
import jax.numpy as jnp
from jax import lax
from jax.experimental import pallas as pl
from jax.experimental.pallas import tpu as pltpu


# ----------------------------- small helpers -------------------------------

def _round_up(x, m):
    return (x + m - 1) // m * m


def _pick_tile(m, cap):
    """Largest power-of-two row tile <= cap that divides m (fallback: m)."""
    for t in (512, 256, 128, 64, 32, 16, 8):
        if t <= cap and m % t == 0:
            return t
    return m


# ----------------------------- GEMM kernels --------------------------------

def _mm_kernel(a_ref, b_ref, o_ref):
    # Accumulate directly into the f32 output block (resident across k).
    @pl.when(pl.program_id(2) == 0)
    def _():
        o_ref[...] = jnp.zeros_like(o_ref)

    o_ref[...] += jnp.dot(a_ref[...], b_ref[...],
                          preferred_element_type=jnp.float32)


def _mm_bn_relu_kernel(scale_ref, shift_ref, a_ref, b_ref, o_ref):
    # Previous layer's BatchNorm(batch stats)+ReLU fused as a per-channel
    # affine+ReLU prologue on the A tile: relu(a*scale + shift) @ b.
    @pl.when(pl.program_id(2) == 0)
    def _():
        o_ref[...] = jnp.zeros_like(o_ref)

    a = a_ref[...].astype(jnp.float32) * scale_ref[...] + shift_ref[...]
    a = jnp.maximum(a, 0.0).astype(jnp.bfloat16)
    o_ref[...] += jnp.dot(a, b_ref[...], preferred_element_type=jnp.float32)


def pallas_matmul(a, b, *, bn_scale=None, bn_shift=None):
    """f32-accumulating bf16 GEMM.  a:(M,K), b:(K,N) -> f32 (M,N).

    bn_scale / bn_shift: optional (1, K) f32 per-channel affine applied with a
    ReLU to `a` inside the kernel (fused BatchNorm+ReLU of the previous layer).
    Only M is (cheaply) padded to the sublane minimum of 8; K and N use the
    real sizes (weights were laid out for lane-dense N at init time).
    """
    M, K = a.shape
    K2, Nc = b.shape
    assert K == K2
    a = a.astype(jnp.bfloat16)
    b = b.astype(jnp.bfloat16)

    Mp = _round_up(M, 8)
    if Mp != M:
        a = jnp.pad(a, ((0, Mp - M), (0, 0)))
    tm = _pick_tile(Mp, 128)

    if Nc % 256 == 0 and Nc >= 512:      # 256-wide tiles help v6e/v7x MXUs
        tn = 256
    elif Nc % 128 == 0:
        tn = 128
    else:
        tn = Nc                          # small Cout: full (masked) lane tile
    if K > 512 and K % 256 == 0:
        tk = 256
    elif K > 512 and K % 128 == 0:
        tk = 128
    else:
        tk = K                           # single reduction step

    grid = (Mp // tm, Nc // tn, K // tk)

    if bn_scale is None:
        kernel = _mm_kernel
        in_specs = [pl.BlockSpec((tm, tk), lambda i, j, k: (i, k)),
                    pl.BlockSpec((tk, tn), lambda i, j, k: (k, j))]
        args = (a, b)
    else:
        kernel = _mm_bn_relu_kernel
        in_specs = [pl.BlockSpec((1, tk), lambda i, j, k: (0, k)),
                    pl.BlockSpec((1, tk), lambda i, j, k: (0, k)),
                    pl.BlockSpec((tm, tk), lambda i, j, k: (i, k)),
                    pl.BlockSpec((tk, tn), lambda i, j, k: (k, j))]
        args = (bn_scale.astype(jnp.float32), bn_shift.astype(jnp.float32),
                a, b)

    out = pl.pallas_call(
        kernel,
        out_shape=jax.ShapeDtypeStruct((Mp, Nc), jnp.float32),
        grid_spec=pltpu.PrefetchScalarGridSpec(
            num_scalar_prefetch=0,
            grid=grid,
            in_specs=in_specs,
            out_specs=pl.BlockSpec((tm, tn), lambda i, j, k: (i, j))),
        compiler_params=pltpu.CompilerParams(
            dimension_semantics=("parallel", "parallel", "arbitrary")),
    )(*args)
    return out[:M] if Mp != M else out


# ------------------------ BatchNorm (batch stats) ---------------------------

def _bn_stats_kernel(x_ref, sum_ref, sq_ref):
    @pl.when(pl.program_id(0) == 0)
    def _():
        sum_ref[...] = jnp.zeros_like(sum_ref)
        sq_ref[...] = jnp.zeros_like(sq_ref)

    x = x_ref[...].astype(jnp.float32)
    sum_ref[...] += jnp.sum(x, axis=0, keepdims=True)
    sq_ref[...] += jnp.sum(x * x, axis=0, keepdims=True)


def bn_batch_scale_shift(x2d, gamma, beta, eps=1e-5):
    """Per-channel (1, C) scale/shift for BatchNorm2d in training mode
    (biased batch variance).  Row-tiled stats kernel -> VMEM-safe on v7x."""
    M, C = x2d.shape
    tm = _pick_tile(M, 512)
    s, sq = pl.pallas_call(
        _bn_stats_kernel,
        out_shape=(jax.ShapeDtypeStruct((1, C), jnp.float32),
                   jax.ShapeDtypeStruct((1, C), jnp.float32)),
        grid_spec=pltpu.PrefetchScalarGridSpec(
            num_scalar_prefetch=0,
            grid=(M // tm,),
            in_specs=[pl.BlockSpec((tm, C), lambda i: (i, 0))],
            out_specs=(pl.BlockSpec((1, C), lambda i: (0, 0)),
                       pl.BlockSpec((1, C), lambda i: (0, 0)))),
        compiler_params=pltpu.CompilerParams(
            dimension_semantics=("arbitrary",)),
    )(x2d)
    mean = s / M
    var = jnp.maximum(sq / M - mean * mean, 0.0)
    scale = gamma.reshape(1, C) * lax.rsqrt(var + eps)
    shift = beta.reshape(1, C) - mean * scale
    return scale, shift


# ------------------------------- tanh ---------------------------------------

def _tanh_kernel(x_ref, o_ref):
    o_ref[...] = jnp.tanh(x_ref[...])


def tanh_pallas(x):
    """Lane-dense tiled tanh: purely elementwise, so reshape to (numel/128, 128)."""
    orig_shape = x.shape
    n = x.size
    if n % 128 == 0 and (n // 128) % 8 == 0:
        x2 = x.reshape(n // 128, 128)
    else:
        x2 = x.reshape(-1, orig_shape[-1])
    M, C = x2.shape
    tm = _pick_tile(M, 512)
    out = pl.pallas_call(
        _tanh_kernel,
        out_shape=jax.ShapeDtypeStruct((M, C), jnp.float32),
        grid_spec=pltpu.PrefetchScalarGridSpec(
            num_scalar_prefetch=0,
            grid=(M // tm,),
            in_specs=[pl.BlockSpec((tm, C), lambda i: (i, 0))],
            out_specs=pl.BlockSpec((tm, C), lambda i: (i, 0))),
        compiler_params=pltpu.CompilerParams(
            dimension_semantics=("parallel",)),
    )(x2.astype(jnp.float32))
    return out.reshape(orig_shape)


# -------- fused self-attention core: bmm1 + softmax + bmm2 + w_o + residual --

def _attn_kernel(x_ref, scale_ref, shift_ref, gamma_ref,
                 th_ref, ph_ref, g_ref, wo_ref, o_ref):
    # scores = theta @ phi^T (contract the tiny channel dim); softmax over the
    # full HW/4 key axis (it lives entirely in this tile); @ g; @ w_o; then
    # recompute relu(bn(x)) for the residual and add gamma * attn_out.
    s = lax.dot_general(th_ref[...], ph_ref[...],
                        dimension_numbers=(((1,), (1,)), ((), ())),
                        preferred_element_type=jnp.float32)
    s = s - jnp.max(s, axis=-1, keepdims=True)
    e = jnp.exp(s)
    p = (e / jnp.sum(e, axis=-1, keepdims=True)).astype(g_ref.dtype)
    attn_g = jnp.dot(p, g_ref[...], preferred_element_type=jnp.float32)
    o = jnp.dot(attn_g.astype(jnp.bfloat16), wo_ref[...],
                preferred_element_type=jnp.float32)
    xn = jnp.maximum(
        x_ref[...].astype(jnp.float32) * scale_ref[...] + shift_ref[...], 0.0)
    o_ref[...] = (xn + gamma_ref[...] * o).astype(o_ref.dtype)


# ------------------------- deconv scatter (XLA glue) -------------------------

def _deconv_scatter_s2p1(y):
    """Tap scatter of ConvTranspose2d(k=4, stride=2, pad=1) via parity-grouped
    pixel shuffle: 4 shifted adds instead of 16 read-modify-write passes.
    y: (N, H, W, 4, 4, C) with tap axes (kh, kw) -> (N, 2H, 2W, C)."""

    def _shift_down(a, axis):          # result[m] = a[m-1], zero at m == 0
        zero = jnp.zeros_like(lax.slice_in_dim(a, 0, 1, axis=axis))
        body = lax.slice_in_dim(a, 0, a.shape[axis] - 1, axis=axis)
        return jnp.concatenate([zero, body], axis=axis)

    def _shift_up(a, axis):            # result[m] = a[m+1], zero at m == last
        zero = jnp.zeros_like(lax.slice_in_dim(a, 0, 1, axis=axis))
        body = lax.slice_in_dim(a, 1, a.shape[axis], axis=axis)
        return jnp.concatenate([body, zero], axis=axis)

    def _interleave(even, odd, axis):
        stacked = jnp.stack([even, odd], axis=axis + 1)
        shape = list(even.shape)
        shape[axis] *= 2
        return stacked.reshape(shape)

    # rows (kh taps sit at axis 3): out_row 2m <- taps {1,3}; 2m+1 <- taps {2,0}
    even_h = y[:, :, :, 1] + _shift_down(y[:, :, :, 3], axis=1)
    odd_h = y[:, :, :, 2] + _shift_up(y[:, :, :, 0], axis=1)
    z = _interleave(even_h, odd_h, axis=1)          # (N, 2H, W, 4, C)
    # cols (kw taps now at axis 3)
    even_w = z[:, :, :, 1] + _shift_down(z[:, :, :, 3], axis=2)
    odd_w = z[:, :, :, 2] + _shift_up(z[:, :, :, 0], axis=2)
    return _interleave(even_w, odd_w, axis=2)       # (N, 2H, 2W, C)


def deconv_s2p1(x_nhwc, w_mat, bn_scale=None, bn_shift=None):
    """ConvTranspose2d(k=4, s=2, p=1, bias=False).  w_mat: (Cin, 16*Cout) bf16,
    columns ordered (kh, kw, cout).  Optional fused BN+ReLU prologue on x."""
    N, H, W, Cin = x_nhwc.shape
    cout = w_mat.shape[1] // 16
    y = pallas_matmul(x_nhwc.reshape(N * H * W, Cin), w_mat,
                      bn_scale=bn_scale, bn_shift=bn_shift)
    y = y.reshape(N, H, W, 4, 4, cout)
    return _deconv_scatter_s2p1(y)


def maxpool2x2(x_nhwc):
    N, H, W, C = x_nhwc.shape
    return x_nhwc.reshape(N, H // 2, 2, W // 2, 2, C).max(axis=(2, 4))


# ----------------------------- SelfAttn block -------------------------------

def self_attn(x_nhwc, p, bn_scale, bn_shift):
    """SelfAttn applied to relu(bn(x)).  The normalization is never
    materialized: it is fused as a prologue of the theta|phi|g projection GEMM
    and recomputed for the residual inside the fused attention kernel."""
    N, H, W, C = x_nhwc.shape
    c8, c2 = C // 8, C // 2
    L, L4 = H * W, (H * W) // 4
    x2d = x_nhwc.reshape(N * H * W, C)

    # single fused theta|phi|g projection (three spectral-norm 1x1 convs ->
    # one GEMM) with BN+ReLU prologue.
    proj = pallas_matmul(x2d, p["w_tpg"], bn_scale=bn_scale,
                         bn_shift=bn_shift).reshape(N, H, W, 2 * c8 + c2)
    theta = proj[..., :c8].reshape(N, L, c8).astype(jnp.bfloat16)
    pg = maxpool2x2(proj[..., c8:])                    # (N, H/2, W/2, c8+c2)
    phi = pg[..., :c8].reshape(N, L4, c8).astype(jnp.bfloat16)
    g = pg[..., c8:].reshape(N, L4, c2).astype(jnp.bfloat16)

    tm = _pick_tile(L, 128)
    out = pl.pallas_call(
        _attn_kernel,
        out_shape=jax.ShapeDtypeStruct((N, L, C), jnp.bfloat16),
        grid_spec=pltpu.PrefetchScalarGridSpec(
            num_scalar_prefetch=0,
            grid=(N, L // tm),
            in_specs=[
                pl.BlockSpec((None, tm, C), lambda n, i: (n, i, 0)),   # x raw
                pl.BlockSpec((1, C), lambda n, i: (0, 0)),             # scale
                pl.BlockSpec((1, C), lambda n, i: (0, 0)),             # shift
                pl.BlockSpec((1, 1), lambda n, i: (0, 0)),             # gamma
                pl.BlockSpec((None, tm, c8), lambda n, i: (n, i, 0)),  # theta
                pl.BlockSpec((None, L4, c8), lambda n, i: (n, 0, 0)),  # phi
                pl.BlockSpec((None, L4, c2), lambda n, i: (n, 0, 0)),  # g
                pl.BlockSpec((c2, C), lambda n, i: (0, 0)),            # w_o
            ],
            out_specs=pl.BlockSpec((None, tm, C), lambda n, i: (n, i, 0))),
        compiler_params=pltpu.CompilerParams(
            dimension_semantics=("parallel", "parallel")),
    )(x_nhwc.reshape(N, L, C), bn_scale, bn_shift,
      jnp.reshape(p["gamma"], (1, 1)).astype(jnp.float32),
      theta, phi, g, p["w_o"])
    return out.reshape(N, H, W, C)


# ----------------------------- Generator ------------------------------------

def generator_forward(x_nchw, params):
    N = x_nchw.shape[0]
    z2d = x_nchw.reshape(N, -1).astype(jnp.float32)    # (N, latentVect); H=W=1

    C1 = params["bn1_g"].shape[0]
    C2 = params["bn2_g"].shape[0]
    C3 = params["bn3_g"].shape[0]
    C4 = params["bn4_g"].shape[0]

    # block 1: ConvT(latent -> 8F, k4, s1, p0) on a 1x1 input == plain GEMM -> 4x4
    y1 = pallas_matmul(z2d, params["w1"])
    x1 = y1.reshape(N, 4, 4, C1).astype(jnp.bfloat16)
    s1, t1 = bn_batch_scale_shift(x1.reshape(-1, C1), params["bn1_g"], params["bn1_b"])

    # block 2 (BN1+ReLU fused into GEMM prologue): -> 8x8, 4F
    x2 = deconv_s2p1(x1, params["w2"], bn_scale=s1, bn_shift=t1).astype(jnp.bfloat16)
    s2, t2 = bn_batch_scale_shift(x2.reshape(-1, C2), params["bn2_g"], params["bn2_b"])

    # block 3: -> 16x16, 2F
    x3 = deconv_s2p1(x2, params["w3"], bn_scale=s2, bn_shift=t2).astype(jnp.bfloat16)
    s3, t3 = bn_batch_scale_shift(x3.reshape(-1, C3), params["bn3_g"], params["bn3_b"])

    # block 4: -> 32x32, F
    x4 = deconv_s2p1(x3, params["w4"], bn_scale=s3, bn_shift=t3).astype(jnp.bfloat16)
    s4, t4 = bn_batch_scale_shift(x4.reshape(-1, C4), params["bn4_g"], params["bn4_b"])

    # self attention on relu(bn4(x4)) at 32x32; BN4+ReLU never materialized
    # (GEMM prologue + in-kernel recompute for the residual).
    xa = self_attn(x4, params["attn"], s4, t4)

    # block 5: -> 64x64, nc, then tanh (after the tap scatter — not fusable
    # into the GEMM epilogue because taps overlap in the output).
    x5 = deconv_s2p1(xa, params["w5"])
    out = tanh_pallas(x5)

    return jnp.transpose(out, (0, 3, 1, 2))            # NHWC -> NCHW


# ----------------------------- parameters -----------------------------------

def spectral_normalize(w, key, n_iter=50, eps=1e-12):
    # torch.nn.utils.spectral_norm: divide by the largest singular value of the
    # (out_channels, -1) weight matrix, estimated with power iteration at
    # parameter-setup time (plain JAX, not on the kernel hot path).
    wm = w.reshape(w.shape[0], -1)
    ku, kv = jax.random.split(key)
    u = jax.random.normal(ku, (wm.shape[0],), jnp.float32)
    v = jax.random.normal(kv, (wm.shape[1],), jnp.float32)
    for _ in range(n_iter):
        v = wm.T @ u
        v = v / (jnp.linalg.norm(v) + eps)
        u = wm @ v
        u = u / (jnp.linalg.norm(u) + eps)
    sigma = u @ wm @ v
    return w / sigma


def init_params(key, latentVect, FeaGen, nc):
    ks = jax.random.split(key, 24)

    def w(k, shape, scale=0.05):
        return scale * jax.random.normal(k, shape, jnp.float32)

    def deconv_mat(wt):
        # PyTorch ConvTranspose2d weight (Cin, Cout, kh, kw)
        #   -> (Cin, kh*kw*Cout) bf16, columns ordered (kh, kw, cout).
        cin, cout, kh, kw = wt.shape
        return jnp.transpose(wt, (0, 2, 3, 1)).reshape(
            cin, kh * kw * cout).astype(jnp.bfloat16)

    def conv1x1_mat(wt):
        # PyTorch Conv2d 1x1 weight (Cout, Cin, 1, 1) -> (Cin, Cout) bf16.
        return wt.reshape(wt.shape[0], wt.shape[1]).T.astype(jnp.bfloat16)

    C1, C2, C3, C4 = FeaGen * 8, FeaGen * 4, FeaGen * 2, FeaGen
    c8, c2 = FeaGen // 8, FeaGen // 2

    w_theta = spectral_normalize(w(ks[13], (c8, FeaGen, 1, 1), 0.2), ks[16])
    w_phi = spectral_normalize(w(ks[14], (c8, FeaGen, 1, 1), 0.2), ks[17])
    w_g = spectral_normalize(w(ks[15], (c2, FeaGen, 1, 1), 0.2), ks[18])
    w_o = spectral_normalize(w(ks[19], (FeaGen, c2, 1, 1), 0.2), ks[20])

    params = {
        "w1": deconv_mat(w(ks[0], (latentVect, C1, 4, 4))),
        "w2": deconv_mat(w(ks[1], (C1, C2, 4, 4))),
        "w3": deconv_mat(w(ks[2], (C2, C3, 4, 4))),
        "w4": deconv_mat(w(ks[3], (C3, C4, 4, 4))),
        "w5": deconv_mat(w(ks[4], (C4, nc, 4, 4))),
        "bn1_g": 1.0 + 0.1 * jax.random.normal(ks[5], (C1,), jnp.float32),
        "bn1_b": 0.1 * jax.random.normal(ks[6], (C1,), jnp.float32),
        "bn2_g": 1.0 + 0.1 * jax.random.normal(ks[7], (C2,), jnp.float32),
        "bn2_b": 0.1 * jax.random.normal(ks[8], (C2,), jnp.float32),
        "bn3_g": 1.0 + 0.1 * jax.random.normal(ks[9], (C3,), jnp.float32),
        "bn3_b": 0.1 * jax.random.normal(ks[10], (C3,), jnp.float32),
        "bn4_g": 1.0 + 0.1 * jax.random.normal(ks[11], (C4,), jnp.float32),
        "bn4_b": 0.1 * jax.random.normal(ks[12], (C4,), jnp.float32),
        "attn": {
            # fused theta|phi|g projection: one GEMM instead of three 1x1 convs
            "w_tpg": jnp.concatenate([conv1x1_mat(w_theta),
                                      conv1x1_mat(w_phi),
                                      conv1x1_mat(w_g)], axis=1),
            "w_o": conv1x1_mat(w_o),
            # matches nn.Parameter(torch.zeros(1)); the attention kernels still
            # execute (gamma is a runtime value) and NaN/Inf would propagate.
            "gamma": jnp.float32(0.0),
        },
    }
    return params


if __name__ == "__main__":
    latentVect, FeaGen, nc, batch = 8, 16, 3, 2
    key = jax.random.PRNGKey(0)
    kp, kx = jax.random.split(key)
    params = init_params(kp, latentVect, FeaGen, nc)
    z = jax.random.normal(kx, (batch, latentVect, 1, 1), jnp.float32)

    out = jax.jit(generator_forward)(z, params)
    out = jax.block_until_ready(out)
    assert out.shape == (batch, nc, 64, 64), out.shape
    assert bool(jnp.all(jnp.isfinite(out)))
    print("KERNEL_OK")
</pallas_src>

<mosaic_0001>
module attributes {stable_mosaic.version = 11 : i64} {
  func.func @_mm_kernel(%arg0: i32, %arg1: i32, %arg2: i32, %arg3: memref<8x8xbf16, #tpu.memory_space<vmem>>, %arg4: memref<8x256xbf16, #tpu.memory_space<vmem>>, %arg5: memref<8x256xf32, #tpu.memory_space<vmem>>) attributes {dimension_semantics = [#tpu.dimension_semantics<parallel>, #tpu.dimension_semantics<parallel>, #tpu.dimension_semantics<arbitrary>], iteration_bounds = array<i64: 1, 8, 1>, scalar_prefetch = 0 : i64, scratch_operands = 0 : i64, tpu.core_type = #tpu.core_type<tc>, window_params = [{transform_indices = @transform_0, window_bounds = array<i64: 8, 8>}, {transform_indices = @transform_1, window_bounds = array<i64: 8, 256>}, {transform_indices = @transform_2, window_bounds = array<i64: 8, 256>}]} {
    %c0_i32 = arith.constant 0 : i32
    %0 = arith.cmpi eq, %arg2, %c0_i32 : i32
    %1 = arith.extui %0 : i1 to i32
    %c0_i32_0 = arith.constant 0 : i32
    %2 = arith.cmpi ne, %1, %c0_i32_0 : i32
    scf.if %2 {
      %cst_8 = arith.constant 0.000000e+00 : f32
      %9 = vector.broadcast %cst_8 : f32 to vector<8x256xf32>
      %c0_9 = arith.constant 0 : index
      %c0_10 = arith.constant 0 : index
      %10 = vector.load %arg5[%c0_9, %c0_10] : memref<8x256xf32, #tpu.memory_space<vmem>>, vector<8x256xf32>
      tpu.vector_store %arg5[%c0_9, %c0_10], %9 {strides = array<i32>} : memref<8x256xf32, #tpu.memory_space<vmem>>, vector<8x256xf32>,
    } else {
    }
    %c0 = arith.constant 0 : index
    %c0_1 = arith.constant 0 : index
    %3 = vector.load %arg5[%c0, %c0_1] : memref<8x256xf32, #tpu.memory_space<vmem>>, vector<8x256xf32>
    %c0_2 = arith.constant 0 : index
    %c0_3 = arith.constant 0 : index
    %4 = vector.load %arg3[%c0_2, %c0_3] : memref<8x8xbf16, #tpu.memory_space<vmem>>, vector<8x8xbf16>
    %c0_4 = arith.constant 0 : index
    %c0_5 = arith.constant 0 : index
    %5 = vector.load %arg4[%c0_4, %c0_5] : memref<8x256xbf16, #tpu.memory_space<vmem>>, vector<8x256xbf16>
    %cst = arith.constant dense<0.000000e+00> : vector<8x256xf32>
    %6 = tpu.matmul %4, %5, %cst {dimension_numbers = #tpu.dot_dimension_numbers<[1], [0], [0], [1], [0, 0, 1, 1], [], []>} : vector<8x8xbf16>, vector<8x256xbf16>, vector<8x256xf32> -> vector<8x256xf32>
    %7 = arith.addf %3, %6 : vector<8x256xf32>
    %c0_6 = arith.constant 0 : index
    %c0_7 = arith.constant 0 : index
    %8 = vector.load %arg5[%c0_6, %c0_7] : memref<8x256xf32, #tpu.memory_space<vmem>>, vector<8x256xf32>
    tpu.vector_store %arg5[%c0_6, %c0_7], %7 {strides = array<i32>} : memref<8x256xf32, #tpu.memory_space<vmem>>, vector<8x256xf32>,
    return
  }
  func.func @transform_0(%arg0: i32, %arg1: i32, %arg2: i32) -> (i32, i32) {
    %c0_i32 = arith.constant 0 : i32
    return %arg0, %arg2 : i32, i32
  }
  func.func @transform_1(%arg0: i32, %arg1: i32, %arg2: i32) -> (i32, i32) {
    %c0_i32 = arith.constant 0 : i32
    return %arg2, %arg1 : i32, i32
  }
  func.func @transform_2(%arg0: i32, %arg1: i32, %arg2: i32) -> (i32, i32) {
    %c0_i32 = arith.constant 0 : i32
    return %arg0, %arg1 : i32, i32
  }
}

module attributes {stable_mosaic.version = 11 : i64} {
  func.func @_bn_stats_kernel(%arg0: i32, %arg1: memref<32x128xbf16, #tpu.memory_space<vmem>>, %arg2: memref<1x128xf32, #tpu.memory_space<vmem>>, %arg3: memref<1x128xf32, #tpu.memory_space<vmem>>) attributes {dimension_semantics = [#tpu.dimension_semantics<arbitrary>], iteration_bounds = array<i64: 1>, scalar_prefetch = 0 : i64, scratch_operands = 0 : i64, tpu.core_type = #tpu.core_type<tc>, window_params = [{transform_indices = @transform_0, window_bounds = array<i64: 32, 128>}, {pipeline_mode = #tpu.pipeline_mode<synchronous>, transform_indices = @transform_1, window_bounds = array<i64: 1, 128>}, {pipeline_mode = #tpu.pipeline_mode<synchronous>, transform_indices = @transform_2, window_bounds = array<i64: 1, 128>}]} {
    %c0_i32 = arith.constant 0 : i32
    %0 = arith.cmpi eq, %arg0, %c0_i32 : i32
    %1 = arith.extui %0 : i1 to i32
    %c0_i32_0 = arith.constant 0 : i32
    %2 = arith.cmpi ne, %1, %c0_i32_0 : i32
    scf.if %2 {
      %cst_11 = arith.constant 0.000000e+00 : f32
      %16 = vector.broadcast %cst_11 : f32 to vector<1x128xf32>
      %c0_12 = arith.constant 0 : index
      %c0_13 = arith.constant 0 : index
      %17 = vector.load %arg2[%c0_12, %c0_13] : memref<1x128xf32, #tpu.memory_space<vmem>>, vector<1x128xf32>
      tpu.vector_store %arg2[%c0_12, %c0_13], %16 {strides = array<i32>} : memref<1x128xf32, #tpu.memory_space<vmem>>, vector<1x128xf32>,
      %cst_14 = arith.constant 0.000000e+00 : f32
      %18 = vector.broadcast %cst_14 : f32 to vector<1x128xf32>
      %c0_15 = arith.constant 0 : index
      %c0_16 = arith.constant 0 : index
      %19 = vector.load %arg3[%c0_15, %c0_16] : memref<1x128xf32, #tpu.memory_space<vmem>>, vector<1x128xf32>
      tpu.vector_store %arg3[%c0_15, %c0_16], %18 {strides = array<i32>} : memref<1x128xf32, #tpu.memory_space<vmem>>, vector<1x128xf32>,
    } else {
    }
    %c0 = arith.constant 0 : index
    %c0_1 = arith.constant 0 : index
    %3 = vector.load %arg1[%c0, %c0_1] : memref<32x128xbf16, #tpu.memory_space<vmem>>, vector<32x128xbf16>
    %4 = arith.extf %3 : vector<32x128xbf16> to vector<32x128xf32>
    %c0_2 = arith.constant 0 : index
    %c0_3 = arith.constant 0 : index
    %5 = vector.load %arg2[%c0_2, %c0_3] : memref<1x128xf32, #tpu.memory_space<vmem>>, vector<1x128xf32>
    %cst = arith.constant dense<0.000000e+00> : vector<128xf32>
    %6 = vector.multi_reduction <add>, %4, %cst [0] : vector<32x128xf32> to vector<128xf32>
    %7 = vector.shape_cast %6 : vector<128xf32> to vector<1x128xf32>
    %8 = arith.addf %5, %7 : vector<1x128xf32>
    %c0_4 = arith.constant 0 : index
    %c0_5 = arith.constant 0 : index
    %9 = vector.load %arg2[%c0_4, %c0_5] : memref<1x128xf32, #tpu.memory_space<vmem>>, vector<1x128xf32>
    tpu.vector_store %arg2[%c0_4, %c0_5], %8 {strides = array<i32>} : memref<1x128xf32, #tpu.memory_space<vmem>>, vector<1x128xf32>,
    %c0_6 = arith.constant 0 : index
    %c0_7 = arith.constant 0 : index
    %10 = vector.load %arg3[%c0_6, %c0_7] : memref<1x128xf32, #tpu.memory_space<vmem>>, vector<1x128xf32>
    %11 = arith.mulf %4, %4 : vector<32x128xf32>
    %cst_8 = arith.constant dense<0.000000e+00> : vector<128xf32>
    %12 = vector.multi_reduction <add>, %11, %cst_8 [0] : vector<32x128xf32> to vector<128xf32>
    %13 = vector.shape_cast %12 : vector<128xf32> to vector<1x128xf32>
    %14 = arith.addf %10, %13 : vector<1x128xf32>
    %c0_9 = arith.constant 0 : index
    %c0_10 = arith.constant 0 : index
    %15 = vector.load %arg3[%c0_9, %c0_10] : memref<1x128xf32, #tpu.memory_space<vmem>>, vector<1x128xf32>
    tpu.vector_store %arg3[%c0_9, %c0_10], %14 {strides = array<i32>} : memref<1x128xf32, #tpu.memory_space<vmem>>, vector<1x128xf32>,
    return
  }
  func.func @transform_0(%arg0: i32) -> (i32, i32) {
    %c0_i32 = arith.constant 0 : i32
    %c0_i32_0 = arith.constant 0 : i32
    return %arg0, %c0_i32 : i32, i32
  }
  func.func @transform_1(%arg0: i32) -> (i32, i32) {
    %c0_i32 = arith.constant 0 : i32
    %c0_i32_0 = arith.constant 0 : i32
    %c0_i32_1 = arith.constant 0 : i32
    return %c0_i32, %c0_i32_0 : i32, i32
  }
  func.func @transform_2(%arg0: i32) -> (i32, i32) {
    %c0_i32 = arith.constant 0 : i32
    %c0_i32_0 = arith.constant 0 : i32
    %c0_i32_1 = arith.constant 0 : i32
    return %c0_i32, %c0_i32_0 : i32, i32
  }
}

module attributes {stable_mosaic.version = 11 : i64} {
  func.func @_mm_bn_relu_kernel(%arg0: i32, %arg1: i32, %arg2: i32, %arg3: memref<1x128xf32, #tpu.memory_space<vmem>>, %arg4: memref<1x128xf32, #tpu.memory_space<vmem>>, %arg5: memref<32x128xbf16, #tpu.memory_space<vmem>>, %arg6: memref<128x256xbf16, #tpu.memory_space<vmem>>, %arg7: memref<32x256xf32, #tpu.memory_space<vmem>>) attributes {dimension_semantics = [#tpu.dimension_semantics<parallel>, #tpu.dimension_semantics<parallel>, #tpu.dimension_semantics<arbitrary>], iteration_bounds = array<i64: 1, 4, 1>, scalar_prefetch = 0 : i64, scratch_operands = 0 : i64, tpu.core_type = #tpu.core_type<tc>, window_params = [{transform_indices = @transform_0, window_bounds = array<i64: 1, 128>}, {transform_indices = @transform_1, window_bounds = array<i64: 1, 128>}, {transform_indices = @transform_2, window_bounds = array<i64: 32, 128>}, {transform_indices = @transform_3, window_bounds = array<i64: 128, 256>}, {transform_indices = @transform_4, window_bounds = array<i64: 32, 256>}]} {
    %c0_i32 = arith.constant 0 : i32
    %0 = arith.cmpi eq, %arg2, %c0_i32 : i32
    %1 = arith.extui %0 : i1 to i32
    %c0_i32_0 = arith.constant 0 : i32
    %2 = arith.cmpi ne, %1, %c0_i32_0 : i32
    scf.if %2 {
      %cst_13 = arith.constant 0.000000e+00 : f32
      %19 = vector.broadcast %cst_13 : f32 to vector<32x256xf32>
      %c0_14 = arith.constant 0 : index
      %c0_15 = arith.constant 0 : index
      %20 = vector.load %arg7[%c0_14, %c0_15] : memref<32x256xf32, #tpu.memory_space<vmem>>, vector<32x256xf32>
      tpu.vector_store %arg7[%c0_14, %c0_15], %19 {strides = array<i32>} : memref<32x256xf32, #tpu.memory_space<vmem>>, vector<32x256xf32>,
    } else {
    }
    %c0 = arith.constant 0 : index
    %c0_1 = arith.constant 0 : index
    %3 = vector.load %arg5[%c0, %c0_1] : memref<32x128xbf16, #tpu.memory_space<vmem>>, vector<32x128xbf16>
    %4 = arith.extf %3 : vector<32x128xbf16> to vector<32x128xf32>
    %c0_2 = arith.constant 0 : index
    %c0_3 = arith.constant 0 : index
    %5 = vector.load %arg3[%c0_2, %c0_3] : memref<1x128xf32, #tpu.memory_space<vmem>>, vector<1x128xf32>
    %6 = vector.broadcast %5 : vector<1x128xf32> to vector<32x128xf32>
    %7 = arith.mulf %4, %6 : vector<32x128xf32>
    %c0_4 = arith.constant 0 : index
    %c0_5 = arith.constant 0 : index
    %8 = vector.load %arg4[%c0_4, %c0_5] : memref<1x128xf32, #tpu.memory_space<vmem>>, vector<1x128xf32>
    %9 = vector.broadcast %8 : vector<1x128xf32> to vector<32x128xf32>
    %10 = arith.addf %7, %9 : vector<32x128xf32>
    %cst = arith.constant 0.000000e+00 : f32
    %11 = vector.broadcast %cst : f32 to vector<32x128xf32>
    %12 = arith.maximumf %10, %11 : vector<32x128xf32>
    %13 = arith.truncf %12 : vector<32x128xf32> to vector<32x128xbf16>
    %c0_6 = arith.constant 0 : index
    %c0_7 = arith.constant 0 : index
    %14 = vector.load %arg7[%c0_6, %c0_7] : memref<32x256xf32, #tpu.memory_space<vmem>>, vector<32x256xf32>
    %c0_8 = arith.constant 0 : index
    %c0_9 = arith.constant 0 : index
    %15 = vector.load %arg6[%c0_8, %c0_9] : memref<128x256xbf16, #tpu.memory_space<vmem>>, vector<128x256xbf16>
    %cst_10 = arith.constant dense<0.000000e+00> : vector<32x256xf32>
    %16 = tpu.matmul %13, %15, %cst_10 {dimension_numbers = #tpu.dot_dimension_numbers<[1], [0], [0], [1], [0, 0, 1, 1], [], []>} : vector<32x128xbf16>, vector<128x256xbf16>, vector<32x256xf32> -> vector<32x256xf32>
    %17 = arith.addf %14, %16 : vector<32x256xf32>
    %c0_11 = arith.constant 0 : index
    %c0_12 = arith.constant 0 : index
    %18 = vector.load %arg7[%c0_11, %c0_12] : memref<32x256xf32, #tpu.memory_space<vmem>>, vector<32x256xf32>
    tpu.vector_store %arg7[%c0_11, %c0_12], %17 {strides = array<i32>} : memref<32x256xf32, #tpu.memory_space<vmem>>, vector<32x256xf32>,
    return
  }
  func.func @transform_0(%arg0: i32, %arg1: i32, %arg2: i32) -> (i32, i32) {
    %c0_i32 = arith.constant 0 : i32
    %c0_i32_0 = arith.constant 0 : i32
    return %c0_i32, %arg2 : i32, i32
  }
  func.func @transform_1(%arg0: i32, %arg1: i32, %arg2: i32) -> (i32, i32) {
    %c0_i32 = arith.constant 0 : i32
    %c0_i32_0 = arith.constant 0 : i32
    return %c0_i32, %arg2 : i32, i32
  }
  func.func @transform_2(%arg0: i32, %arg1: i32, %arg2: i32) -> (i32, i32) {
    %c0_i32 = arith.constant 0 : i32
    return %arg0, %arg2 : i32, i32
  }
  func.func @transform_3(%arg0: i32, %arg1: i32, %arg2: i32) -> (i32, i32) {
    %c0_i32 = arith.constant 0 : i32
    return %arg2, %arg1 : i32, i32
  }
  func.func @transform_4(%arg0: i32, %arg1: i32, %arg2: i32) -> (i32, i32) {
    %c0_i32 = arith.constant 0 : i32
    return %arg0, %arg1 : i32, i32
  }
}

module attributes {stable_mosaic.version = 11 : i64} {
  func.func @_bn_stats_kernel(%arg0: i32, %arg1: memref<128x64xbf16, #tpu.memory_space<vmem>>, %arg2: memref<1x64xf32, #tpu.memory_space<vmem>>, %arg3: memref<1x64xf32, #tpu.memory_space<vmem>>) attributes {dimension_semantics = [#tpu.dimension_semantics<arbitrary>], iteration_bounds = array<i64: 1>, scalar_prefetch = 0 : i64, scratch_operands = 0 : i64, tpu.core_type = #tpu.core_type<tc>, window_params = [{transform_indices = @transform_0, window_bounds = array<i64: 128, 64>}, {pipeline_mode = #tpu.pipeline_mode<synchronous>, transform_indices = @transform_1, window_bounds = array<i64: 1, 64>}, {pipeline_mode = #tpu.pipeline_mode<synchronous>, transform_indices = @transform_2, window_bounds = array<i64: 1, 64>}]} {
    %c0_i32 = arith.constant 0 : i32
    %0 = arith.cmpi eq, %arg0, %c0_i32 : i32
    %1 = arith.extui %0 : i1 to i32
    %c0_i32_0 = arith.constant 0 : i32
    %2 = arith.cmpi ne, %1, %c0_i32_0 : i32
    scf.if %2 {
      %cst_11 = arith.constant 0.000000e+00 : f32
      %16 = vector.broadcast %cst_11 : f32 to vector<1x64xf32>
      %c0_12 = arith.constant 0 : index
      %c0_13 = arith.constant 0 : index
      %17 = vector.load %arg2[%c0_12, %c0_13] : memref<1x64xf32, #tpu.memory_space<vmem>>, vector<1x64xf32>
      tpu.vector_store %arg2[%c0_12, %c0_13], %16 {strides = array<i32>} : memref<1x64xf32, #tpu.memory_space<vmem>>, vector<1x64xf32>,
      %cst_14 = arith.constant 0.000000e+00 : f32
      %18 = vector.broadcast %cst_14 : f32 to vector<1x64xf32>
      %c0_15 = arith.constant 0 : index
      %c0_16 = arith.constant 0 : index
      %19 = vector.load %arg3[%c0_15, %c0_16] : memref<1x64xf32, #tpu.memory_space<vmem>>, vector<1x64xf32>
      tpu.vector_store %arg3[%c0_15, %c0_16], %18 {strides = array<i32>} : memref<1x64xf32, #tpu.memory_space<vmem>>, vector<1x64xf32>,
    } else {
    }
    %c0 = arith.constant 0 : index
    %c0_1 = arith.constant 0 : index
    %3 = vector.load %arg1[%c0, %c0_1] : memref<128x64xbf16, #tpu.memory_space<vmem>>, vector<128x64xbf16>
    %4 = arith.extf %3 : vector<128x64xbf16> to vector<128x64xf32>
    %c0_2 = arith.constant 0 : index
    %c0_3 = arith.constant 0 : index
    %5 = vector.load %arg2[%c0_2, %c0_3] : memref<1x64xf32, #tpu.memory_space<vmem>>, vector<1x64xf32>
    %cst = arith.constant dense<0.000000e+00> : vector<64xf32>
    %6 = vector.multi_reduction <add>, %4, %cst [0] : vector<128x64xf32> to vector<64xf32>
    %7 = vector.shape_cast %6 : vector<64xf32> to vector<1x64xf32>
    %8 = arith.addf %5, %7 : vector<1x64xf32>
    %c0_4 = arith.constant 0 : index
    %c0_5 = arith.constant 0 : index
    %9 = vector.load %arg2[%c0_4, %c0_5] : memref<1x64xf32, #tpu.memory_space<vmem>>, vector<1x64xf32>
    tpu.vector_store %arg2[%c0_4, %c0_5], %8 {strides = array<i32>} : memref<1x64xf32, #tpu.memory_space<vmem>>, vector<1x64xf32>,
    %c0_6 = arith.constant 0 : index
    %c0_7 = arith.constant 0 : index
    %10 = vector.load %arg3[%c0_6, %c0_7] : memref<1x64xf32, #tpu.memory_space<vmem>>, vector<1x64xf32>
    %11 = arith.mulf %4, %4 : vector<128x64xf32>
    %cst_8 = arith.constant dense<0.000000e+00> : vector<64xf32>
    %12 = vector.multi_reduction <add>, %11, %cst_8 [0] : vector<128x64xf32> to vector<64xf32>
    %13 = vector.shape_cast %12 : vector<64xf32> to vector<1x64xf32>
    %14 = arith.addf %10, %13 : vector<1x64xf32>
    %c0_9 = arith.constant 0 : index
    %c0_10 = arith.constant 0 : index
    %15 = vector.load %arg3[%c0_9, %c0_10] : memref<1x64xf32, #tpu.memory_space<vmem>>, vector<1x64xf32>
    tpu.vector_store %arg3[%c0_9, %c0_10], %14 {strides = array<i32>} : memref<1x64xf32, #tpu.memory_space<vmem>>, vector<1x64xf32>,
    return
  }
  func.func @transform_0(%arg0: i32) -> (i32, i32) {
    %c0_i32 = arith.constant 0 : i32
    %c0_i32_0 = arith.constant 0 : i32
    return %arg0, %c0_i32 : i32, i32
  }
  func.func @transform_1(%arg0: i32) -> (i32, i32) {
    %c0_i32 = arith.constant 0 : i32
    %c0_i32_0 = arith.constant 0 : i32
    %c0_i32_1 = arith.constant 0 : i32
    return %c0_i32, %c0_i32_0 : i32, i32
  }
  func.func @transform_2(%arg0: i32) -> (i32, i32) {
    %c0_i32 = arith.constant 0 : i32
    %c0_i32_0 = arith.constant 0 : i32
    %c0_i32_1 = arith.constant 0 : i32
    return %c0_i32, %c0_i32_0 : i32, i32
  }
}

module attributes {stable_mosaic.version = 11 : i64} {
  func.func @_mm_bn_relu_kernel(%arg0: i32, %arg1: i32, %arg2: i32, %arg3: memref<1x64xf32, #tpu.memory_space<vmem>>, %arg4: memref<1x64xf32, #tpu.memory_space<vmem>>, %arg5: memref<128x64xbf16, #tpu.memory_space<vmem>>, %arg6: memref<64x256xbf16, #tpu.memory_space<vmem>>, %arg7: memref<128x256xf32, #tpu.memory_space<vmem>>) attributes {dimension_semantics = [#tpu.dimension_semantics<parallel>, #tpu.dimension_semantics<parallel>, #tpu.dimension_semantics<arbitrary>], iteration_bounds = array<i64: 1, 2, 1>, scalar_prefetch = 0 : i64, scratch_operands = 0 : i64, tpu.core_type = #tpu.core_type<tc>, window_params = [{transform_indices = @transform_0, window_bounds = array<i64: 1, 64>}, {transform_indices = @transform_1, window_bounds = array<i64: 1, 64>}, {transform_indices = @transform_2, window_bounds = array<i64: 128, 64>}, {transform_indices = @transform_3, window_bounds = array<i64: 64, 256>}, {transform_indices = @transform_4, window_bounds = array<i64: 128, 256>}]} {
    %c0_i32 = arith.constant 0 : i32
    %0 = arith.cmpi eq, %arg2, %c0_i32 : i32
    %1 = arith.extui %0 : i1 to i32
    %c0_i32_0 = arith.constant 0 : i32
    %2 = arith.cmpi ne, %1, %c0_i32_0 : i32
    scf.if %2 {
      %cst_13 = arith.constant 0.000000e+00 : f32
      %19 = vector.broadcast %cst_13 : f32 to vector<128x256xf32>
      %c0_14 = arith.constant 0 : index
      %c0_15 = arith.constant 0 : index
      %20 = vector.load %arg7[%c0_14, %c0_15] : memref<128x256xf32, #tpu.memory_space<vmem>>, vector<128x256xf32>
      tpu.vector_store %arg7[%c0_14, %c0_15], %19 {strides = array<i32>} : memref<128x256xf32, #tpu.memory_space<vmem>>, vector<128x256xf32>,
    } else {
    }
    %c0 = arith.constant 0 : index
    %c0_1 = arith.constant 0 : index
    %3 = vector.load %arg5[%c0, %c0_1] : memref<128x64xbf16, #tpu.memory_space<vmem>>, vector<128x64xbf16>
    %4 = arith.extf %3 : vector<128x64xbf16> to vector<128x64xf32>
    %c0_2 = arith.constant 0 : index
    %c0_3 = arith.constant 0 : index
    %5 = vector.load %arg3[%c0_2, %c0_3] : memref<1x64xf32, #tpu.memory_space<vmem>>, vector<1x64xf32>
    %6 = vector.broadcast %5 : vector<1x64xf32> to vector<128x64xf32>
    %7 = arith.mulf %4, %6 : vector<128x64xf32>
    %c0_4 = arith.constant 0 : index
    %c0_5 = arith.constant 0 : index
    %8 = vector.load %arg4[%c0_4, %c0_5] : memref<1x64xf32, #tpu.memory_space<vmem>>, vector<1x64xf32>
    %9 = vector.broadcast %8 : vector<1x64xf32> to vector<128x64xf32>
    %10 = arith.addf %7, %9 : vector<128x64xf32>
    %cst = arith.constant 0.000000e+00 : f32
    %11 = vector.broadcast %cst : f32 to vector<128x64xf32>
    %12 = arith.maximumf %10, %11 : vector<128x64xf32>
    %13 = arith.truncf %12 : vector<128x64xf32> to vector<128x64xbf16>
    %c0_6 = arith.constant 0 : index
    %c0_7 = arith.constant 0 : index
    %14 = vector.load %arg7[%c0_6, %c0_7] : memref<128x256xf32, #tpu.memory_space<vmem>>, vector<128x256xf32>
    %c0_8 = arith.constant 0 : index
    %c0_9 = arith.constant 0 : index
    %15 = vector.load %arg6[%c0_8, %c0_9] : memref<64x256xbf16, #tpu.memory_space<vmem>>, vector<64x256xbf16>
    %cst_10 = arith.constant dense<0.000000e+00> : vector<128x256xf32>
    %16 = tpu.matmul %13, %15, %cst_10 {dimension_numbers = #tpu.dot_dimension_numbers<[1], [0], [0], [1], [0, 0, 1, 1], [], []>} : vector<128x64xbf16>, vector<64x256xbf16>, vector<128x256xf32> -> vector<128x256xf32>
    %17 = arith.addf %14, %16 : vector<128x256xf32>
    %c0_11 = arith.constant 0 : index
    %c0_12 = arith.constant 0 : index
    %18 = vector.load %arg7[%c0_11, %c0_12] : memref<128x256xf32, #tpu.memory_space<vmem>>, vector<128x256xf32>
    tpu.vector_store %arg7[%c0_11, %c0_12], %17 {strides = array<i32>} : memref<128x256xf32, #tpu.memory_space<vmem>>, vector<128x256xf32>,
    return
  }
  func.func @transform_0(%arg0: i32, %arg1: i32, %arg2: i32) -> (i32, i32) {
    %c0_i32 = arith.constant 0 : i32
    %c0_i32_0 = arith.constant 0 : i32
    return %c0_i32, %arg2 : i32, i32
  }
  func.func @transform_1(%arg0: i32, %arg1: i32, %arg2: i32) -> (i32, i32) {
    %c0_i32 = arith.constant 0 : i32
    %c0_i32_0 = arith.constant 0 : i32
    return %c0_i32, %arg2 : i32, i32
  }
  func.func @transform_2(%arg0: i32, %arg1: i32, %arg2: i32) -> (i32, i32) {
    %c0_i32 = arith.constant 0 : i32
    return %arg0, %arg2 : i32, i32
  }
  func.func @transform_3(%arg0: i32, %arg1: i32, %arg2: i32) -> (i32, i32) {
    %c0_i32 = arith.constant 0 : i32
    return %arg2, %arg1 : i32, i32
  }
  func.func @transform_4(%arg0: i32, %arg1: i32, %arg2: i32) -> (i32, i32) {
    %c0_i32 = arith.constant 0 : i32
    return %arg0, %arg1 : i32, i32
  }
}

module attributes {stable_mosaic.version = 11 : i64} {
  func.func @_bn_stats_kernel(%arg0: i32, %arg1: memref<512x32xbf16, #tpu.memory_space<vmem>>, %arg2: memref<1x32xf32, #tpu.memory_space<vmem>>, %arg3: memref<1x32xf32, #tpu.memory_space<vmem>>) attributes {dimension_semantics = [#tpu.dimension_semantics<arbitrary>], iteration_bounds = array<i64: 1>, scalar_prefetch = 0 : i64, scratch_operands = 0 : i64, tpu.core_type = #tpu.core_type<tc>, window_params = [{transform_indices = @transform_0, window_bounds = array<i64: 512, 32>}, {pipeline_mode = #tpu.pipeline_mode<synchronous>, transform_indices = @transform_1, window_bounds = array<i64: 1, 32>}, {pipeline_mode = #tpu.pipeline_mode<synchronous>, transform_indices = @transform_2, window_bounds = array<i64: 1, 32>}]} {
    %c0_i32 = arith.constant 0 : i32
    %0 = arith.cmpi eq, %arg0, %c0_i32 : i32
    %1 = arith.extui %0 : i1 to i32
    %c0_i32_0 = arith.constant 0 : i32
    %2 = arith.cmpi ne, %1, %c0_i32_0 : i32
    scf.if %2 {
      %cst_11 = arith.constant 0.000000e+00 : f32
      %16 = vector.broadcast %cst_11 : f32 to vector<1x32xf32>
      %c0_12 = arith.constant 0 : index
      %c0_13 = arith.constant 0 : index
      %17 = vector.load %arg2[%c0_12, %c0_13] : memref<1x32xf32, #tpu.memory_space<vmem>>, vector<1x32xf32>
      tpu.vector_store %arg2[%c0_12, %c0_13], %16 {strides = array<i32>} : memref<1x32xf32, #tpu.memory_space<vmem>>, vector<1x32xf32>,
      %cst_14 = arith.constant 0.000000e+00 : f32
      %18 = vector.broadcast %cst_14 : f32 to vector<1x32xf32>
      %c0_15 = arith.constant 0 : index
      %c0_16 = arith.constant 0 : index
      %19 = vector.load %arg3[%c0_15, %c0_16] : memref<1x32xf32, #tpu.memory_space<vmem>>, vector<1x32xf32>
      tpu.vector_store %arg3[%c0_15, %c0_16], %18 {strides = array<i32>} : memref<1x32xf32, #tpu.memory_space<vmem>>, vector<1x32xf32>,
    } else {
    }
    %c0 = arith.constant 0 : index
    %c0_1 = arith.constant 0 : index
    %3 = vector.load %arg1[%c0, %c0_1] : memref<512x32xbf16, #tpu.memory_space<vmem>>, vector<512x32xbf16>
    %4 = arith.extf %3 : vector<512x32xbf16> to vector<512x32xf32>
    %c0_2 = arith.constant 0 : index
    %c0_3 = arith.constant 0 : index
    %5 = vector.load %arg2[%c0_2, %c0_3] : memref<1x32xf32, #tpu.memory_space<vmem>>, vector<1x32xf32>
    %cst = arith.constant dense<0.000000e+00> : vector<32xf32>
    %6 = vector.multi_reduction <add>, %4, %cst [0] : vector<512x32xf32> to vector<32xf32>
    %7 = vector.shape_cast %6 : vector<32xf32> to vector<1x32xf32>
    %8 = arith.addf %5, %7 : vector<1x32xf32>
    %c0_4 = arith.constant 0 : index
    %c0_5 = arith.constant 0 : index
    %9 = vector.load %arg2[%c0_4, %c0_5] : memref<1x32xf32, #tpu.memory_space<vmem>>, vector<1x32xf32>
    tpu.vector_store %arg2[%c0_4, %c0_5], %8 {strides = array<i32>} : memref<1x32xf32, #tpu.memory_space<vmem>>, vector<1x32xf32>,
    %c0_6 = arith.constant 0 : index
    %c0_7 = arith.constant 0 : index
    %10 = vector.load %arg3[%c0_6, %c0_7] : memref<1x32xf32, #tpu.memory_space<vmem>>, vector<1x32xf32>
    %11 = arith.mulf %4, %4 : vector<512x32xf32>
    %cst_8 = arith.constant dense<0.000000e+00> : vector<32xf32>
    %12 = vector.multi_reduction <add>, %11, %cst_8 [0] : vector<512x32xf32> to vector<32xf32>
    %13 = vector.shape_cast %12 : vector<32xf32> to vector<1x32xf32>
    %14 = arith.addf %10, %13 : vector<1x32xf32>
    %c0_9 = arith.constant 0 : index
    %c0_10 = arith.constant 0 : index
    %15 = vector.load %arg3[%c0_9, %c0_10] : memref<1x32xf32, #tpu.memory_space<vmem>>, vector<1x32xf32>
    tpu.vector_store %arg3[%c0_9, %c0_10], %14 {strides = array<i32>} : memref<1x32xf32, #tpu.memory_space<vmem>>, vector<1x32xf32>,
    return
  }
  func.func @transform_0(%arg0: i32) -> (i32, i32) {
    %c0_i32 = arith.constant 0 : i32
    %c0_i32_0 = arith.constant 0 : i32
    return %arg0, %c0_i32 : i32, i32
  }
  func.func @transform_1(%arg0: i32) -> (i32, i32) {
    %c0_i32 = arith.constant 0 : i32
    %c0_i32_0 = arith.constant 0 : i32
    %c0_i32_1 = arith.constant 0 : i32
    return %c0_i32, %c0_i32_0 : i32, i32
  }
  func.func @transform_2(%arg0: i32) -> (i32, i32) {
    %c0_i32 = arith.constant 0 : i32
    %c0_i32_0 = arith.constant 0 : i32
    %c0_i32_1 = arith.constant 0 : i32
    return %c0_i32, %c0_i32_0 : i32, i32
  }
}

module attributes {stable_mosaic.version = 11 : i64} {
  func.func @_mm_bn_relu_kernel(%arg0: i32, %arg1: i32, %arg2: i32, %arg3: memref<1x32xf32, #tpu.memory_space<vmem>>, %arg4: memref<1x32xf32, #tpu.memory_space<vmem>>, %arg5: memref<128x32xbf16, #tpu.memory_space<vmem>>, %arg6: memref<32x128xbf16, #tpu.memory_space<vmem>>, %arg7: memref<128x128xf32, #tpu.memory_space<vmem>>) attributes {dimension_semantics = [#tpu.dimension_semantics<parallel>, #tpu.dimension_semantics<parallel>, #tpu.dimension_semantics<arbitrary>], iteration_bounds = array<i64: 4, 2, 1>, scalar_prefetch = 0 : i64, scratch_operands = 0 : i64, tpu.core_type = #tpu.core_type<tc>, window_params = [{transform_indices = @transform_0, window_bounds = array<i64: 1, 32>}, {transform_indices = @transform_1, window_bounds = array<i64: 1, 32>}, {transform_indices = @transform_2, window_bounds = array<i64: 128, 32>}, {transform_indices = @transform_3, window_bounds = array<i64: 32, 128>}, {transform_indices = @transform_4, window_bounds = array<i64: 128, 128>}]} {
    %c0_i32 = arith.constant 0 : i32
    %0 = arith.cmpi eq, %arg2, %c0_i32 : i32
    %1 = arith.extui %0 : i1 to i32
    %c0_i32_0 = arith.constant 0 : i32
    %2 = arith.cmpi ne, %1, %c0_i32_0 : i32
    scf.if %2 {
      %cst_13 = arith.constant 0.000000e+00 : f32
      %19 = vector.broadcast %cst_13 : f32 to vector<128x128xf32>
      %c0_14 = arith.constant 0 : index
      %c0_15 = arith.constant 0 : index
      %20 = vector.load %arg7[%c0_14, %c0_15] : memref<128x128xf32, #tpu.memory_space<vmem>>, vector<128x128xf32>
      tpu.vector_store %arg7[%c0_14, %c0_15], %19 {strides = array<i32>} : memref<128x128xf32, #tpu.memory_space<vmem>>, vector<128x128xf32>,
    } else {
    }
    %c0 = arith.constant 0 : index
    %c0_1 = arith.constant 0 : index
    %3 = vector.load %arg5[%c0, %c0_1] : memref<128x32xbf16, #tpu.memory_space<vmem>>, vector<128x32xbf16>
    %4 = arith.extf %3 : vector<128x32xbf16> to vector<128x32xf32>
    %c0_2 = arith.constant 0 : index
    %c0_3 = arith.constant 0 : index
    %5 = vector.load %arg3[%c0_2, %c0_3] : memref<1x32xf32, #tpu.memory_space<vmem>>, vector<1x32xf32>
    %6 = vector.broadcast %5 : vector<1x32xf32> to vector<128x32xf32>
    %7 = arith.mulf %4, %6 : vector<128x32xf32>
    %c0_4 = arith.constant 0 : index
    %c0_5 = arith.constant 0 : index
    %8 = vector.load %arg4[%c0_4, %c0_5] : memref<1x32xf32, #tpu.memory_space<vmem>>, vector<1x32xf32>
    %9 = vector.broadcast %8 : vector<1x32xf32> to vector<128x32xf32>
    %10 = arith.addf %7, %9 : vector<128x32xf32>
    %cst = arith.constant 0.000000e+00 : f32
    %11 = vector.broadcast %cst : f32 to vector<128x32xf32>
    %12 = arith.maximumf %10, %11 : vector<128x32xf32>
    %13 = arith.truncf %12 : vector<128x32xf32> to vector<128x32xbf16>
    %c0_6 = arith.constant 0 : index
    %c0_7 = arith.constant 0 : index
    %14 = vector.load %arg7[%c0_6, %c0_7] : memref<128x128xf32, #tpu.memory_space<vmem>>, vector<128x128xf32>
    %c0_8 = arith.constant 0 : index
    %c0_9 = arith.constant 0 : index
    %15 = vector.load %arg6[%c0_8, %c0_9] : memref<32x128xbf16, #tpu.memory_space<vmem>>, vector<32x128xbf16>
    %cst_10 = arith.constant dense<0.000000e+00> : vector<128x128xf32>
    %16 = tpu.matmul %13, %15, %cst_10 {dimension_numbers = #tpu.dot_dimension_numbers<[1], [0], [0], [1], [0, 0, 1, 1], [], []>} : vector<128x32xbf16>, vector<32x128xbf16>, vector<128x128xf32> -> vector<128x128xf32>
    %17 = arith.addf %14, %16 : vector<128x128xf32>
    %c0_11 = arith.constant 0 : index
    %c0_12 = arith.constant 0 : index
    %18 = vector.load %arg7[%c0_11, %c0_12] : memref<128x128xf32, #tpu.memory_space<vmem>>, vector<128x128xf32>
    tpu.vector_store %arg7[%c0_11, %c0_12], %17 {strides = array<i32>} : memref<128x128xf32, #tpu.memory_space<vmem>>, vector<128x128xf32>,
    return
  }
  func.func @transform_0(%arg0: i32, %arg1: i32, %arg2: i32) -> (i32, i32) {
    %c0_i32 = arith.constant 0 : i32
    %c0_i32_0 = arith.constant 0 : i32
    return %c0_i32, %arg2 : i32, i32
  }
  func.func @transform_1(%arg0: i32, %arg1: i32, %arg2: i32) -> (i32, i32) {
    %c0_i32 = arith.constant 0 : i32
    %c0_i32_0 = arith.constant 0 : i32
    return %c0_i32, %arg2 : i32, i32
  }
  func.func @transform_2(%arg0: i32, %arg1: i32, %arg2: i32) -> (i32, i32) {
    %c0_i32 = arith.constant 0 : i32
    return %arg0, %arg2 : i32, i32
  }
  func.func @transform_3(%arg0: i32, %arg1: i32, %arg2: i32) -> (i32, i32) {
    %c0_i32 = arith.constant 0 : i32
    return %arg2, %arg1 : i32, i32
  }
  func.func @transform_4(%arg0: i32, %arg1: i32, %arg2: i32) -> (i32, i32) {
    %c0_i32 = arith.constant 0 : i32
    return %arg0, %arg1 : i32, i32
  }
}

module attributes {stable_mosaic.version = 11 : i64} {
  func.func @_bn_stats_kernel(%arg0: i32, %arg1: memref<512x16xbf16, #tpu.memory_space<vmem>>, %arg2: memref<1x16xf32, #tpu.memory_space<vmem>>, %arg3: memref<1x16xf32, #tpu.memory_space<vmem>>) attributes {dimension_semantics = [#tpu.dimension_semantics<arbitrary>], iteration_bounds = array<i64: 4>, scalar_prefetch = 0 : i64, scratch_operands = 0 : i64, tpu.core_type = #tpu.core_type<tc>, window_params = [{transform_indices = @transform_0, window_bounds = array<i64: 512, 16>}, {pipeline_mode = #tpu.pipeline_mode<synchronous>, transform_indices = @transform_1, window_bounds = array<i64: 1, 16>}, {pipeline_mode = #tpu.pipeline_mode<synchronous>, transform_indices = @transform_2, window_bounds = array<i64: 1, 16>}]} {
    %c0_i32 = arith.constant 0 : i32
    %0 = arith.cmpi eq, %arg0, %c0_i32 : i32
    %1 = arith.extui %0 : i1 to i32
    %c0_i32_0 = arith.constant 0 : i32
    %2 = arith.cmpi ne, %1, %c0_i32_0 : i32
    scf.if %2 {
      %cst_11 = arith.constant 0.000000e+00 : f32
      %16 = vector.broadcast %cst_11 : f32 to vector<1x16xf32>
      %c0_12 = arith.constant 0 : index
      %c0_13 = arith.constant 0 : index
      %17 = vector.load %arg2[%c0_12, %c0_13] : memref<1x16xf32, #tpu.memory_space<vmem>>, vector<1x16xf32>
      tpu.vector_store %arg2[%c0_12, %c0_13], %16 {strides = array<i32>} : memref<1x16xf32, #tpu.memory_space<vmem>>, vector<1x16xf32>,
      %cst_14 = arith.constant 0.000000e+00 : f32
      %18 = vector.broadcast %cst_14 : f32 to vector<1x16xf32>
      %c0_15 = arith.constant 0 : index
      %c0_16 = arith.constant 0 : index
      %19 = vector.load %arg3[%c0_15, %c0_16] : memref<1x16xf32, #tpu.memory_space<vmem>>, vector<1x16xf32>
      tpu.vector_store %arg3[%c0_15, %c0_16], %18 {strides = array<i32>} : memref<1x16xf32, #tpu.memory_space<vmem>>, vector<1x16xf32>,
    } else {
    }
    %c0 = arith.constant 0 : index
    %c0_1 = arith.constant 0 : index
    %3 = vector.load %arg1[%c0, %c0_1] : memref<512x16xbf16, #tpu.memory_space<vmem>>, vector<512x16xbf16>
    %4 = arith.extf %3 : vector<512x16xbf16> to vector<512x16xf32>
    %c0_2 = arith.constant 0 : index
    %c0_3 = arith.constant 0 : index
    %5 = vector.load %arg2[%c0_2, %c0_3] : memref<1x16xf32, #tpu.memory_space<vmem>>, vector<1x16xf32>
    %cst = arith.constant dense<0.000000e+00> : vector<16xf32>
    %6 = vector.multi_reduction <add>, %4, %cst [0] : vector<512x16xf32> to vector<16xf32>
    %7 = vector.shape_cast %6 : vector<16xf32> to vector<1x16xf32>
    %8 = arith.addf %5, %7 : vector<1x16xf32>
    %c0_4 = arith.constant 0 : index
    %c0_5 = arith.constant 0 : index
    %9 = vector.load %arg2[%c0_4, %c0_5] : memref<1x16xf32, #tpu.memory_space<vmem>>, vector<1x16xf32>
    tpu.vector_store %arg2[%c0_4, %c0_5], %8 {strides = array<i32>} : memref<1x16xf32, #tpu.memory_space<vmem>>, vector<1x16xf32>,
    %c0_6 = arith.constant 0 : index
    %c0_7 = arith.constant 0 : index
    %10 = vector.load %arg3[%c0_6, %c0_7] : memref<1x16xf32, #tpu.memory_space<vmem>>, vector<1x16xf32>
    %11 = arith.mulf %4, %4 : vector<512x16xf32>
    %cst_8 = arith.constant dense<0.000000e+00> : vector<16xf32>
    %12 = vector.multi_reduction <add>, %11, %cst_8 [0] : vector<512x16xf32> to vector<16xf32>
    %13 = vector.shape_cast %12 : vector<16xf32> to vector<1x16xf32>
    %14 = arith.addf %10, %13 : vector<1x16xf32>
    %c0_9 = arith.constant 0 : index
    %c0_10 = arith.constant 0 : index
    %15 = vector.load %arg3[%c0_9, %c0_10] : memref<1x16xf32, #tpu.memory_space<vmem>>, vector<1x16xf32>
    tpu.vector_store %arg3[%c0_9, %c0_10], %14 {strides = array<i32>} : memref<1x16xf32, #tpu.memory_space<vmem>>, vector<1x16xf32>,
    return
  }
  func.func @transform_0(%arg0: i32) -> (i32, i32) {
    %c0_i32 = arith.constant 0 : i32
    %c0_i32_0 = arith.constant 0 : i32
    return %arg0, %c0_i32 : i32, i32
  }
  func.func @transform_1(%arg0: i32) -> (i32, i32) {
    %c0_i32 = arith.constant 0 : i32
    %c0_i32_0 = arith.constant 0 : i32
    %c0_i32_1 = arith.constant 0 : i32
    return %c0_i32, %c0_i32_0 : i32, i32
  }
  func.func @transform_2(%arg0: i32) -> (i32, i32) {
    %c0_i32 = arith.constant 0 : i32
    %c0_i32_0 = arith.constant 0 : i32
    %c0_i32_1 = arith.constant 0 : i32
    return %c0_i32, %c0_i32_0 : i32, i32
  }
}

module attributes {stable_mosaic.version = 11 : i64} {
  func.func @_mm_bn_relu_kernel(%arg0: i32, %arg1: i32, %arg2: i32, %arg3: memref<1x16xf32, #tpu.memory_space<vmem>>, %arg4: memref<1x16xf32, #tpu.memory_space<vmem>>, %arg5: memref<128x16xbf16, #tpu.memory_space<vmem>>, %arg6: memref<16x12xbf16, #tpu.memory_space<vmem>>, %arg7: memref<128x12xf32, #tpu.memory_space<vmem>>) attributes {dimension_semantics = [#tpu.dimension_semantics<parallel>, #tpu.dimension_semantics<parallel>, #tpu.dimension_semantics<arbitrary>], iteration_bounds = array<i64: 16, 1, 1>, scalar_prefetch = 0 : i64, scratch_operands = 0 : i64, tpu.core_type = #tpu.core_type<tc>, window_params = [{transform_indices = @transform_0, window_bounds = array<i64: 1, 16>}, {transform_indices = @transform_1, window_bounds = array<i64: 1, 16>}, {transform_indices = @transform_2, window_bounds = array<i64: 128, 16>}, {transform_indices = @transform_3, window_bounds = array<i64: 16, 12>}, {transform_indices = @transform_4, window_bounds = array<i64: 128, 12>}]} {
    %c0_i32 = arith.constant 0 : i32
    %0 = arith.cmpi eq, %arg2, %c0_i32 : i32
    %1 = arith.extui %0 : i1 to i32
    %c0_i32_0 = arith.constant 0 : i32
    %2 = arith.cmpi ne, %1, %c0_i32_0 : i32
    scf.if %2 {
      %cst_13 = arith.constant 0.000000e+00 : f32
      %19 = vector.broadcast %cst_13 : f32 to vector<128x12xf32>
      %c0_14 = arith.constant 0 : index
      %c0_15 = arith.constant 0 : index
      %20 = vector.load %arg7[%c0_14, %c0_15] : memref<128x12xf32, #tpu.memory_space<vmem>>, vector<128x12xf32>
      tpu.vector_store %arg7[%c0_14, %c0_15], %19 {strides = array<i32>} : memref<128x12xf32, #tpu.memory_space<vmem>>, vector<128x12xf32>,
    } else {
    }
    %c0 = arith.constant 0 : index
    %c0_1 = arith.constant 0 : index
    %3 = vector.load %arg5[%c0, %c0_1] : memref<128x16xbf16, #tpu.memory_space<vmem>>, vector<128x16xbf16>
    %4 = arith.extf %3 : vector<128x16xbf16> to vector<128x16xf32>
    %c0_2 = arith.constant 0 : index
    %c0_3 = arith.constant 0 : index
    %5 = vector.load %arg3[%c0_2, %c0_3] : memref<1x16xf32, #tpu.memory_space<vmem>>, vector<1x16xf32>
    %6 = vector.broadcast %5 : vector<1x16xf32> to vector<128x16xf32>
    %7 = arith.mulf %4, %6 : vector<128x16xf32>
    %c0_4 = arith.constant 0 : index
    %c0_5 = arith.constant 0 : index
    %8 = vector.load %arg4[%c0_4, %c0_5] : memref<1x16xf32, #tpu.memory_space<vmem>>, vector<1x16xf32>
    %9 = vector.broadcast %8 : vector<1x16xf32> to vector<128x16xf32>
    %10 = arith.addf %7, %9 : vector<128x16xf32>
    %cst = arith.constant 0.000000e+00 : f32
    %11 = vector.broadcast %cst : f32 to vector<128x16xf32>
    %12 = arith.maximumf %10, %11 : vector<128x16xf32>
    %13 = arith.truncf %12 : vector<128x16xf32> to vector<128x16xbf16>
    %c0_6 = arith.constant 0 : index
    %c0_7 = arith.constant 0 : index
    %14 = vector.load %arg7[%c0_6, %c0_7] : memref<128x12xf32, #tpu.memory_space<vmem>>, vector<128x12xf32>
    %c0_8 = arith.constant 0 : index
    %c0_9 = arith.constant 0 : index
    %15 = vector.load %arg6[%c0_8, %c0_9] : memref<16x12xbf16, #tpu.memory_space<vmem>>, vector<16x12xbf16>
    %cst_10 = arith.constant dense<0.000000e+00> : vector<128x12xf32>
    %16 = tpu.matmul %13, %15, %cst_10 {dimension_numbers = #tpu.dot_dimension_numbers<[1], [0], [0], [1], [0, 0, 1, 1], [], []>} : vector<128x16xbf16>, vector<16x12xbf16>, vector<128x12xf32> -> vector<128x12xf32>
    %17 = arith.addf %14, %16 : vector<128x12xf32>
    %c0_11 = arith.constant 0 : index
    %c0_12 = arith.constant 0 : index
    %18 = vector.load %arg7[%c0_11, %c0_12] : memref<128x12xf32, #tpu.memory_space<vmem>>, vector<128x12xf32>
    tpu.vector_store %arg7[%c0_11, %c0_12], %17 {strides = array<i32>} : memref<128x12xf32, #tpu.memory_space<vmem>>, vector<128x12xf32>,
    return
  }
  func.func @transform_0(%arg0: i32, %arg1: i32, %arg2: i32) -> (i32, i32) {
    %c0_i32 = arith.constant 0 : i32
    %c0_i32_0 = arith.constant 0 : i32
    return %c0_i32, %arg2 : i32, i32
  }
  func.func @transform_1(%arg0: i32, %arg1: i32, %arg2: i32) -> (i32, i32) {
    %c0_i32 = arith.constant 0 : i32
    %c0_i32_0 = arith.constant 0 : i32
    return %c0_i32, %arg2 : i32, i32
  }
  func.func @transform_2(%arg0: i32, %arg1: i32, %arg2: i32) -> (i32, i32) {
    %c0_i32 = arith.constant 0 : i32
    return %arg0, %arg2 : i32, i32
  }
  func.func @transform_3(%arg0: i32, %arg1: i32, %arg2: i32) -> (i32, i32) {
    %c0_i32 = arith.constant 0 : i32
    return %arg2, %arg1 : i32, i32
  }
  func.func @transform_4(%arg0: i32, %arg1: i32, %arg2: i32) -> (i32, i32) {
    %c0_i32 = arith.constant 0 : i32
    return %arg0, %arg1 : i32, i32
  }
}

module attributes {stable_mosaic.version = 11 : i64} {
  func.func @_attn_kernel(%arg0: i32, %arg1: i32, %arg2: memref<1x128x16xbf16, #tpu.memory_space<vmem>>, %arg3: memref<1x16xf32, #tpu.memory_space<vmem>>, %arg4: memref<1x16xf32, #tpu.memory_space<vmem>>, %arg5: memref<1x1xf32, #tpu.memory_space<vmem>>, %arg6: memref<1x128x2xbf16, #tpu.memory_space<vmem>>, %arg7: memref<1x256x2xbf16, #tpu.memory_space<vmem>>, %arg8: memref<1x256x8xbf16, #tpu.memory_space<vmem>>, %arg9: memref<8x16xbf16, #tpu.memory_space<vmem>>, %arg10: memref<1x128x16xbf16, #tpu.memory_space<vmem>>) attributes {dimension_semantics = [#tpu.dimension_semantics<parallel>, #tpu.dimension_semantics<parallel>], iteration_bounds = array<i64: 2, 8>, scalar_prefetch = 0 : i64, scratch_operands = 0 : i64, tpu.core_type = #tpu.core_type<tc>, window_params = [{transform_indices = @transform_0, window_bounds = array<i64: 1, 128, 16>}, {pipeline_mode = #tpu.pipeline_mode<synchronous>, transform_indices = @transform_1, window_bounds = array<i64: 1, 16>}, {pipeline_mode = #tpu.pipeline_mode<synchronous>, transform_indices = @transform_2, window_bounds = array<i64: 1, 16>}, {pipeline_mode = #tpu.pipeline_mode<synchronous>, transform_indices = @transform_3, window_bounds = array<i64: 1, 1>}, {transform_indices = @transform_4, window_bounds = array<i64: 1, 128, 2>}, {transform_indices = @transform_5, window_bounds = array<i64: 1, 256, 2>}, {transform_indices = @transform_6, window_bounds = array<i64: 1, 256, 8>}, {pipeline_mode = #tpu.pipeline_mode<synchronous>, transform_indices = @transform_7, window_bounds = array<i64: 8, 16>}, {transform_indices = @transform_8, window_bounds = array<i64: 1, 128, 16>}]} {
    %c0 = arith.constant 0 : index
    %c0_0 = arith.constant 0 : index
    %c0_1 = arith.constant 0 : index
    %0 = vector.load %arg6[%c0, %c0_0, %c0_1] : memref<1x128x2xbf16, #tpu.memory_space<vmem>>, vector<1x128x2xbf16>
    %1 = vector.shape_cast %0 : vector<1x128x2xbf16> to vector<128x2xbf16>
    %c0_2 = arith.constant 0 : index
    %c0_3 = arith.constant 0 : index
    %c0_4 = arith.constant 0 : index
    %2 = vector.load %arg7[%c0_2, %c0_3, %c0_4] : memref<1x256x2xbf16, #tpu.memory_space<vmem>>, vector<1x256x2xbf16>
    %3 = vector.shape_cast %2 : vector<1x256x2xbf16> to vector<256x2xbf16>
    %cst = arith.constant dense<0.000000e+00> : vector<128x256xf32>
    %4 = tpu.matmul %1, %3, %cst {dimension_numbers = #tpu.dot_dimension_numbers<[1], [1], [0], [0], [0, 0, 1, 0], [], []>} : vector<128x2xbf16>, vector<256x2xbf16>, vector<128x256xf32> -> vector<128x256xf32>
    %cst_5 = arith.constant dense<0xFF800000> : vector<128xf32>
    %5 = vector.multi_reduction <maximumf>, %4, %cst_5 [1] : vector<128x256xf32> to vector<128xf32>
    %6 = vector.shape_cast %5 : vector<128xf32> to vector<128x1xf32>
    %7 = vector.broadcast %6 : vector<128x1xf32> to vector<128x256xf32>
    %8 = arith.subf %4, %7 : vector<128x256xf32>
    %9 = math.exp %8 : vector<128x256xf32>
    %cst_6 = arith.constant dense<0.000000e+00> : vector<128xf32>
    %10 = vector.multi_reduction <add>, %9, %cst_6 [1] : vector<128x256xf32> to vector<128xf32>
    %11 = vector.shape_cast %10 : vector<128xf32> to vector<128x1xf32>
    %12 = vector.broadcast %11 : vector<128x1xf32> to vector<128x256xf32>
    %13 = arith.divf %9, %12 : vector<128x256xf32>
    %14 = arith.truncf %13 : vector<128x256xf32> to vector<128x256xbf16>
    %c0_7 = arith.constant 0 : index
    %c0_8 = arith.constant 0 : index
    %c0_9 = arith.constant 0 : index
    %15 = vector.load %arg8[%c0_7, %c0_8, %c0_9] : memref<1x256x8xbf16, #tpu.memory_space<vmem>>, vector<1x256x8xbf16>
    %16 = vector.shape_cast %15 : vector<1x256x8xbf16> to vector<256x8xbf16>
    %cst_10 = arith.constant dense<0.000000e+00> : vector<128x8xf32>
    %17 = tpu.matmul %14, %16, %cst_10 {dimension_numbers = #tpu.dot_dimension_numbers<[1], [0], [0], [1], [0, 0, 1, 1], [], []>} : vector<128x256xbf16>, vector<256x8xbf16>, vector<128x8xf32> -> vector<128x8xf32>
    %18 = arith.truncf %17 : vector<128x8xf32> to vector<128x8xbf16>
    %c0_11 = arith.constant 0 : index
    %c0_12 = arith.constant 0 : index
    %19 = vector.load %arg9[%c0_11, %c0_12] : memref<8x16xbf16, #tpu.memory_space<vmem>>, vector<8x16xbf16>
    %cst_13 = arith.constant dense<0.000000e+00> : vector<128x16xf32>
    %20 = tpu.matmul %18, %19, %cst_13 {dimension_numbers = #tpu.dot_dimension_numbers<[1], [0], [0], [1], [0, 0, 1, 1], [], []>} : vector<128x8xbf16>, vector<8x16xbf16>, vector<128x16xf32> -> vector<128x16xf32>
    %c0_14 = arith.constant 0 : index
    %c0_15 = arith.constant 0 : index
    %c0_16 = arith.constant 0 : index
    %21 = vector.load %arg2[%c0_14, %c0_15, %c0_16] : memref<1x128x16xbf16, #tpu.memory_space<vmem>>, vector<1x128x16xbf16>
    %22 = vector.shape_cast %21 : vector<1x128x16xbf16> to vector<128x16xbf16>
    %23 = arith.extf %22 : vector<128x16xbf16> to vector<128x16xf32>
    %c0_17 = arith.constant 0 : index
    %c0_18 = arith.constant 0 : index
    %24 = vector.load %arg3[%c0_17, %c0_18] : memref<1x16xf32, #tpu.memory_space<vmem>>, vector<1x16xf32>
    %25 = vector.broadcast %24 : vector<1x16xf32> to vector<128x16xf32>
    %26 = arith.mulf %23, %25 : vector<128x16xf32>
    %c0_19 = arith.constant 0 : index
    %c0_20 = arith.constant 0 : index
    %27 = vector.load %arg4[%c0_19, %c0_20] : memref<1x16xf32, #tpu.memory_space<vmem>>, vector<1x16xf32>
    %28 = vector.broadcast %27 : vector<1x16xf32> to vector<128x16xf32>
    %29 = arith.addf %26, %28 : vector<128x16xf32>
    %cst_21 = arith.constant 0.000000e+00 : f32
    %30 = vector.broadcast %cst_21 : f32 to vector<128x16xf32>
    %31 = arith.maximumf %29, %30 : vector<128x16xf32>
    %c0_22 = arith.constant 0 : index
    %c0_23 = arith.constant 0 : index
    %32 = vector.load %arg5[%c0_22, %c0_23] : memref<1x1xf32, #tpu.memory_space<vmem>>, vector<1x1xf32>
    %33 = vector.broadcast %32 : vector<1x1xf32> to vector<128x16xf32>
    %34 = arith.mulf %33, %20 : vector<128x16xf32>
    %35 = arith.addf %31, %34 : vector<128x16xf32>
    %36 = arith.truncf %35 : vector<128x16xf32> to vector<128x16xbf16>
    %c0_24 = arith.constant 0 : index
    %c0_25 = arith.constant 0 : index
    %c0_26 = arith.constant 0 : index
    %37 = vector.load %arg10[%c0_24, %c0_25, %c0_26] : memref<1x128x16xbf16, #tpu.memory_space<vmem>>, vector<1x128x16xbf16>
    %38 = vector.shape_cast %37 : vector<1x128x16xbf16> to vector<128x16xbf16>
    %39 = vector.shape_cast %36 : vector<128x16xbf16> to vector<1x128x16xbf16>
    tpu.vector_store %arg10[%c0_24, %c0_25, %c0_26], %39 {strides = array<i32>} : memref<1x128x16xbf16, #tpu.memory_space<vmem>>, vector<1x128x16xbf16>,
    return
  }
  func.func @transform_0(%arg0: i32, %arg1: i32) -> (i32, i32, i32) {
    %c0_i32 = arith.constant 0 : i32
    %c0_i32_0 = arith.constant 0 : i32
    return %arg0, %arg1, %c0_i32 : i32, i32, i32
  }
  func.func @transform_1(%arg0: i32, %arg1: i32) -> (i32, i32) {
    %c0_i32 = arith.constant 0 : i32
    %c0_i32_0 = arith.constant 0 : i32
    %c0_i32_1 = arith.constant 0 : i32
    return %c0_i32, %c0_i32_0 : i32, i32
  }
  func.func @transform_2(%arg0: i32, %arg1: i32) -> (i32, i32) {
    %c0_i32 = arith.constant 0 : i32
    %c0_i32_0 = arith.constant 0 : i32
    %c0_i32_1 = arith.constant 0 : i32
    return %c0_i32, %c0_i32_0 : i32, i32
  }
  func.func @transform_3(%arg0: i32, %arg1: i32) -> (i32, i32) {
    %c0_i32 = arith.constant 0 : i32
    %c0_i32_0 = arith.constant 0 : i32
    %c0_i32_1 = arith.constant 0 : i32
    return %c0_i32, %c0_i32_0 : i32, i32
  }
  func.func @transform_4(%arg0: i32, %arg1: i32) -> (i32, i32, i32) {
    %c0_i32 = arith.constant 0 : i32
    %c0_i32_0 = arith.constant 0 : i32
    return %arg0, %arg1, %c0_i32 : i32, i32, i32
  }
  func.func @transform_5(%arg0: i32, %arg1: i32) -> (i32, i32, i32) {
    %c0_i32 = arith.constant 0 : i32
    %c0_i32_0 = arith.constant 0 : i32
    %c0_i32_1 = arith.constant 0 : i32
    return %arg0, %c0_i32, %c0_i32_0 : i32, i32, i32
  }
  func.func @transform_6(%arg0: i32, %arg1: i32) -> (i32, i32, i32) {
    %c0_i32 = arith.constant 0 : i32
    %c0_i32_0 = arith.constant 0 : i32
    %c0_i32_1 = arith.constant 0 : i32
    return %arg0, %c0_i32, %c0_i32_0 : i32, i32, i32
  }
  func.func @transform_7(%arg0: i32, %arg1: i32) -> (i32, i32) {
    %c0_i32 = arith.constant 0 : i32
    %c0_i32_0 = arith.constant 0 : i32
    %c0_i32_1 = arith.constant 0 : i32
    return %c0_i32, %c0_i32_0 : i32, i32
  }
  func.func @transform_8(%arg0: i32, %arg1: i32) -> (i32, i32, i32) {
    %c0_i32 = arith.constant 0 : i32
    %c0_i32_0 = arith.constant 0 : i32
    return %arg0, %arg1, %c0_i32 : i32, i32, i32
  }
}

module attributes {stable_mosaic.version = 11 : i64} {
  func.func @_mm_kernel(%arg0: i32, %arg1: i32, %arg2: i32, %arg3: memref<128x16xbf16, #tpu.memory_space<vmem>>, %arg4: memref<16x48xbf16, #tpu.memory_space<vmem>>, %arg5: memref<128x48xf32, #tpu.memory_space<vmem>>) attributes {dimension_semantics = [#tpu.dimension_semantics<parallel>, #tpu.dimension_semantics<parallel>, #tpu.dimension_semantics<arbitrary>], iteration_bounds = array<i64: 16, 1, 1>, scalar_prefetch = 0 : i64, scratch_operands = 0 : i64, tpu.core_type = #tpu.core_type<tc>, window_params = [{transform_indices = @transform_0, window_bounds = array<i64: 128, 16>}, {transform_indices = @transform_1, window_bounds = array<i64: 16, 48>}, {transform_indices = @transform_2, window_bounds = array<i64: 128, 48>}]} {
    %c0_i32 = arith.constant 0 : i32
    %0 = arith.cmpi eq, %arg2, %c0_i32 : i32
    %1 = arith.extui %0 : i1 to i32
    %c0_i32_0 = arith.constant 0 : i32
    %2 = arith.cmpi ne, %1, %c0_i32_0 : i32
    scf.if %2 {
      %cst_8 = arith.constant 0.000000e+00 : f32
      %9 = vector.broadcast %cst_8 : f32 to vector<128x48xf32>
      %c0_9 = arith.constant 0 : index
      %c0_10 = arith.constant 0 : index
      %10 = vector.load %arg5[%c0_9, %c0_10] : memref<128x48xf32, #tpu.memory_space<vmem>>, vector<128x48xf32>
      tpu.vector_store %arg5[%c0_9, %c0_10], %9 {strides = array<i32>} : memref<128x48xf32, #tpu.memory_space<vmem>>, vector<128x48xf32>,
    } else {
    }
    %c0 = arith.constant 0 : index
    %c0_1 = arith.constant 0 : index
    %3 = vector.load %arg5[%c0, %c0_1] : memref<128x48xf32, #tpu.memory_space<vmem>>, vector<128x48xf32>
    %c0_2 = arith.constant 0 : index
    %c0_3 = arith.constant 0 : index
    %4 = vector.load %arg3[%c0_2, %c0_3] : memref<128x16xbf16, #tpu.memory_space<vmem>>, vector<128x16xbf16>
    %c0_4 = arith.constant 0 : index
    %c0_5 = arith.constant 0 : index
    %5 = vector.load %arg4[%c0_4, %c0_5] : memref<16x48xbf16, #tpu.memory_space<vmem>>, vector<16x48xbf16>
    %cst = arith.constant dense<0.000000e+00> : vector<128x48xf32>
    %6 = tpu.matmul %4, %5, %cst {dimension_numbers = #tpu.dot_dimension_numbers<[1], [0], [0], [1], [0, 0, 1, 1], [], []>} : vector<128x16xbf16>, vector<16x48xbf16>, vector<128x48xf32> -> vector<128x48xf32>
    %7 = arith.addf %3, %6 : vector<128x48xf32>
    %c0_6 = arith.constant 0 : index
    %c0_7 = arith.constant 0 : index
    %8 = vector.load %arg5[%c0_6, %c0_7] : memref<128x48xf32, #tpu.memory_space<vmem>>, vector<128x48xf32>
    tpu.vector_store %arg5[%c0_6, %c0_7], %7 {strides = array<i32>} : memref<128x48xf32, #tpu.memory_space<vmem>>, vector<128x48xf32>,
    return
  }
  func.func @transform_0(%arg0: i32, %arg1: i32, %arg2: i32) -> (i32, i32) {
    %c0_i32 = arith.constant 0 : i32
    return %arg0, %arg2 : i32, i32
  }
  func.func @transform_1(%arg0: i32, %arg1: i32, %arg2: i32) -> (i32, i32) {
    %c0_i32 = arith.constant 0 : i32
    return %arg2, %arg1 : i32, i32
  }
  func.func @transform_2(%arg0: i32, %arg1: i32, %arg2: i32) -> (i32, i32) {
    %c0_i32 = arith.constant 0 : i32
    return %arg0, %arg1 : i32, i32
  }
}

module attributes {stable_mosaic.version = 11 : i64} {
  func.func @_tanh_kernel(%arg0: i32, %arg1: memref<64x128xf32, #tpu.memory_space<vmem>>, %arg2: memref<64x128xf32, #tpu.memory_space<vmem>>) attributes {dimension_semantics = [#tpu.dimension_semantics<parallel>], iteration_bounds = array<i64: 3>, scalar_prefetch = 0 : i64, scratch_operands = 0 : i64, tpu.core_type = #tpu.core_type<tc>, window_params = [{transform_indices = @transform_0, window_bounds = array<i64: 64, 128>}, {transform_indices = @transform_1, window_bounds = array<i64: 64, 128>}]} {
    %c0 = arith.constant 0 : index
    %c0_0 = arith.constant 0 : index
    %0 = vector.load %arg1[%c0, %c0_0] : memref<64x128xf32, #tpu.memory_space<vmem>>, vector<64x128xf32>
    %1 = math.tanh %0 : vector<64x128xf32>
    %c0_1 = arith.constant 0 : index
    %c0_2 = arith.constant 0 : index
    %2 = vector.load %arg2[%c0_1, %c0_2] : memref<64x128xf32, #tpu.memory_space<vmem>>, vector<64x128xf32>
    tpu.vector_store %arg2[%c0_1, %c0_2], %1 {strides = array<i32>} : memref<64x128xf32, #tpu.memory_space<vmem>>, vector<64x128xf32>,
    return
  }
  func.func @transform_0(%arg0: i32) -> (i32, i32) {
    %c0_i32 = arith.constant 0 : i32
    %c0_i32_0 = arith.constant 0 : i32
    return %arg0, %c0_i32 : i32, i32
  }
  func.func @transform_1(%arg0: i32) -> (i32, i32) {
    %c0_i32 = arith.constant 0 : i32
    %c0_i32_0 = arith.constant 0 : i32
    return %arg0, %c0_i32 : i32, i32
  }
}

</mosaic_0001>

<bundles_post_ra>
// kernel: generator_forward.12
= control target key start
LH: loop header
LB: loop body
LE: loop exit
PB: predicated region body
PF: predicated region fallthrough
CT: control target
= control target key end

     0   :  { %7 = vsyncpa [#allocation3], 0  ;;  %s717_s0 = inlined_call_operand.vmem [shape: bf16[8,8], index: 0, kind: input, shape index: {}]   ;;  %s718_s1 = inlined_call_operand.hbm [shape: bf16[8,2048], index: 1, kind: input, shape index: {}]   ;;  %s719_s2 = inlined_call_operand.vmem [shape: f32[8,2048], index: 2, kind: output, shape index: {}]  }
   0x1   :  { %9 = vsyncpa [#allocation3 + $0x1], 0  ;;  %s590_s9 = smov 0   ;;  %s592_s10 = smov 0  }
   0x2   :  { %s594_s11 = smov 0   ;;  %s596_s12 = smov 0  }
   0x3   :  { %s598_s13 = smov 0   ;;  %s600_s14 = smov 0  }
   0x4 LB: > { %s413_s15 = sadd.s32 4294967295, %s571_s14   ;;  %s30_s16 = sadd.s32 1, %s567_s13  ;;  %s571_s14 = sphi %s600_s14, %s15_s14   ;;  %s567_s13 = sphi %s598_s13, %s729_s13   ;;  %s563_s12 = sphi %s596_s12, %s728_s12   ;;  %s559_s11 = sphi %s594_s11, %s727_s11   ;;  %s555_s10 = sphi %s592_s10, %s726_s10   ;;  %s551_s9 = sphi %s590_s9, %s725_s9  }
   0x5   : > { %p32_p0 = scmp.ge.s32.totalorder %s30_s16, 8  ;;  %s71_s17 = sadd.s32 1, %s559_s11 }
   0x6   : > { %p78_p1 = scmp.ne.s32.totalorder %s559_s11, %s555_s10  ;;  %p79_p2 = scmp.eq.s32.totalorder %s571_s14, 0 }
   0x7   : > { %s731_s16 = smov (%p32_p0, %s30_s16), 0  ;;  %p84_p4 = scmp.ne.s32.totalorder %s555_s10, %s551_s9 }
   0x8   : > { %p626_p3 = por %p79_p2, %p78_p1  ;;  %s67_s19 = ssub.s32 %s567_s13, %s731_s16 }
   0x9   : > { %p85_p5 = scmp.eq.s32.totalorder %s413_s15, 0  ;;  %p69_p6 = scmp.eq.s32.totalorder %s67_s19, 0 }
   0xa   : > { %p438_p8 = scmp.lt.s32.totalorder %s571_s14, 8  ;;  %s146_s22 = sand.u32 1, %s559_s11  }
   0xb   : > { %p633_p7 = por %p85_p5, %p84_p4  ;;  %s431_s23 = sshll.u32 %s567_s13, 7 }
   0xc   : > { %s639_s21 = scalar_select %p69_p6, %s559_s11, %s71_s17  }
   0xd   : > { %s418_s24 = sshll.u32 %s146_s22, 3  ;;  %s646_s27 = scalar_lea.hbm %s718_s1, %s431_s23 }
   0xe   : > { %s150_s28 = scalar_lea.vmem [#allocation2], %s418_s24  ;;  %p650_p9 = pnand %p438_p8, %p626_p3 }
   0xf   : > { %s160_s29 = sshll.u32 %s150_s28, 4  ;;  %s147_s3 = scalar_lea.sflag [#allocation3], %s146_s22  ;;  %s654_s29 = int_to_ptr.vmem [resolvable:$true] %s160_s29 }
  0x10   : > { %s491_s4 = scalar_lea.hbm %s646_s27, 128  ;;  %p493_p13 = pneg %p650_p9 }
  0x11   : > { %p492_p12 = scmp.ne.s32.totalorder %s646_s27, %s491_s4  ;;  %s496_s7 = scalar_lea.hbm %s718_s1, 1024 }
  0x12   : > { %p497_p2 = scmp.lt.u32.totalorder %s646_s27, %s718_s1  ;;  %p498_p3 = scmp.lt.u32.totalorder %s496_s7, %s491_s4 }
  0x13   : > { %p494_p0 = pnand %p493_p13, %p492_p12  ;;  %p500_p5 = scmp.lt.u32.totalorder %s491_s4, %s646_s27 }
  0x14   : > { %p499_p4 = por %p498_p3, %p497_p2 }
  0x15   : > { %p495_p1 = pneg %p494_p0 }
  0x16   : > { %p501_p6 = por %p500_p5, %p499_p4 }
  0x18   : > { %p502_p8 = pnand %p501_p6, %p495_p1 }
  0x1a   : > { %505 = shalt.err (!%p502_p8)
}
  0x1b   : > { %s506_s15 = scalar_lea.vmem %s654_s29, 128  ;;  %s573_s17 = smov [#allocation2]  }
  0x1c   : > { %p507_p12 = scmp.ne.s32.totalorder %s654_s29, %s506_s15  ;;  %s511_s18 = sshll.u32 %s573_s17, 4  ;;  %s512_s18 = int_to_ptr.vmem [resolvable:$false] %s511_s18 }
  0x1d   : > { %s513_s19 = scalar_lea.vmem %s512_s18, 256  ;;  %p514_p11 = scmp.lt.s32.totalorder %s654_s29, %s512_s18 }
  0x1e   : > { %p509_p0 = pnand %p507_p12, %p493_p13  ;;  %p515_p2 = scmp.lt.s32.totalorder %s513_s19, %s506_s15 }
  0x20   : > { %p510_p10 = pneg %p509_p0  ;;  %p516_p3 = por %p515_p2, %p514_p11 }
  0x22   : > { %p517_p4 = pnand %p516_p3, %p510_p10 }
  0x24   : > { %520 = shalt.err (!%p517_p4)
}
  0x25   : > { %437 = dma.hbm_to_vmem [thread:$0]  (!%p650_p9), %s646_s27, 128, %s654_s29, %s147_s3  }
  0x26   : > { %p723_p1 = scmp.lt.s32.totalorder %s571_s14, 9  ;;  %p724_p5 = scmp.ge.s32.totalorder %s571_s14, 1 }
  0x28   : > { %p166_p13 = pnand %p724_p5, %p723_p1 }
  0x29   : > { %s171_s22 = sand.u32 (!%p166_p13), 1, %s555_s10  }
  0x2a   : > { %169 = sbr.rel (%p166_p13) target bundleno = 272 (0x110), region = 28  ;;  %s422_s23 = sshll.u32 (!%p166_p13), %s171_s22, 3 }
  0x2b   : > { %s172_s24 = scalar_lea.sflag (!%p166_p13), [#allocation3], %s171_s22  ;;  %s175_s25 = scalar_lea.vmem (!%p166_p13), [#allocation2], %s422_s23 }
  0x31   : > { %546 = dma.done.wait (%p633_p7), %s172_s24, 128  }
  0x32   : > { %548 = vsyncadd (%p633_p7), %s172_s24, 4294967168  ;;  %v574_v0 = vmov 0   ;;  %v235_v1 = vld [vmem:[%s175_s25] sm:$0xff]  ;;  %vm245_vm0 = vcmask 1043456   ;;  %vm241_vm1 = vcmask 64512   ;;  %s423_s28 = sshll.u32 %s563_s12, 1 }
  0x33   : > { %284 = vmatprep.mubr.bf16.mxu0 %v574_v0  ;;  %v426_v2 = vcombine.high %v235_v1, %v235_v1  ;;  %v425_v3 = vcombine.low %v235_v1, %v235_v1  ;;  %v234_v5 = vld [vmem:[%s717_s0] sm:$0xf]  ;;  %p218_p9 = scmp.lt.s32.totalorder %s423_s28, 15 }
  0x35   : > { %427 = vmatprep.subr.msk.bf16.mxu0 %vm245_vm0, %v426_v2  ;;  %v247_v4 = vsel %vm245_vm0, %v425_v3, 0  ;;  %s733_s28 = smov (!%p218_p9, %s423_s28), 15 }
  0x36   : > { %253 = vmatpush1.bf16.msra.mxu0 %v247_v4  ;;  %s424_s20 = sshll.u32 %s733_s28, 3 }
  0x37   : > { %s223_s3 = scalar_lea.vmem %s719_s2, %s424_s20 }
  0x39   : > { %428 = vmatmul.mubr.msk.bf16.vlgmr.msra.gmra.mrb[0].mxu0 %vm241_vm1, %v234_v5 }
 0x10c   : > { %v286_v6 = vpop.f32.mrb[0].mxu0 }
 0x10d   : > { %v288_v7 = vpop.f32.mrb[1].mxu0  ;;  %295 = vst [vmem:[%s223_s3] sm:$0xff] %v286_v6 }
 0x10e   : > { %v290_v8 = vpop.f32.mrb[2].mxu0  ;;  %296 = vst [vmem:[%s223_s3 + $0x8] sm:$0xff] %v288_v7 }
 0x10f   : > { %v291_v9 = vpop.f32.mrb[3].mxu0 }
 0x110 PF: > { %s15_s14 = sadd.s32 1, %s571_s14   ;;  %s725_s9 = smov %s555_s10 }
 0x111   : > { %p12_p7 = scmp.ge.s32.totalorder %s15_s14, 10   ;;  %s726_s10 = smov %s559_s11 }
 0x112   : > { %s727_s11 = smov %s639_s21  ;;  %s728_s12 = smov %s567_s13 }
 0x113   : > { %s729_s13 = smov %s731_s16  ;;  %14 = sbr.rel (!%p12_p7) target bundleno = 4 (0x4), region = 75 }
 0x11a   :  { %327 = vsyncpa [#allocation3], 1 }
 0x11b   :  { %329 = vsyncpa [#allocation3 + $0x1], 1 }

// kernel: generator_forward.13
= control target key start
LH: loop header
LB: loop body
LE: loop exit
PB: predicated region body
PF: predicated region fallthrough
CT: control target
= control target key end

     0   :  { %v70_v0 = vmov 0.0   ;;  %s110_s1 = inlined_call_operand.vmem [shape: f32[1,128], index: 1, kind: output, shape index: {0}]   ;;  %s111_s2 = inlined_call_operand.vmem [shape: f32[1,128], index: 2, kind: output, shape index: {1}]   ;;  %s112_s0 = inlined_call_operand.vmem [shape: bf16[32,128], index: 0, kind: input, shape index: {}]  }
   0x1   :  { %14 = vst [vmem:[%s110_s1] sm:$0x1] %v70_v0  ;;  %15 = vst [vmem:[%s111_s2] sm:$0x1] %v70_v0  ;;  %v61_v1 = vld [vmem:[%s112_s0] sm:$0xff]   ;;  %v68_v2 = vld [vmem:[%s112_s0 + $0x8] sm:$0xff]  }
   0x2   :  { %v62_v3 = vunpack.c.l.bf16 %v61_v1  ;;  %v63_v4 = vunpack.c.h.bf16 %v61_v1  ;;  %v66_v5 = vunpack.c.l.bf16 %v68_v2  ;;  %v67_v6 = vunpack.c.h.bf16 %v68_v2 }
   0x4   :  { %v25_v7 = vadd.f32 %v63_v4, %v62_v3  ;;  %v37_v8 = vmul.f32 %v62_v3, %v62_v3  ;;  %v38_v9 = vmul.f32 %v63_v4, %v63_v4  ;;  %v39_v10 = vmul.f32 %v66_v5, %v66_v5 }
   0x5   :  { %v40_v12 = vmul.f32 %v67_v6, %v67_v6 }
   0x6   :  { %v26_v11 = vadd.f32 %v66_v5, %v25_v7  ;;  %v41_v13 = vadd.f32 %v38_v9, %v37_v8 }
   0x8   :  { %v27_v14 = vadd.f32 %v67_v6, %v26_v11  ;;  %v42_v15 = vadd.f32 %v41_v13, %v39_v10  ;;  %v24_v26 = vld [vmem:[%s110_s1] sm:$0x1] }
   0x9   :  { %v36_v29 = vld [vmem:[%s111_s2] sm:$0x1] }
   0xa   :  { %v28_v16 = vrot.slane %v27_v14, 4  ;;  %v43_v17 = vadd.f32 %v42_v15, %v40_v12 }
   0xc   :  { %v29_v18 = vadd.f32 %v28_v16, %v27_v14  ;;  %v44_v19 = vrot.slane %v43_v17, 4 }
   0xe   :  { %v30_v20 = vrot.slane %v29_v18, 2  ;;  %v45_v21 = vadd.f32 %v44_v19, %v43_v17 }
  0x10   :  { %v31_v22 = vadd.f32 %v30_v20, %v29_v18  ;;  %v46_v23 = vrot.slane %v45_v21, 2 }
  0x12   :  { %v32_v24 = vrot.slane %v31_v22, 1  ;;  %v47_v25 = vadd.f32 %v46_v23, %v45_v21 }
  0x14   :  { %v33_v27 = vadd.f32 %v32_v24, %v31_v22  ;;  %v48_v28 = vrot.slane %v47_v25, 1 }
  0x16   :  { %v34_v30 = vadd.f32 %v33_v27, %v24_v26  ;;  %v49_v31 = vadd.f32 %v48_v28, %v47_v25 }
  0x18   :  { %35 = vst [vmem:[%s110_s1] sm:$0x1] %v34_v30  ;;  %v50_v32 = vadd.f32 %v49_v31, %v36_v29 }
  0x1a   :  { %51 = vst [vmem:[%s111_s2] sm:$0x1] %v50_v32 }

// kernel: generator_forward.14
= control target key start
LH: loop header
LB: loop body
LE: loop exit
PB: predicated region body
PF: predicated region fallthrough
CT: control target
= control target key end

     0   :  { %9 = vsyncpa [#allocation3], 0  ;;  %s1115_s0 = inlined_call_operand.vmem [shape: f32[1,128], index: 0, kind: input, shape index: {}]   ;;  %s1116_s1 = inlined_call_operand.vmem [shape: f32[1,128], index: 1, kind: input, shape index: {}]   ;;  %s1117_s2 = inlined_call_operand.vmem [shape: bf16[32,128], index: 2, kind: input, shape index: {}]   ;;  %s1118_s3 = inlined_call_operand.hbm [shape: bf16[128,1024], index: 3, kind: input, shape index: {}]   ;;  %s1119_s4 = inlined_call_operand.vmem [shape: f32[32,1024], index: 4, kind: output, shape index: {}]  }
   0x1   :  { %11 = vsyncpa [#allocation3 + $0x1], 0  ;;  %s949_s15 = smov 0   ;;  %s951_s16 = smov 0  }
   0x2   :  { %s953_s17 = smov 0   ;;  %s955_s18 = smov 0  }
   0x3   :  { %s957_s19 = smov 0   ;;  %s959_s20 = smov 0  }
   0x4 LB: > { %s690_s21 = sadd.s32 4294967295, %s917_s20   ;;  %s32_s22 = sadd.s32 1, %s913_s19  ;;  %s917_s20 = sphi %s959_s20, %s17_s20   ;;  %s913_s19 = sphi %s957_s19, %s1130_s19   ;;  %s909_s18 = sphi %s955_s18, %s1129_s18   ;;  %s905_s17 = sphi %s953_s17, %s1128_s17   ;;  %s901_s16 = sphi %s951_s16, %s1127_s16   ;;  %s897_s15 = sphi %s949_s15, %s1126_s15  }
   0x5   : > { %p34_p0 = scmp.ge.s32.totalorder %s32_s22, 4  ;;  %s125_s23 = sadd.s32 1, %s905_s17 }
   0x6   : > { %p132_p1 = scmp.ne.s32.totalorder %s905_s17, %s901_s16  ;;  %p133_p2 = scmp.eq.s32.totalorder %s917_s20, 0 }
   0x7   : > { %s1132_s22 = smov (%p34_p0, %s32_s22), 0  ;;  %p138_p4 = scmp.ne.s32.totalorder %s901_s16, %s897_s15 }
   0x8   : > { %p985_p3 = por %p133_p2, %p132_p1  ;;  %s121_s25 = ssub.s32 %s913_s19, %s1132_s22 }
   0x9   : > { %p139_p5 = scmp.eq.s32.totalorder %s690_s21, 0  ;;  %p123_p6 = scmp.eq.s32.totalorder %s121_s25, 0 }
   0xa   : > { %p164_p7 = scmp.eq.s32.totalorder %s690_s21, 3  ;;  %p759_p10 = scmp.lt.s32.totalorder %s917_s20, 4 }
   0xb   : > { %p992_p8 = por %p139_p5, %p138_p4  ;;  %s214_s29 = sand.u32 1, %s905_s17  }
   0xc   : > { %s997_s27 = scalar_select %p123_p6, %s905_s17, %s125_s23  }
   0xd   : > { %p999_p9 = por %p164_p7, %p132_p1  ;;  %s726_s30 = sshll.u32 %s913_s19, 7 }
   0xe   : > { %s697_s5 = sshll.u32 %s214_s29, 7  ;;  %s1009_s8 = scalar_lea.hbm %s1118_s3, %s726_s30 }
   0xf   : > { %s1122_s28 = scalar_select %p999_p9, 1, 0 }
  0x10   : > { %s218_s9 = scalar_lea.vmem [#allocation2], %s697_s5  ;;  %p1013_p11 = pnand %p759_p10, %p985_p3 }
  0x11   : > { %s228_s10 = sshll.u32 %s218_s9, 4  ;;  %s1020_s12 = scalar_lea.sflag [#allocation3], %s214_s29  ;;  %s1017_s10 = int_to_ptr.vmem [resolvable:$true] %s228_s10 }
  0x12   : > { %s837_s13 = scalar_lea.hbm %s1009_s8, 2048  ;;  %p839_p0 = pneg %p1013_p11 }
  0x13   : > { %p838_p13 = scmp.ne.s32.totalorder %s1009_s8, %s837_s13  ;;  %s842_s21 = scalar_lea.hbm %s1118_s3, 8192 }
  0x14   : > { %p843_p3 = scmp.lt.u32.totalorder %s1009_s8, %s1118_s3  ;;  %p844_p4 = scmp.lt.u32.totalorder %s842_s21, %s837_s13 }
  0x15   : > { %p840_p1 = pnand %p839_p0, %p838_p13  ;;  %p846_p6 = scmp.lt.u32.totalorder %s837_s13, %s1009_s8 }
  0x16   : > { %p845_p5 = por %p844_p4, %p843_p3 }
  0x17   : > { %p841_p2 = pneg %p840_p1 }
  0x18   : > { %p847_p7 = por %p846_p6, %p845_p5 }
  0x1a   : > { %p848_p10 = pnand %p847_p7, %p841_p2 }
  0x1c   : > { %851 = shalt.err (!%p848_p10)
}
  0x1d   : > { %s852_s25 = scalar_lea.vmem %s1017_s10, 2048  ;;  %s919_s29 = smov [#allocation2]  }
  0x1e   : > { %p853_p13 = scmp.ne.s32.totalorder %s1017_s10, %s852_s25  ;;  %s857_s30 = sshll.u32 %s919_s29, 4  ;;  %s858_s30 = int_to_ptr.vmem [resolvable:$false] %s857_s30 }
  0x1f   : > { %s859_s5 = scalar_lea.vmem %s858_s30, 4096  ;;  %p860_p9 = scmp.lt.s32.totalorder %s1017_s10, %s858_s30 }
  0x20   : > { %p855_p1 = pnand %p853_p13, %p839_p0  ;;  %p861_p3 = scmp.lt.s32.totalorder %s859_s5, %s852_s25 }
  0x22   : > { %p856_p12 = pneg %p855_p1  ;;  %p862_p4 = por %p861_p3, %p860_p9 }
  0x24   : > { %p863_p5 = pnand %p862_p4, %p856_p12 }
  0x26   : > { %866 = shalt.err (!%p863_p5)
}
  0x27   : > { %s920_s6 = smov 512   ;;  %s921_s7 = smov 128  }
  0x28   : > { %s922_s9 = smov 8   ;;  %p236_p0 = scmp.lt.s32.totalorder %s917_s20, 5 }
  0x29   : > { %758 = dma.hbm_to_vmem [thread:$0]  (!%p1013_p11), %s1009_s8, 2048, %s1017_s10, %s1020_s12, %s920_s6, %s921_s7, %s922_s9  }
  0x2a   : > { %p1124_p2 = scmp.ge.s32.totalorder %s917_s20, 1 }
  0x2c   : > { %p237_p6 = pnand %p1124_p2, %p236_p0 }
  0x2d   : > { %s1052_s13 = sand.u32 (!%p237_p6), 1, %s901_s16  }
  0x2e   : > { %240 = sbr.rel (%p237_p6) target bundleno = 313 (0x139), region = 36  ;;  %s701_s14 = sshll.u32 (!%p237_p6), %s1052_s13, 7 }
  0x2f   : > { %s243_s15 = scalar_lea.sflag (!%p237_p6), [#allocation3], %s1052_s13  ;;  %s1056_s21 = scalar_lea.vmem (!%p237_p6), [#allocation2], %s701_s14 }
  0x35   : > { %892 = dma.done.wait (%p992_p8), %s243_s15, 2048  }
  0x36   : > { %894 = vsyncadd (%p992_p8), %s243_s15, 4294965248  ;;  %v923_v0 = vmov 0   ;;  %v813_v1 = vld [vmem:[%s1056_s21 + $0x4] ss:$8 sps:$4 sm:$0xff]   ;;  %v815_v2 = vld [vmem:[%s1056_s21] ss:$8 sps:$4 sm:$0xff]  }
  0x37   : > { %488 = vmatprep.mubr.bf16.mxu0 %v923_v0  ;;  %498 = vmatprep.mubr.bf16.mxu1 %v923_v0  ;;  %v816_v3 = vld [vmem:[%s1056_s21 + $0x14] ss:$8 sps:$4 sm:$0xff]   ;;  %v818_v4 = vld [vmem:[%s1056_s21 + $0x10] ss:$8 sps:$4 sm:$0xff]   ;;  %v819_v5 = vld [vmem:[%s1056_s21 + $0x24] ss:$8 sps:$4 sm:$0xff]  }
  0x38   : > { %456 = vmatprep.subr.bf16.mxu0 %v813_v1  ;;  %737 = vmatprep.subr.bf16.mxu1 %v813_v1  ;;  %v821_v6 = vld [vmem:[%s1056_s21 + $0x20] ss:$8 sps:$4 sm:$0xff]   ;;  %v822_v7 = vld [vmem:[%s1056_s21 + $0x34] ss:$8 sps:$4 sm:$0xff]   ;;  %v824_v8 = vld [vmem:[%s1056_s21 + $0x30] ss:$8 sps:$4 sm:$0xff]  }
  0x39   : > { %457 = vmatpush1.bf16.msra.mxu0 %v815_v2  ;;  %745 = vmatpush1.bf16.msra.mxu1 %v815_v2  ;;  %v729_v9 = vld [vmem:[%s1117_s2] sm:$0xff]   ;;  %v736_v10 = vld [vmem:[%s1117_s2 + $0x8] sm:$0xff]   ;;  %v828_v18 = vld [vmem:[%s1056_s21 + $0x54] ss:$8 sps:$4 sm:$0xff]   ;;  %s702_s29 = sshll.u32 %s1052_s13, 6  ;;  %p1125_p8 = scmp.ne.s32.totalorder %s1122_s28, 0 }
  0x3a   : > { %458 = vmatprep.subr.bf16.mxu0 %v816_v3  ;;  %738 = vmatprep.subr.bf16.mxu1 %v816_v3  ;;  %v825_v11 = vld [vmem:[%s1056_s21 + $0x44] ss:$8 sps:$4 sm:$0xff]   ;;  %v730_v12 = vunpack.c.l.bf16 %v729_v9  ;;  %v731_v13 = vunpack.c.h.bf16 %v729_v9  ;;  %v734_v14 = vunpack.c.l.bf16 %v736_v10  ;;  %v735_v15 = vunpack.c.h.bf16 %v736_v10  ;;  %v827_v16 = vld [vmem:[%s1056_s21 + $0x40] ss:$8 sps:$4 sm:$0xff]   ;;  %v830_v23 = vld [vmem:[%s1056_s21 + $0x50] ss:$8 sps:$4 sm:$0xff]  }
  0x3b   : > { %v703_v17 = vld [vmem:[%s1115_s0] ss:$0 sm:$0xff]  ;;  %v831_v25 = vld [vmem:[%s1056_s21 + $0x64] ss:$8 sps:$4 sm:$0xff]   ;;  %v834_v31 = vld [vmem:[%s1056_s21 + $0x74] ss:$8 sps:$4 sm:$0xff]  }
  0x3c   : > { %v331_v19 = vmul.f32 %v730_v12, %v703_v17  ;;  %v332_v20 = vmul.f32 %v731_v13, %v703_v17  ;;  %v333_v21 = vmul.f32 %v734_v14, %v703_v17  ;;  %v334_v22 = vmul.f32 %v735_v15, %v703_v17  ;;  %v704_v24 = vld [vmem:[%s1116_s1] ss:$0 sm:$0xff]  ;;  %v836_v36 = vld [vmem:[%s1056_s21 + $0x70] ss:$8 sps:$4 sm:$0xff]   ;;  %s283_s30 = scalar_lea.vmem [#allocation4], %s702_s29  ;;  %s727_s5 = sshll.u32 (%p1125_p8), %s909_s18, 4 }
  0x3d   : > { %459 = vmatpush1.bf16.msra.mxu0 %v818_v4  ;;  %746 = vmatpush1.bf16.msra.mxu1 %v818_v4  ;;  %v833_v30 = vld [vmem:[%s1056_s21 + $0x60] ss:$8 sps:$4 sm:$0xff]   ;;  %s537_s9 = scalar_lea.vmem (%p1125_p8), %s1119_s4, %s727_s5 }
  0x3e   : > { %460 = vmatprep.subr.bf16.mxu0 %v819_v5  ;;  %739 = vmatprep.subr.bf16.mxu1 %v819_v5  ;;  %v342_v26 = vadd.f32 %v704_v24, %v331_v19  ;;  %v343_v27 = vadd.f32 %v704_v24, %v332_v20  ;;  %v344_v28 = vadd.f32 %v704_v24, %v333_v21 }
  0x3f   : > { %v345_v29 = vadd.f32 %v704_v24, %v334_v22 }
  0x40   : > { %v346_v32 = vmax.f32 %v342_v26, 0.0  ;;  %v347_v33 = vmax.f32 %v343_v27, 0.0  ;;  %v348_v34 = vmax.f32 %v344_v28, 0.0 }
  0x41   : > { %461 = vmatpush1.bf16.msra.mxu0 %v821_v6  ;;  %747 = vmatpush1.bf16.msra.mxu1 %v821_v6  ;;  %v349_v35 = vmax.f32 %v345_v29, 0.0 }
  0x42   : > { %462 = vmatprep.subr.bf16.mxu0 %v822_v7  ;;  %740 = vmatprep.subr.bf16.mxu1 %v822_v7  ;;  %v350_v37 = vpack.c.bf16 %v347_v33, %v346_v32 }
  0x43   : > { %v351_v38 = vpack.c.bf16 %v349_v35, %v348_v34 }
  0x45   : > { %463 = vmatpush1.bf16.msra.mxu0 %v824_v8  ;;  %748 = vmatpush1.bf16.msra.mxu1 %v824_v8 }
  0x46   : > { %464 = vmatprep.subr.bf16.mxu0 %v825_v11  ;;  %741 = vmatprep.subr.bf16.mxu1 %v825_v11 }
  0x49   : > { %465 = vmatpush1.bf16.msra.mxu0 %v827_v16  ;;  %749 = vmatpush1.bf16.msra.mxu1 %v827_v16 }
  0x4a   : > { %466 = vmatprep.subr.bf16.mxu0 %v828_v18  ;;  %742 = vmatprep.subr.bf16.mxu1 %v828_v18 }
  0x4d   : > { %467 = vmatpush1.bf16.msra.mxu0 %v830_v23  ;;  %750 = vmatpush1.bf16.msra.mxu1 %v830_v23 }
  0x4e   : > { %468 = vmatprep.subr.bf16.mxu0 %v831_v25  ;;  %743 = vmatprep.subr.bf16.mxu1 %v831_v25 }
  0x51   : > { %469 = vmatpush1.bf16.msra.mxu0 %v833_v30  ;;  %751 = vmatpush1.bf16.msra.mxu1 %v833_v30 }
  0x52   : > { %470 = vmatprep.subr.bf16.mxu0 %v834_v31  ;;  %744 = vmatprep.subr.bf16.mxu1 %v834_v31 }
  0x55   : > { %471 = vmatpush1.bf16.msra.mxu0 %v836_v36  ;;  %752 = vmatpush1.bf16.msra.mxu1 %v836_v36 }
  0x58   : > { %489 = vmatmul.mubr.bf16.vlgmr.msra.gmra.mrb[0].mxu0 %v350_v37  ;;  %499 = vmatmul.mubr.bf16.vlgmr.msra.gmra.mrb[0].mxu1 %v351_v38 }
 0x129   : > { %531 = sbr.rel (!%p1125_p8) target bundleno = 313 (0x139), region = 48 }
 0x12b   : > { %v490_v39 = vpop.f32.mrb[0].mxu0  ;;  %v500_v40 = vpop.f32.mrb[0].mxu1 }
 0x12c   : > { %v492_v41 = vpop.f32.mrb[1].mxu0  ;;  %v502_v42 = vpop.f32.mrb[1].mxu1  ;;  %517 = vst [vmem:[%s283_s30] sm:$0xff] %v490_v39  ;;  %521 = vst [vmem:[%s283_s30 + $0x20] sm:$0xff] %v500_v40 }
 0x12d   : > { %v494_v43 = vpop.f32.mrb[2].mxu0  ;;  %v504_v44 = vpop.f32.mrb[2].mxu1  ;;  %518 = vst [vmem:[%s283_s30 + $0x8] sm:$0xff] %v492_v41  ;;  %522 = vst [vmem:[%s283_s30 + $0x28] sm:$0xff] %v502_v42 }
 0x12e   : > { %v496_v45 = vpop.f32.mrb[3].mxu0  ;;  %v506_v46 = vpop.f32.mrb[3].mxu1  ;;  %519 = vst [vmem:[%s283_s30 + $0x10] sm:$0xff] %v494_v43  ;;  %523 = vst [vmem:[%s283_s30 + $0x30] sm:$0xff] %v504_v44 }
 0x12f   : > { %520 = vst [vmem:[%s283_s30 + $0x18] sm:$0xff] %v496_v45  ;;  %524 = vst [vmem:[%s283_s30 + $0x38] sm:$0xff] %v506_v46 }
 0x133   : > { %v550_v47 = vld [vmem:[%s283_s30] sm:$0xff] }
 0x134   : > { %v552_v48 = vld [vmem:[%s283_s30 + $0x8] sm:$0xff]  ;;  %v558_v51 = vld [vmem:[%s283_s30 + $0x20] sm:$0xff]  ;;  %551 = vst [vmem:[%s537_s9] sm:$0xff] %v550_v47 }
 0x135   : > { %v554_v49 = vld [vmem:[%s283_s30 + $0x10] sm:$0xff]  ;;  %v560_v52 = vld [vmem:[%s283_s30 + $0x28] sm:$0xff]  ;;  %553 = vst [vmem:[%s537_s9 + $0x8] sm:$0xff] %v552_v48  ;;  %559 = vst [vmem:[%s537_s9 + $0x80] sm:$0xff] %v558_v51 }
 0x136   : > { %v556_v50 = vld [vmem:[%s283_s30 + $0x18] sm:$0xff]  ;;  %555 = vst [vmem:[%s537_s9 + $0x40] sm:$0xff] %v554_v49  ;;  %561 = vst [vmem:[%s537_s9 + $0x88] sm:$0xff] %v560_v52  ;;  %v562_v53 = vld [vmem:[%s283_s30 + $0x30] sm:$0xff] }
 0x137   : > { %557 = vst [vmem:[%s537_s9 + $0x48] sm:$0xff] %v556_v50  ;;  %v564_v54 = vld [vmem:[%s283_s30 + $0x38] sm:$0xff]  ;;  %563 = vst [vmem:[%s537_s9 + $0xc0] sm:$0xff] %v562_v53 }
 0x138   : > { %565 = vst [vmem:[%s537_s9 + $0xc8] sm:$0xff] %v564_v54 }
 0x139 PF: > { %s17_s20 = sadd.s32 1, %s917_s20   ;;  %s1126_s15 = smov %s901_s16 }
 0x13a   : > { %p14_p9 = scmp.ge.s32.totalorder %s17_s20, 6   ;;  %s1127_s16 = smov %s905_s17 }
 0x13b   : > { %s1128_s17 = smov %s997_s27  ;;  %s1129_s18 = smov %s913_s19 }
 0x13c   : > { %s1130_s19 = smov %s1132_s22  ;;  %16 = sbr.rel (!%p14_p9) target bundleno = 4 (0x4), region = 112 }
 0x143   :  { %581 = vsyncpa [#allocation3], 1 }
 0x144   :  { %583 = vsyncpa [#allocation3 + $0x1], 1 }

// kernel: generator_forward.15
= control target key start
LH: loop header
LB: loop body
LE: loop exit
PB: predicated region body
PF: predicated region fallthrough
CT: control target
= control target key end

     0   :  { %vm14_vm0 = vcmask 516096   ;;  %v195_v0 = vmov 0.0   ;;  %vm50_vm1 = vcmask 523264   ;;  %s289_s0 = inlined_call_operand.vmem [shape: bf16[128,64], index: 0, kind: input, shape index: {}]   ;;  %s290_s1 = inlined_call_operand.vmem [shape: f32[1,64], index: 1, kind: output, shape index: {0}]   ;;  %s291_s2 = inlined_call_operand.vmem [shape: f32[1,64], index: 2, kind: output, shape index: {1}]  }
   0x1   :  { %15 = vst.msk [vmem:[%s290_s1] sm:$0x1] %vm14_vm0, %v195_v0  ;;  %v156_v1 = vld [vmem:[%s289_s0] sm:$0xff]   ;;  %v187_v2 = vld [vmem:[%s289_s0 + $0x8] sm:$0xff]   ;;  %16 = vst.msk [vmem:[%s291_s2] sm:$0x1] %vm14_vm0, %v195_v0 }
   0x2   :  { %v157_v3 = vunpack.c.l.bf16 %v156_v1  ;;  %v158_v4 = vunpack.c.h.bf16 %v156_v1  ;;  %v161_v5 = vunpack.c.l.bf16 %v187_v2  ;;  %v188_v6 = vld [vmem:[%s289_s0 + $0x10] sm:$0xff]   ;;  %v162_v7 = vunpack.c.h.bf16 %v187_v2  ;;  %v189_v14 = vld [vmem:[%s289_s0 + $0x18] sm:$0xff]   ;;  %v190_v24 = vld [vmem:[%s289_s0 + $0x20] sm:$0xff]  }
   0x3   :  { %v165_v12 = vunpack.c.l.bf16 %v188_v6  ;;  %v166_v16 = vunpack.c.h.bf16 %v188_v6  ;;  %v169_v22 = vunpack.c.l.bf16 %v189_v14  ;;  %v170_v27 = vunpack.c.h.bf16 %v189_v14  ;;  %v191_v37 = vld [vmem:[%s289_s0 + $0x28] sm:$0xff]   ;;  %v192_v50 = vld [vmem:[%s289_s0 + $0x30] sm:$0xff]   ;;  %v193_v63 = vld [vmem:[%s289_s0 + $0x38] sm:$0xff]  }
   0x4   :  { %v51_v8 = vsel %vm50_vm1, %v157_v3, 0.0  ;;  %v52_v9 = vsel %vm50_vm1, %v158_v4, 0.0  ;;  %v54_v10 = vsel %vm50_vm1, %v161_v5, 0.0  ;;  %v56_v13 = vsel %vm50_vm1, %v162_v7, 0.0 }
   0x5   :  { %v53_v11 = vadd.f32 %v52_v9, %v51_v8  ;;  %v58_v17 = vsel %vm50_vm1, %v165_v12, 0.0  ;;  %v92_v19 = vmul.f32 %v157_v3, %v157_v3  ;;  %v93_v20 = vmul.f32 %v158_v4, %v158_v4 }
   0x6   :  { %v94_v21 = vmul.f32 %v161_v5, %v161_v5  ;;  %v60_v23 = vsel %vm50_vm1, %v166_v16, 0.0  ;;  %v95_v26 = vmul.f32 %v162_v7, %v162_v7  ;;  %v62_v28 = vsel %vm50_vm1, %v169_v22, 0.0 }
   0x7   :  { %v55_v15 = vadd.f32 %v54_v10, %v53_v11  ;;  %v96_v29 = vmul.f32 %v165_v12, %v165_v12  ;;  %v108_v31 = vsel %vm50_vm1, %v92_v19, 0.0  ;;  %v109_v32 = vsel %vm50_vm1, %v93_v20, 0.0 }
   0x8   :  { %v111_v33 = vsel %vm50_vm1, %v94_v21, 0.0  ;;  %v173_v34 = vunpack.c.l.bf16 %v190_v24  ;;  %v64_v35 = vsel %vm50_vm1, %v170_v27, 0.0  ;;  %v110_v36 = vadd.f32 %v109_v32, %v108_v31 }
   0x9   :  { %v57_v18 = vadd.f32 %v56_v13, %v55_v15  ;;  %v97_v39 = vmul.f32 %v166_v16, %v166_v16  ;;  %v113_v40 = vsel %vm50_vm1, %v95_v26, 0.0  ;;  %v174_v41 = vunpack.c.h.bf16 %v190_v24 }
   0xa   :  { %v66_v42 = vsel %vm50_vm1, %v173_v34, 0.0  ;;  %v112_v43 = vadd.f32 %v111_v33, %v110_v36  ;;  %v98_v45 = vmul.f32 %v169_v22, %v169_v22  ;;  %v115_v46 = vsel %vm50_vm1, %v96_v29, 0.0 }
   0xb   :  { %v59_v25 = vadd.f32 %v58_v17, %v57_v18  ;;  %v177_v47 = vunpack.c.l.bf16 %v191_v37  ;;  %v68_v48 = vsel %vm50_vm1, %v174_v41, 0.0  ;;  %v99_v52 = vmul.f32 %v170_v27, %v170_v27 }
   0xc   :  { %v114_v49 = vadd.f32 %v113_v40, %v112_v43  ;;  %v117_v53 = vsel %vm50_vm1, %v97_v39, 0.0  ;;  %v178_v54 = vunpack.c.h.bf16 %v191_v37  ;;  %v100_v58 = vmul.f32 %v173_v34, %v173_v34 }
   0xd   :  { %v61_v30 = vadd.f32 %v60_v23, %v59_v25  ;;  %v70_v55 = vsel %vm50_vm1, %v177_v47, 0.0  ;;  %v119_v59 = vsel %vm50_vm1, %v98_v45, 0.0  ;;  %v181_v60 = vunpack.c.l.bf16 %v192_v50 }
   0xe   :  { %v116_v56 = vadd.f32 %v115_v46, %v114_v49  ;;  %v72_v61 = vsel %vm50_vm1, %v178_v54, 0.0  ;;  %v101_v1 = vmul.f32 %v174_v41, %v174_v41  ;;  %v121_v2 = vsel %vm50_vm1, %v99_v52, 0.0  ;;  %v91_v52 = vld [vmem:[%s291_s2] sm:$0x1] }
   0xf   :  { %v63_v38 = vadd.f32 %v62_v28, %v61_v30  ;;  %v182_v3 = vunpack.c.h.bf16 %v192_v50  ;;  %v74_v4 = vsel %vm50_vm1, %v181_v60, 0.0  ;;  %v102_v7 = vmul.f32 %v177_v47, %v177_v47 }
  0x10   :  { %v118_v62 = vadd.f32 %v117_v53, %v116_v56  ;;  %v123_v8 = vsel %vm50_vm1, %v100_v58, 0.0  ;;  %v185_v9 = vunpack.c.l.bf16 %v193_v63  ;;  %v103_v13 = vmul.f32 %v178_v54, %v178_v54 }
  0x11   :  { %v65_v44 = vadd.f32 %v64_v35, %v63_v38  ;;  %v76_v10 = vsel %vm50_vm1, %v182_v3, 0.0  ;;  %v125_v14 = vsel %vm50_vm1, %v101_v1, 0.0  ;;  %v186_v15 = vunpack.c.h.bf16 %v193_v63 }
  0x12   :  { %v120_v5 = vadd.f32 %v119_v59, %v118_v62  ;;  %v78_v16 = vsel %vm50_vm1, %v185_v9, 0.0  ;;  %v104_v19 = vmul.f32 %v181_v60, %v181_v60  ;;  %v127_v20 = vsel %vm50_vm1, %v102_v7, 0.0 }
  0x13   :  { %v67_v51 = vadd.f32 %v66_v42, %v65_v44  ;;  %v80_v21 = vsel %vm50_vm1, %v186_v15, 0.0  ;;  %v105_v24 = vmul.f32 %v182_v3, %v182_v3  ;;  %v129_v25 = vsel %vm50_vm1, %v103_v13, 0.0  ;;  %v49_v44 = vld [vmem:[%s290_s1] sm:$0x1] }
  0x14   :  { %v122_v11 = vadd.f32 %v121_v2, %v120_v5  ;;  %v106_v28 = vmul.f32 %v185_v9, %v185_v9  ;;  %v131_v29 = vsel %vm50_vm1, %v104_v19, 0.0  ;;  %v107_v32 = vmul.f32 %v186_v15, %v186_v15 }
  0x15   :  { %v69_v57 = vadd.f32 %v68_v48, %v67_v51  ;;  %v133_v33 = vsel %vm50_vm1, %v105_v24, 0.0 }
  0x16   :  { %v124_v17 = vadd.f32 %v123_v8, %v122_v11  ;;  %v135_v36 = vsel %vm50_vm1, %v106_v28, 0.0  ;;  %v137_v39 = vsel %vm50_vm1, %v107_v32, 0.0 }
  0x17   :  { %v71_v0 = vadd.f32 %v70_v55, %v69_v57 }
  0x18   :  { %v126_v22 = vadd.f32 %v125_v14, %v124_v17 }
  0x19   :  { %v73_v6 = vadd.f32 %v72_v61, %v71_v0 }
  0x1a   :  { %v128_v26 = vadd.f32 %v127_v20, %v126_v22 }
  0x1b   :  { %v75_v12 = vadd.f32 %v74_v4, %v73_v6 }
  0x1c   :  { %v130_v30 = vadd.f32 %v129_v25, %v128_v26 }
  0x1d   :  { %v77_v18 = vadd.f32 %v76_v10, %v75_v12 }
  0x1e   :  { %v132_v34 = vadd.f32 %v131_v29, %v130_v30 }
  0x1f   :  { %v79_v23 = vadd.f32 %v78_v16, %v77_v18 }
  0x20   :  { %v134_v37 = vadd.f32 %v133_v33, %v132_v34 }
  0x21   :  { %v81_v27 = vadd.f32 %v80_v21, %v79_v23 }
  0x22   :  { %v136_v40 = vadd.f32 %v135_v36, %v134_v37 }
  0x23   :  { %v82_v31 = vrot.slane %v81_v27, 4 }
  0x24   :  { %v138_v42 = vadd.f32 %v137_v39, %v136_v40 }
  0x25   :  { %v83_v35 = vadd.f32 %v82_v31, %v81_v27 }
  0x26   :  { %v139_v45 = vrot.slane %v138_v42, 4 }
  0x27   :  { %v84_v38 = vrot.slane %v83_v35, 2 }
  0x28   :  { %v140_v47 = vadd.f32 %v139_v45, %v138_v42 }
  0x29   :  { %v85_v41 = vadd.f32 %v84_v38, %v83_v35 }
  0x2a   :  { %v141_v49 = vrot.slane %v140_v47, 2 }
  0x2b   :  { %v86_v43 = vrot.slane %v85_v41, 1 }
  0x2c   :  { %v142_v50 = vadd.f32 %v141_v49, %v140_v47 }
  0x2d   :  { %v87_v46 = vadd.f32 %v86_v43, %v85_v41 }
  0x2e   :  { %v143_v51 = vrot.slane %v142_v50, 1 }
  0x2f   :  { %v88_v48 = vadd.f32 %v87_v46, %v49_v44 }
  0x30   :  { %v144_v53 = vadd.f32 %v143_v51, %v142_v50 }
  0x31   :  { %90 = vst.msk [vmem:[%s290_s1] sm:$0x1] %vm14_vm0, %v88_v48 }
  0x32   :  { %v145_v54 = vadd.f32 %v144_v53, %v91_v52 }
  0x34   :  { %146 = vst.msk [vmem:[%s291_s2] sm:$0x1] %vm14_vm0, %v145_v54 }

// kernel: generator_forward.16
= control target key start
LH: loop header
LB: loop body
LE: loop exit
PB: predicated region body
PF: predicated region fallthrough
CT: control target
= control target key end

     0   :  { %s1180_s15 = smov 0   ;;  %s1182_s16 = smov 0   ;;  %s1448_s0 = inlined_call_operand.vmem [shape: f32[1,64], index: 0, kind: input, shape index: {}]   ;;  %s1449_s1 = inlined_call_operand.vmem [shape: f32[1,64], index: 1, kind: input, shape index: {}]   ;;  %s1450_s2 = inlined_call_operand.vmem [shape: bf16[128,64], index: 2, kind: input, shape index: {}]   ;;  %s1451_s3 = inlined_call_operand.vmem [shape: bf16[64,512], index: 3, kind: input, shape index: {}]   ;;  %s1452_s4 = inlined_call_operand.vmem [shape: f32[128,512], index: 4, kind: output, shape index: {}]  }
   0x1   :  { %s1184_s17 = smov 0   ;;  %s1186_s18 = smov 0  }
   0x2   :  { %s1188_s19 = smov 0  }
   0x3 LB: > { %s29_s20 = sadd.s32 1, %s1148_s18  ;;  %s975_s21 = sadd.s32 4294967295, %s1152_s19   ;;  %s1152_s19 = sphi %s1188_s19, %s14_s19   ;;  %s1148_s18 = sphi %s1186_s18, %s1457_s18   ;;  %s1144_s17 = sphi %s1184_s17, %s1456_s17   ;;  %s1140_s16 = sphi %s1182_s16, %s1455_s16   ;;  %s1136_s15 = sphi %s1180_s15, %s1454_s15  }
   0x4   : > { %p31_p0 = scmp.ge.s32.totalorder %s29_s20, 2  ;;  %p129_p1 = scmp.ne.s32.totalorder %s1140_s16, %s1136_s15 }
   0x5   : > { %p130_p2 = scmp.eq.s32.totalorder %s1152_s19, 0  ;;  %p161_p4 = scmp.eq.s32.totalorder %s975_s21, 1 }
   0x6   : > { %s1459_s20 = smov (%p31_p0, %s29_s20), 0  ;;  %s122_s23 = sadd.s32 1, %s1140_s16 }
   0x7   : > { %p131_p3 = por %p130_p2, %p129_p1  ;;  %s118_s22 = ssub.s32 %s1148_s18, %s1459_s20 }
   0x8   : > { %p120_p5 = scmp.eq.s32.totalorder %s118_s22, 0  ;;  %p1215_p6 = por %p161_p4, %p129_p1 }
   0x9   : > { %p981_p7 = scmp.ge.s32.totalorder %s1152_s19, 2 }
   0xa   : > { %s1220_s25 = scalar_select %p120_p5, %s1140_s16, %s122_s23  }
   0xb   : > { %207 = sbr.rel (%p981_p7) target bundleno = 26 (0x1a), region = 28 }
  0x12   : > { %210 = sbr.rel (!%p131_p3) target bundleno = 26 (0x1a), region = 32  ;;  %s212_s26 = sand.u32 (%p131_p3), 1, %s1140_s16  }
  0x13   : > { %s1011_s27 = sshll.u32 (%p131_p3), %s1148_s18, 3  ;;  %s982_s28 = sshll.u32 (%p131_p3), %s212_s26, 6 }
  0x14   : > { %s220_s5 = scalar_lea.vmem (%p131_p3), %s1451_s3, %s1011_s27  ;;  %s214_s6 = scalar_lea.vmem (%p131_p3), [#allocation2], %s982_s28 }
  0x15   : > { %v262_v0 = vld [vmem:[%s220_s5] sm:$0xff] (%p131_p3)  ;;  %v264_v1 = vld [vmem:[%s220_s5 + $0x10] sm:$0xff] (%p131_p3) }
  0x16   : > { %v266_v2 = vld [vmem:[%s220_s5 + $0x20] sm:$0xff] (%p131_p3)  ;;  %263 = vst [vmem:[%s214_s6] sm:$0xff] (%p131_p3), %v262_v0  ;;  %265 = vst [vmem:[%s214_s6 + $0x8] sm:$0xff] (%p131_p3), %v264_v1  ;;  %v268_v3 = vld [vmem:[%s220_s5 + $0x30] sm:$0xff] (%p131_p3) }
  0x17   : > { %267 = vst [vmem:[%s214_s6 + $0x10] sm:$0xff] (%p131_p3), %v266_v2  ;;  %v270_v4 = vld [vmem:[%s220_s5 + $0x40] sm:$0xff] (%p131_p3)  ;;  %v272_v5 = vld [vmem:[%s220_s5 + $0x50] sm:$0xff] (%p131_p3)  ;;  %269 = vst [vmem:[%s214_s6 + $0x18] sm:$0xff] (%p131_p3), %v268_v3 }
  0x18   : > { %271 = vst [vmem:[%s214_s6 + $0x20] sm:$0xff] (%p131_p3), %v270_v4  ;;  %273 = vst [vmem:[%s214_s6 + $0x28] sm:$0xff] (%p131_p3), %v272_v5  ;;  %v274_v6 = vld [vmem:[%s220_s5 + $0x60] sm:$0xff] (%p131_p3)  ;;  %v276_v7 = vld [vmem:[%s220_s5 + $0x70] sm:$0xff] (%p131_p3) }
  0x19   : > { %275 = vst [vmem:[%s214_s6 + $0x30] sm:$0xff] %v274_v6  ;;  %277 = vst [vmem:[%s214_s6 + $0x38] sm:$0xff] %v276_v7 }
  0x1a PF: > { %p985_p8 = scmp.ge.s32.totalorder %s1152_s19, 1  ;;  %p282_p9 = scmp.lt.s32.totalorder %s1152_s19, 3 }
  0x1c   : > { %p283_p10 = pnand %p985_p8, %p282_p9 }
  0x1d   : > { %s289_s7 = sand.u32 (!%p283_p10), 1, %s1136_s15   ;;  %v1014_v8 = vld [vmem:[%s1450_s2] sm:$0xff] (!%p283_p10)   ;;  %v1154_v9 = vmov (!%p283_p10), 0   ;;  %v1045_v16 = vld [vmem:[%s1450_s2 + $0x8] sm:$0xff] (!%p283_p10)   ;;  %v1046_v42 = vld [vmem:[%s1450_s2 + $0x10] sm:$0xff] (!%p283_p10)   ;;  %vm565_vm0 = vcmask (!%p283_p10), 523264  }
  0x1e   : > { %286 = sbr.rel (%p283_p10) target bundleno = 298 (0x12a), region = 70  ;;  %s986_s10 = sshll.u32 (!%p283_p10), %s289_s7, 6  ;;  %622 = vmatprep.mubr.bf16.mxu0 (!%p283_p10), %v1154_v9  ;;  %662 = vmatprep.mubr.bf16.mxu1 (!%p283_p10), %v1154_v9  ;;  %v1015_v10 = vunpack.c.l.bf16 (!%p283_p10), %v1014_v8  ;;  %v1016_v11 = vunpack.c.h.bf16 (!%p283_p10), %v1014_v8  ;;  %v1241_v12 = vld [vmem:[%s1448_s0] ss:$0 sm:$0xff] (!%p283_p10)  ;;  %v1049_v24 = vld [vmem:[%s1450_s2 + $0x28] sm:$0xff] (!%p283_p10)   ;;  %v1019_v28 = vunpack.c.l.bf16 (!%p283_p10), %v1045_v16  ;;  %v1020_v29 = vunpack.c.h.bf16 (!%p283_p10), %v1045_v16  ;;  %v1050_v48 = vld [vmem:[%s1450_s2 + $0x30] sm:$0xff] (!%p283_p10)  }
  0x1f   : > { %v1048_v13 = vld [vmem:[%s1450_s2 + $0x20] sm:$0xff] (!%p283_p10)   ;;  %s1249_s23 = scalar_lea.vmem (!%p283_p10), [#allocation2], %s986_s10  ;;  %v1035_v30 = vunpack.c.l.bf16 (!%p283_p10), %v1049_v24  ;;  %v1036_v31 = vunpack.c.h.bf16 (!%p283_p10), %v1049_v24  ;;  %v1023_v51 = vunpack.c.l.bf16 (!%p283_p10), %v1046_v42  ;;  %v1024_v54 = vunpack.c.h.bf16 (!%p283_p10), %v1046_v42  ;;  %v1047_v3 = vld [vmem:[%s1450_s2 + $0x18] sm:$0xff] (!%p283_p10)   ;;  %s987_s13 = sshll.u32 (!%p283_p10), %s289_s7, 8 }
  0x20   : > { %v1031_v14 = vunpack.c.l.bf16 (!%p283_p10), %v1048_v13  ;;  %v1032_v15 = vunpack.c.h.bf16 (!%p283_p10), %v1048_v13  ;;  %v1102_v17 = vld [vmem:[%s1249_s23 + $0x4] ss:$8 sps:$4 sm:$0xff] (!%p283_p10)   ;;  %v1104_v18 = vld [vmem:[%s1249_s23] ss:$8 sps:$4 sm:$0xff] (!%p283_p10)   ;;  %v422_v19 = vmul.f32 (!%p283_p10), %v1015_v10, %v1241_v12  ;;  %v1105_v20 = vld [vmem:[%s1249_s23 + $0x14] ss:$8 sps:$4 sm:$0xff] (!%p283_p10)   ;;  %v423_v21 = vmul.f32 (!%p283_p10), %v1016_v11, %v1241_v12 }
  0x21   : > { %590 = vmatprep.subr.bf16.mxu0 (!%p283_p10), %v1102_v17  ;;  %1052 = vmatprep.subr.bf16.mxu1 (!%p283_p10), %v1102_v17  ;;  %v1107_v25 = vld [vmem:[%s1249_s23 + $0x10] ss:$8 sps:$4 sm:$0xff] (!%p283_p10)   ;;  %v1265_v26 = vld [vmem:[%s1449_s1] ss:$0 sm:$0xff] (!%p283_p10)  ;;  %v1108_v27 = vld [vmem:[%s1249_s23 + $0x24] ss:$8 sps:$4 sm:$0xff] (!%p283_p10)   ;;  %v424_v38 = vmul.f32 (!%p283_p10), %v1019_v28, %v1241_v12  ;;  %v425_v39 = vmul.f32 (!%p283_p10), %v1020_v29, %v1241_v12  ;;  %v432_v40 = vmul.f32 (!%p283_p10), %v1035_v30, %v1241_v12  ;;  %v1039_v57 = vunpack.c.l.bf16 (!%p283_p10), %v1050_v48 }
  0x22   : > { %v430_v22 = vmul.f32 (!%p283_p10), %v1031_v14, %v1241_v12  ;;  %v431_v23 = vmul.f32 (!%p283_p10), %v1032_v15, %v1241_v12  ;;  %591 = vmatpush1.bf16.msra.mxu0 (!%p283_p10), %v1104_v18  ;;  %1056 = vmatpush1.bf16.msra.mxu1 (!%p283_p10), %v1104_v18  ;;  %v445_v32 = vadd.f32 (!%p283_p10), %v1265_v26, %v422_v19  ;;  %v1110_v36 = vld [vmem:[%s1249_s23 + $0x20] ss:$8 sps:$4 sm:$0xff] (!%p283_p10)   ;;  %v1111_v37 = vld [vmem:[%s1249_s23 + $0x34] ss:$8 sps:$4 sm:$0xff] (!%p283_p10)   ;;  %v1113_v47 = vld [vmem:[%s1249_s23 + $0x30] ss:$8 sps:$4 sm:$0xff] (!%p283_p10)   ;;  %v1040_v58 = vunpack.c.h.bf16 (!%p283_p10), %v1050_v48 }
  0x23   : > { %592 = vmatprep.subr.bf16.mxu0 (!%p283_p10), %v1105_v20  ;;  %1053 = vmatprep.subr.bf16.mxu1 (!%p283_p10), %v1105_v20  ;;  %v446_v33 = vadd.f32 (!%p283_p10), %v1265_v26, %v423_v21  ;;  %v433_v41 = vmul.f32 (!%p283_p10), %v1036_v31, %v1241_v12  ;;  %v447_v49 = vadd.f32 (!%p283_p10), %v1265_v26, %v424_v38  ;;  %v1051_v4 = vld [vmem:[%s1450_s2 + $0x38] sm:$0xff] (!%p283_p10)   ;;  %v1027_v10 = vunpack.c.l.bf16 (!%p283_p10), %v1047_v3  ;;  %s1327_s14 = scalar_lea.vmem (!%p283_p10), [#allocation3], %s987_s13 }
  0x24   : > { %v453_v34 = vadd.f32 (!%p283_p10), %v1265_v26, %v430_v22  ;;  %v454_v35 = vadd.f32 (!%p283_p10), %v1265_v26, %v431_v23  ;;  %v461_v43 = vmax.f32 (!%p283_p10), %v445_v32, 0.0  ;;  %v448_v50 = vadd.f32 (!%p283_p10), %v1265_v26, %v425_v39 }
  0x25   : > { %v462_v44 = vmax.f32 %v446_v33, 0.0  ;;  %v455_v52 = vadd.f32 %v1265_v26, %v432_v40  ;;  %v456_v53 = vadd.f32 %v1265_v26, %v433_v41  ;;  %v463_v59 = vmax.f32 %v447_v49, 0.0  ;;  %s1012_s15 = sshll.u32 (%p1215_p6), %s1144_s17, 4 }
  0x26   : > { %593 = vmatpush1.bf16.msra.mxu0 %v1107_v25  ;;  %1057 = vmatpush1.bf16.msra.mxu1 %v1107_v25  ;;  %v469_v45 = vmax.f32 %v453_v34, 0.0  ;;  %v470_v46 = vmax.f32 %v454_v35, 0.0  ;;  %v464_v60 = vmax.f32 %v448_v50, 0.0  ;;  %v426_v61 = vmul.f32 %v1023_v51, %v1241_v12  ;;  %s1370_s22 = scalar_lea.vmem (%p1215_p6), %s1452_s4, %s1012_s15 }
  0x27   : > { %594 = vmatprep.subr.bf16.mxu0 %v1108_v27  ;;  %1054 = vmatprep.subr.bf16.mxu1 %v1108_v27  ;;  %v477_v55 = vpack.c.bf16 %v462_v44, %v461_v43  ;;  %v471_v62 = vmax.f32 %v455_v52, 0.0  ;;  %v472_v63 = vmax.f32 %v456_v53, 0.0  ;;  %v427_v0 = vmul.f32 %v1024_v54, %v1241_v12 }
  0x28   : > { %v481_v56 = vpack.c.bf16 %v470_v46, %v469_v45  ;;  %v434_v1 = vmul.f32 %v1039_v57, %v1241_v12  ;;  %v435_v2 = vmul.f32 %v1040_v58, %v1241_v12  ;;  %v478_v5 = vpack.c.bf16 %v464_v60, %v463_v59 }
  0x29   : > { %v449_v6 = vadd.f32 %v1265_v26, %v426_v61  ;;  %v482_v7 = vpack.c.bf16 %v472_v63, %v471_v62  ;;  %v450_v8 = vadd.f32 %v1265_v26, %v427_v0  ;;  %v1028_v11 = vunpack.c.h.bf16 %v1047_v3 }
  0x2a   : > { %595 = vmatpush1.bf16.msra.mxu0 %v1110_v36  ;;  %1058 = vmatpush1.bf16.msra.mxu1 %v1110_v36  ;;  %v457_v13 = vadd.f32 %v1265_v26, %v434_v1  ;;  %v458_v14 = vadd.f32 %v1265_v26, %v435_v2  ;;  %v1043_v15 = vunpack.c.l.bf16 %v1051_v4  ;;  %v1044_v16 = vunpack.c.h.bf16 %v1051_v4 }
  0x2b   : > { %596 = vmatprep.subr.bf16.mxu0 %v1111_v37  ;;  %1055 = vmatprep.subr.bf16.mxu1 %v1111_v37  ;;  %v465_v17 = vmax.f32 %v449_v6, 0.0  ;;  %v466_v18 = vmax.f32 %v450_v8, 0.0  ;;  %v428_v19 = vmul.f32 %v1027_v10, %v1241_v12  ;;  %v429_v20 = vmul.f32 %v1028_v11, %v1241_v12 }
  0x2c   : > { %v473_v21 = vmax.f32 %v457_v13, 0.0  ;;  %v474_v22 = vmax.f32 %v458_v14, 0.0  ;;  %v436_v23 = vmul.f32 %v1043_v15, %v1241_v12  ;;  %v437_v24 = vmul.f32 %v1044_v16, %v1241_v12 }
  0x2d   : > { %v479_v25 = vpack.c.bf16 %v466_v18, %v465_v17  ;;  %v451_v27 = vadd.f32 %v1265_v26, %v428_v19  ;;  %v452_v29 = vadd.f32 %v1265_v26, %v429_v20 }
  0x2e   : > { %597 = vmatpush1.bf16.msra.mxu0 %v1113_v47  ;;  %1059 = vmatpush1.bf16.msra.mxu1 %v1113_v47  ;;  %v483_v28 = vpack.c.bf16 %v474_v22, %v473_v21  ;;  %v459_v30 = vadd.f32 %v1265_v26, %v436_v23  ;;  %v460_v31 = vadd.f32 %v1265_v26, %v437_v24 }
  0x2f   : > { %v467_v12 = vmax.f32 %v451_v27, 0.0  ;;  %v468_v32 = vmax.f32 %v452_v29, 0.0 }
  0x30   : > { %v475_v33 = vmax.f32 %v459_v30, 0.0  ;;  %v476_v34 = vmax.f32 %v460_v31, 0.0 }
  0x31   : > { %998 = vmatmul.mubr.msk.bf16.vlgmr.msra.gmra.mrb[0].mxu0 %vm565_vm0, %v477_v55  ;;  %1002 = vmatmul.mubr.msk.bf16.vlgmr.msra.gmra.mrb[0].mxu1 %vm565_vm0, %v481_v56  ;;  %v480_v35 = vpack.c.bf16 %v468_v32, %v467_v12 }
  0x32   : > { %632 = vmatprep.mubr.bf16.mxu0 %v1154_v9  ;;  %672 = vmatprep.mubr.bf16.mxu1 %v1154_v9  ;;  %v484_v36 = vpack.c.bf16 %v476_v34, %v475_v33 }
  0x39   : > { %999 = vmatmul.mubr.msk.bf16.gmra.mrb[4].mxu0 %vm565_vm0, %v478_v5  ;;  %1003 = vmatmul.mubr.msk.bf16.gmra.mrb[4].mxu1 %vm565_vm0, %v482_v7 }
  0x3a   : > { %642 = vmatprep.mubr.bf16.mxu0 %v1154_v9  ;;  %682 = vmatprep.mubr.bf16.mxu1 %v1154_v9 }
  0x41   : > { %1000 = vmatmul.mubr.msk.bf16.gmra.mrb[8].mxu0 %vm565_vm0, %v479_v25  ;;  %1004 = vmatmul.mubr.msk.bf16.gmra.mrb[8].mxu1 %vm565_vm0, %v483_v28 }
  0x42   : > { %652 = vmatprep.mubr.bf16.mxu0 %v1154_v9  ;;  %692 = vmatprep.mubr.bf16.mxu1 %v1154_v9 }
  0x49   : > { %1001 = vmatmul.mubr.msk.bf16.gmra.mrb[12].mxu0 %vm565_vm0, %v480_v35  ;;  %1005 = vmatmul.mubr.msk.bf16.gmra.mrb[12].mxu1 %vm565_vm0, %v484_v36 }
 0x104   : > { %v624_v26 = vpop.f32.mrb[0].mxu0  ;;  %v664_v37 = vpop.f32.mrb[0].mxu1 }
 0x105   : > { %v626_v38 = vpop.f32.mrb[1].mxu0  ;;  %v666_v39 = vpop.f32.mrb[1].mxu1  ;;  %735 = vst [vmem:[%s1327_s14] sm:$0xff] %v624_v26  ;;  %751 = vst [vmem:[%s1327_s14 + $0x80] sm:$0xff] %v664_v37 }
 0x106   : > { %v628_v40 = vpop.f32.mrb[2].mxu0  ;;  %v668_v41 = vpop.f32.mrb[2].mxu1  ;;  %736 = vst [vmem:[%s1327_s14 + $0x8] sm:$0xff] %v626_v38  ;;  %752 = vst [vmem:[%s1327_s14 + $0x88] sm:$0xff] %v666_v39 }
 0x107   : > { %v630_v9 = vpop.f32.mrb[3].mxu0  ;;  %v670_v42 = vpop.f32.mrb[3].mxu1  ;;  %737 = vst [vmem:[%s1327_s14 + $0x10] sm:$0xff] %v628_v40  ;;  %753 = vst [vmem:[%s1327_s14 + $0x90] sm:$0xff] %v668_v41 }
 0x108   : > { %738 = vst [vmem:[%s1327_s14 + $0x18] sm:$0xff] %v630_v9  ;;  %754 = vst [vmem:[%s1327_s14 + $0x98] sm:$0xff] %v670_v42 }
 0x10c   : > { %v634_v43 = vpop.f32.mrb[4].mxu0  ;;  %v674_v44 = vpop.f32.mrb[4].mxu1  ;;  %v792_v3 = vld [vmem:[%s1327_s14] sm:$0xff] (%p1215_p6) }
 0x10d   : > { %v636_v45 = vpop.f32.mrb[5].mxu0  ;;  %v676_v46 = vpop.f32.mrb[5].mxu1  ;;  %739 = vst [vmem:[%s1327_s14 + $0x20] sm:$0xff] %v634_v43  ;;  %755 = vst [vmem:[%s1327_s14 + $0xa0] sm:$0xff] %v674_v44  ;;  %v794_v4 = vld [vmem:[%s1327_s14 + $0x8] sm:$0xff] (%p1215_p6)  ;;  %v824_v21 = vld [vmem:[%s1327_s14 + $0x80] sm:$0xff] (%p1215_p6) }
 0x10e   : > { %v638_v47 = vpop.f32.mrb[6].mxu0  ;;  %v678_v48 = vpop.f32.mrb[6].mxu1  ;;  %740 = vst [vmem:[%s1327_s14 + $0x28] sm:$0xff] %v636_v45  ;;  %756 = vst [vmem:[%s1327_s14 + $0xa8] sm:$0xff] %v676_v46  ;;  %v796_v5 = vld [vmem:[%s1327_s14 + $0x10] sm:$0xff] (%p1215_p6)  ;;  %v826_v22 = vld [vmem:[%s1327_s14 + $0x88] sm:$0xff] (%p1215_p6) }
 0x10f   : > { %v640_v49 = vpop.f32.mrb[7].mxu0  ;;  %v680_v50 = vpop.f32.mrb[7].mxu1  ;;  %741 = vst [vmem:[%s1327_s14 + $0x30] sm:$0xff] %v638_v47  ;;  %757 = vst [vmem:[%s1327_s14 + $0xb0] sm:$0xff] %v678_v48  ;;  %v798_v6 = vld [vmem:[%s1327_s14 + $0x18] sm:$0xff] (%p1215_p6)  ;;  %v828_v23 = vld [vmem:[%s1327_s14 + $0x90] sm:$0xff] (%p1215_p6) }
 0x110   : > { %742 = vst [vmem:[%s1327_s14 + $0x38] sm:$0xff] %v640_v49  ;;  %758 = vst [vmem:[%s1327_s14 + $0xb8] sm:$0xff] %v680_v50  ;;  %v830_v24 = vld [vmem:[%s1327_s14 + $0x98] sm:$0xff] (%p1215_p6) }
 0x111   : > { %793 = vst [vmem:[%s1370_s22] sm:$0xff] (%p1215_p6), %v792_v3  ;;  %795 = vst [vmem:[%s1370_s22 + $0x8] sm:$0xff] (%p1215_p6), %v794_v4 }
 0x112   : > { %797 = vst [vmem:[%s1370_s22 + $0x20] sm:$0xff] (%p1215_p6), %v796_v5  ;;  %799 = vst [vmem:[%s1370_s22 + $0x28] sm:$0xff] (%p1215_p6), %v798_v6 }
 0x113   : > { %825 = vst [vmem:[%s1370_s22 + $0x100] sm:$0xff] (%p1215_p6), %v824_v21  ;;  %827 = vst [vmem:[%s1370_s22 + $0x108] sm:$0xff] (%p1215_p6), %v826_v22 }
 0x114   : > { %v644_v51 = vpop.f32.mrb[8].mxu0  ;;  %v684_v52 = vpop.f32.mrb[8].mxu1  ;;  %v800_v7 = vld [vmem:[%s1327_s14 + $0x20] sm:$0xff] (%p1215_p6)  ;;  %829 = vst [vmem:[%s1370_s22 + $0x120] sm:$0xff] (%p1215_p6), %v828_v23  ;;  %831 = vst [vmem:[%s1370_s22 + $0x128] sm:$0xff] (%p1215_p6), %v830_v24 }
 0x115   : > { %v646_v53 = vpop.f32.mrb[9].mxu0  ;;  %v686_v54 = vpop.f32.mrb[9].mxu1  ;;  %743 = vst [vmem:[%s1327_s14 + $0x40] sm:$0xff] %v644_v51  ;;  %759 = vst [vmem:[%s1327_s14 + $0xc0] sm:$0xff] %v684_v52  ;;  %v802_v8 = vld [vmem:[%s1327_s14 + $0x28] sm:$0xff] (%p1215_p6)  ;;  %v832_v25 = vld [vmem:[%s1327_s14 + $0xa0] sm:$0xff] (%p1215_p6) }
 0x116   : > { %v648_v55 = vpop.f32.mrb[10].mxu0  ;;  %v688_v56 = vpop.f32.mrb[10].mxu1  ;;  %744 = vst [vmem:[%s1327_s14 + $0x48] sm:$0xff] %v646_v53  ;;  %760 = vst [vmem:[%s1327_s14 + $0xc8] sm:$0xff] %v686_v54  ;;  %v804_v10 = vld [vmem:[%s1327_s14 + $0x30] sm:$0xff] (%p1215_p6)  ;;  %v834_v27 = vld [vmem:[%s1327_s14 + $0xa8] sm:$0xff] (%p1215_p6) }
 0x117   : > { %v650_v57 = vpop.f32.mrb[11].mxu0  ;;  %v690_v58 = vpop.f32.mrb[11].mxu1  ;;  %745 = vst [vmem:[%s1327_s14 + $0x50] sm:$0xff] %v648_v55  ;;  %761 = vst [vmem:[%s1327_s14 + $0xd0] sm:$0xff] %v688_v56  ;;  %v806_v11 = vld [vmem:[%s1327_s14 + $0x38] sm:$0xff] (%p1215_p6)  ;;  %v836_v28 = vld [vmem:[%s1327_s14 + $0xb0] sm:$0xff] (%p1215_p6) }
 0x118   : > { %746 = vst [vmem:[%s1327_s14 + $0x58] sm:$0xff] %v650_v57  ;;  %762 = vst [vmem:[%s1327_s14 + $0xd8] sm:$0xff] %v690_v58  ;;  %v838_v29 = vld [vmem:[%s1327_s14 + $0xb8] sm:$0xff] (%p1215_p6) }
 0x119   : > { %801 = vst [vmem:[%s1370_s22 + $0x40] sm:$0xff] (%p1215_p6), %v800_v7  ;;  %803 = vst [vmem:[%s1370_s22 + $0x48] sm:$0xff] (%p1215_p6), %v802_v8 }
 0x11a   : > { %773 = sbr.rel (!%p1215_p6) target bundleno = 298 (0x12a), region = 82  ;;  %805 = vst [vmem:[%s1370_s22 + $0x60] sm:$0xff] (%p1215_p6), %v804_v10  ;;  %807 = vst [vmem:[%s1370_s22 + $0x68] sm:$0xff] (%p1215_p6), %v806_v11 }
 0x11b   : > { %833 = vst [vmem:[%s1370_s22 + $0x140] sm:$0xff] (%p1215_p6), %v832_v25  ;;  %835 = vst [vmem:[%s1370_s22 + $0x148] sm:$0xff] (%p1215_p6), %v834_v27 }
 0x11c   : > { %v654_v59 = vpop.f32.mrb[12].mxu0  ;;  %v694_v60 = vpop.f32.mrb[12].mxu1  ;;  %v808_v13 = vld [vmem:[%s1327_s14 + $0x40] sm:$0xff] (%p1215_p6)  ;;  %837 = vst [vmem:[%s1370_s22 + $0x160] sm:$0xff] (%p1215_p6), %v836_v28  ;;  %839 = vst [vmem:[%s1370_s22 + $0x168] sm:$0xff] (%p1215_p6), %v838_v29 }
 0x11d   : > { %v656_v61 = vpop.f32.mrb[13].mxu0  ;;  %v696_v62 = vpop.f32.mrb[13].mxu1  ;;  %747 = vst [vmem:[%s1327_s14 + $0x60] sm:$0xff] %v654_v59  ;;  %763 = vst [vmem:[%s1327_s14 + $0xe0] sm:$0xff] %v694_v60  ;;  %v810_v14 = vld [vmem:[%s1327_s14 + $0x48] sm:$0xff] (%p1215_p6)  ;;  %v840_v30 = vld [vmem:[%s1327_s14 + $0xc0] sm:$0xff] (%p1215_p6) }
 0x11e   : > { %v658_v63 = vpop.f32.mrb[14].mxu0  ;;  %v698_v0 = vpop.f32.mrb[14].mxu1  ;;  %748 = vst [vmem:[%s1327_s14 + $0x68] sm:$0xff] %v656_v61  ;;  %764 = vst [vmem:[%s1327_s14 + $0xe8] sm:$0xff] %v696_v62  ;;  %v812_v15 = vld [vmem:[%s1327_s14 + $0x50] sm:$0xff] (%p1215_p6)  ;;  %v842_v31 = vld [vmem:[%s1327_s14 + $0xc8] sm:$0xff] (%p1215_p6) }
 0x11f   : > { %v660_v1 = vpop.f32.mrb[15].mxu0  ;;  %v700_v2 = vpop.f32.mrb[15].mxu1  ;;  %749 = vst [vmem:[%s1327_s14 + $0x70] sm:$0xff] %v658_v63  ;;  %765 = vst [vmem:[%s1327_s14 + $0xf0] sm:$0xff] %v698_v0  ;;  %v814_v16 = vld [vmem:[%s1327_s14 + $0x58] sm:$0xff] (%p1215_p6)  ;;  %v844_v12 = vld [vmem:[%s1327_s14 + $0xd0] sm:$0xff] (%p1215_p6) }
 0x120   : > { %750 = vst [vmem:[%s1327_s14 + $0x78] sm:$0xff] %v660_v1  ;;  %766 = vst [vmem:[%s1327_s14 + $0xf8] sm:$0xff] %v700_v2  ;;  %v846_v32 = vld [vmem:[%s1327_s14 + $0xd8] sm:$0xff] (%p1215_p6) }
 0x121   : > { %809 = vst [vmem:[%s1370_s22 + $0x80] sm:$0xff] %v808_v13  ;;  %811 = vst [vmem:[%s1370_s22 + $0x88] sm:$0xff] %v810_v14 }
 0x122   : > { %813 = vst [vmem:[%s1370_s22 + $0xa0] sm:$0xff] %v812_v15  ;;  %815 = vst [vmem:[%s1370_s22 + $0xa8] sm:$0xff] %v814_v16 }
 0x123   : > { %841 = vst [vmem:[%s1370_s22 + $0x180] sm:$0xff] %v840_v30  ;;  %843 = vst [vmem:[%s1370_s22 + $0x188] sm:$0xff] %v842_v31 }
 0x124   : > { %v816_v17 = vld [vmem:[%s1327_s14 + $0x60] sm:$0xff]  ;;  %845 = vst [vmem:[%s1370_s22 + $0x1a0] sm:$0xff] %v844_v12  ;;  %847 = vst [vmem:[%s1370_s22 + $0x1a8] sm:$0xff] %v846_v32 }
 0x125   : > { %v818_v18 = vld [vmem:[%s1327_s14 + $0x68] sm:$0xff]  ;;  %817 = vst [vmem:[%s1370_s22 + $0xc0] sm:$0xff] %v816_v17  ;;  %v848_v33 = vld [vmem:[%s1327_s14 + $0xe0] sm:$0xff] }
 0x126   : > { %v820_v19 = vld [vmem:[%s1327_s14 + $0x70] sm:$0xff]  ;;  %819 = vst [vmem:[%s1370_s22 + $0xc8] sm:$0xff] %v818_v18  ;;  %v850_v34 = vld [vmem:[%s1327_s14 + $0xe8] sm:$0xff]  ;;  %849 = vst [vmem:[%s1370_s22 + $0x1c0] sm:$0xff] %v848_v33 }
 0x127   : > { %821 = vst [vmem:[%s1370_s22 + $0xe0] sm:$0xff] %v820_v19  ;;  %v822_v20 = vld [vmem:[%s1327_s14 + $0x78] sm:$0xff]  ;;  %851 = vst [vmem:[%s1370_s22 + $0x1c8] sm:$0xff] %v850_v34  ;;  %v852_v35 = vld [vmem:[%s1327_s14 + $0xf0] sm:$0xff] }
 0x128   : > { %823 = vst [vmem:[%s1370_s22 + $0xe8] sm:$0xff] %v822_v20  ;;  %v854_v36 = vld [vmem:[%s1327_s14 + $0xf8] sm:$0xff]  ;;  %853 = vst [vmem:[%s1370_s22 + $0x1e0] sm:$0xff] %v852_v35 }
 0x129   : > { %855 = vst [vmem:[%s1370_s22 + $0x1e8] sm:$0xff] %v854_v36 }
 0x12a PF: > { %s14_s19 = sadd.s32 1, %s1152_s19   ;;  %s1454_s15 = smov %s1140_s16 }
 0x12b   : > { %p11_p11 = scmp.ge.s32.totalorder %s14_s19, 4   ;;  %s1455_s16 = smov %s1220_s25 }
 0x12c   : > { %s1456_s17 = smov %s1148_s18  ;;  %s1457_s18 = smov %s1459_s20 }
 0x12d   :  { %13 = sbr.rel (!%p11_p11) target bundleno = 3 (0x3), region = 145 }

// kernel: generator_forward.17
= control target key start
LH: loop header
LB: loop body
LE: loop exit
PB: predicated region body
PF: predicated region fallthrough
CT: control target
= control target key end

     0   :  { %vm14_vm0 = vcmask 253952   ;;  %v651_v0 = vmov 0.0   ;;  %vm146_vm1 = vcmask 261120   ;;  %s1446_s1 = inlined_call_operand.vmem [shape: f32[1,32], index: 1, kind: output, shape index: {0}]   ;;  %s1447_s2 = inlined_call_operand.vmem [shape: f32[1,32], index: 2, kind: output, shape index: {1}]   ;;  %s1448_s0 = inlined_call_operand.vmem [shape: bf16[512,32], index: 0, kind: input, shape index: {}]  }
   0x1   :  { %15 = vst.msk [vmem:[%s1446_s1] sm:$0x1] %vm14_vm0, %v651_v0  ;;  %16 = vst.msk [vmem:[%s1447_s2] sm:$0x1] %vm14_vm0, %v651_v0  ;;  %v492_v1 = vld [vmem:[%s1448_s0] sm:$0xff]   ;;  %v619_v2 = vld [vmem:[%s1448_s0 + $0x8] sm:$0xff]  }
   0x2   :  { %v620_v3 = vld [vmem:[%s1448_s0 + $0x10] sm:$0xff]   ;;  %v621_v4 = vld [vmem:[%s1448_s0 + $0x18] sm:$0xff]   ;;  %v622_v5 = vld [vmem:[%s1448_s0 + $0x20] sm:$0xff]   ;;  %v693_v7 = vunpack.c.l.bf16 %v492_v1  ;;  %v695_v8 = vunpack.c.h.bf16 %v492_v1  ;;  %v697_v9 = vunpack.c.l.bf16 %v619_v2  ;;  %v705_v12 = vunpack.c.h.bf16 %v619_v2 }
   0x3   :  { %v623_v6 = vld [vmem:[%s1448_s0 + $0x28] sm:$0xff]   ;;  %v636_v11 = vld [vmem:[%s1448_s0 + $0x90] sm:$0xff]   ;;  %v707_v13 = vunpack.c.l.bf16 %v620_v3  ;;  %v709_v14 = vunpack.c.h.bf16 %v620_v3  ;;  %v711_v15 = vunpack.c.l.bf16 %v621_v4  ;;  %v637_v16 = vld [vmem:[%s1448_s0 + $0x98] sm:$0xff]   ;;  %v719_v18 = vunpack.c.h.bf16 %v621_v4 }
   0x4   :  { %v635_v10 = vld [vmem:[%s1448_s0 + $0x88] sm:$0xff]   ;;  %v638_v17 = vld [vmem:[%s1448_s0 + $0xa0] sm:$0xff]   ;;  %v721_v19 = vunpack.c.l.bf16 %v622_v5  ;;  %v723_v20 = vunpack.c.h.bf16 %v622_v5  ;;  %v725_v21 = vunpack.c.l.bf16 %v623_v6  ;;  %v727_v22 = vunpack.c.h.bf16 %v623_v6  ;;  %v640_v27 = vld [vmem:[%s1448_s0 + $0xb0] sm:$0xff]  }
   0x5   :  { %v729_v23 = vunpack.c.l.bf16 %v635_v10  ;;  %v731_v24 = vunpack.c.h.bf16 %v635_v10  ;;  %v733_v25 = vunpack.c.l.bf16 %v636_v11  ;;  %v639_v26 = vld [vmem:[%s1448_s0 + $0xa8] sm:$0xff]   ;;  %v741_v28 = vunpack.c.h.bf16 %v636_v11  ;;  %v641_v32 = vld [vmem:[%s1448_s0 + $0xb8] sm:$0xff]   ;;  %v642_v34 = vld [vmem:[%s1448_s0 + $0xc0] sm:$0xff]  }
   0x6   :  { %v743_v29 = vunpack.c.l.bf16 %v637_v16  ;;  %v745_v30 = vunpack.c.h.bf16 %v637_v16  ;;  %v747_v31 = vunpack.c.l.bf16 %v638_v17  ;;  %v752_v33 = vunpack.c.h.bf16 %v638_v17  ;;  %v643_v35 = vld [vmem:[%s1448_s0 + $0xc8] sm:$0xff]   ;;  %v644_v42 = vld [vmem:[%s1448_s0 + $0xd0] sm:$0xff]   ;;  %v645_v47 = vld [vmem:[%s1448_s0 + $0xd8] sm:$0xff]  }
   0x7   :  { %v147_v36 = vsel %vm146_vm1, %v693_v7, 0.0  ;;  %v148_v37 = vsel %vm146_vm1, %v695_v8, 0.0  ;;  %v150_v38 = vsel %vm146_vm1, %v697_v9, 0.0  ;;  %v766_v39 = vunpack.c.l.bf16 %v639_v26  ;;  %v646_v48 = vld [vmem:[%s1448_s0 + $0xe0] sm:$0xff]   ;;  %v647_v53 = vld [vmem:[%s1448_s0 + $0xe8] sm:$0xff]   ;;  %v648_v58 = vld [vmem:[%s1448_s0 + $0xf0] sm:$0xff]  }
   0x8   :  { %v768_v40 = vunpack.c.h.bf16 %v639_v26  ;;  %v770_v41 = vunpack.c.l.bf16 %v640_v27  ;;  %v149_v43 = vadd.f32 %v148_v37, %v147_v36  ;;  %v775_v44 = vunpack.c.h.bf16 %v640_v27  ;;  %v649_v59 = vld [vmem:[%s1448_s0 + $0xf8] sm:$0xff]  }
   0x9   :  { %v777_v45 = vunpack.c.l.bf16 %v641_v32  ;;  %v779_v46 = vunpack.c.h.bf16 %v641_v32  ;;  %v152_v49 = vsel %vm146_vm1, %v705_v12, 0.0  ;;  %v789_v50 = vunpack.c.l.bf16 %v642_v34 }
   0xa   :  { %v791_v51 = vunpack.c.h.bf16 %v642_v34  ;;  %v793_v52 = vunpack.c.l.bf16 %v643_v35  ;;  %v151_v54 = vadd.f32 %v150_v38, %v149_v43  ;;  %v798_v55 = vunpack.c.h.bf16 %v643_v35 }
   0xb   :  { %v800_v56 = vunpack.c.l.bf16 %v644_v42  ;;  %v802_v57 = vunpack.c.h.bf16 %v644_v42  ;;  %v154_v60 = vsel %vm146_vm1, %v707_v13, 0.0  ;;  %v812_v61 = vunpack.c.l.bf16 %v645_v47 }
   0xc   :  { %v814_v62 = vunpack.c.h.bf16 %v645_v47  ;;  %v816_v63 = vunpack.c.l.bf16 %v646_v48  ;;  %v153_v0 = vadd.f32 %v152_v49, %v151_v54  ;;  %v818_v1 = vunpack.c.h.bf16 %v646_v48 }
   0xd   :  { %v820_v2 = vunpack.c.l.bf16 %v647_v53  ;;  %v822_v3 = vunpack.c.h.bf16 %v647_v53  ;;  %v156_v4 = vsel %vm146_vm1, %v709_v14, 0.0  ;;  %v826_v5 = vunpack.c.l.bf16 %v648_v58 }
   0xe   :  { %1471 = vst [vmem:[#allocation2_spill] sm:$0xff] %v814_v62  ;;  %1472 = vst [vmem:[#allocation3_spill] sm:$0xff] %v816_v63  ;;  %v828_v6 = vunpack.c.h.bf16 %v648_v58  ;;  %v830_v10 = vunpack.c.l.bf16 %v649_v59  ;;  %v155_v11 = vadd.f32 %v154_v60, %v153_v0  ;;  %v832_v16 = vunpack.c.h.bf16 %v649_v59 }
   0xf   :  { %1473 = vst [vmem:[#allocation4_spill] sm:$0xff] %v818_v1  ;;  %1474 = vst [vmem:[#allocation5_spill] sm:$0xff] %v820_v2  ;;  %v158_v17 = vsel %vm146_vm1, %v711_v15, 0.0  ;;  %v160_v26 = vsel %vm146_vm1, %v719_v18, 0.0  ;;  %v162_v27 = vsel %vm146_vm1, %v721_v19, 0.0  ;;  %v164_v34 = vsel %vm146_vm1, %v723_v20, 0.0 }
  0x10   :  { %1475 = vst [vmem:[#allocation6_spill] sm:$0xff] %v822_v3  ;;  %1476 = vst [vmem:[#allocation7_spill] sm:$0xff] %v826_v5  ;;  %v157_v32 = vadd.f32 %v156_v4, %v155_v11  ;;  %v166_v35 = vsel %vm146_vm1, %v725_v21, 0.0  ;;  %v846_v36 = vsel %vm146_vm1, %v729_v23, 0.0  ;;  %v850_v37 = vsel %vm146_vm1, %v731_v24, 0.0 }
  0x11   :  { %1477 = vst [vmem:[#allocation8_spill] sm:$0xff] %v828_v6  ;;  %1478 = vst [vmem:[#allocation9_spill] sm:$0xff] %v830_v10  ;;  %v854_v38 = vsel %vm146_vm1, %v733_v25, 0.0  ;;  %v858_v42 = vsel %vm146_vm1, %v741_v28, 0.0  ;;  %v862_v43 = vsel %vm146_vm1, %v743_v29, 0.0  ;;  %v866_v48 = vsel %vm146_vm1, %v745_v30, 0.0 }
  0x12   :  { %1479 = vst [vmem:[#allocation10_spill] sm:$0xff] %v832_v16  ;;  %1480 = vst [vmem:[#allocation11_spill] sm:$0xff] %v846_v36  ;;  %v159_v47 = vadd.f32 %v158_v17, %v157_v32  ;;  %v870_v49 = vsel %vm146_vm1, %v747_v31, 0.0  ;;  %v874_v53 = vsel %vm146_vm1, %v752_v33, 0.0  ;;  %v878_v54 = vsel %vm146_vm1, %v766_v39, 0.0 }
  0x13   :  { %1481 = vst [vmem:[#allocation12_spill] sm:$0xff] %v850_v37  ;;  %1482 = vst [vmem:[#allocation13_spill] sm:$0xff] %v854_v38  ;;  %v882_v58 = vsel %vm146_vm1, %v768_v40, 0.0  ;;  %v886_v59 = vsel %vm146_vm1, %v770_v41, 0.0  ;;  %v890_v60 = vsel %vm146_vm1, %v775_v44, 0.0  ;;  %v894_v4 = vsel %vm146_vm1, %v777_v45, 0.0 }
  0x14   :  { %1483 = vst [vmem:[#allocation14_spill] sm:$0xff] %v858_v42  ;;  %1484 = vst [vmem:[#allocation15_spill] sm:$0xff] %v862_v43  ;;  %v161_v0 = vadd.f32 %v160_v26, %v159_v47  ;;  %v898_v11 = vsel %vm146_vm1, %v779_v46, 0.0  ;;  %v902_v17 = vsel %vm146_vm1, %v789_v50, 0.0  ;;  %v906_v32 = vsel %vm146_vm1, %v791_v51, 0.0 }
  0x15   :  { %1485 = vst [vmem:[#allocation16_spill] sm:$0xff] %v866_v48  ;;  %1486 = vst [vmem:[#allocation17_spill] sm:$0xff] %v870_v49  ;;  %v914_v26 = vsel %vm146_vm1, %v798_v55, 0.0  ;;  %v918_v47 = vsel %vm146_vm1, %v800_v56, 0.0 }
  0x16   :  { %1487 = vst [vmem:[#allocation18_spill] sm:$0xff] %v874_v53  ;;  %1488 = vst [vmem:[#allocation19_spill] sm:$0xff] %v878_v54  ;;  %v630_v53 = vld [vmem:[%s1448_s0 + $0x60] sm:$0xff]  }
  0x17   :  { %1489 = vst [vmem:[#allocation20_spill] sm:$0xff] %v882_v58  ;;  %1490 = vst [vmem:[#allocation21_spill] sm:$0xff] %v886_v59 }
  0x18   :  { %1491 = vst [vmem:[#allocation22_spill] sm:$0xff] %v890_v60  ;;  %1492 = vst [vmem:[#allocation23_spill] sm:$0xff] %v894_v4  ;;  %v910_v60 = vsel %vm146_vm1, %v793_v52, 0.0  ;;  %v627_v4 = vld [vmem:[%s1448_s0 + $0x48] sm:$0xff]  }
  0x19   :  { %1493 = vst [vmem:[#allocation24_spill] sm:$0xff] %v898_v11  ;;  %1494 = vst [vmem:[#allocation25_spill] sm:$0xff] %v902_v17  ;;  %v624_v17 = vld [vmem:[%s1448_s0 + $0x30] sm:$0xff]   ;;  %v163_v11 = vadd.f32 %v162_v27, %v161_v0  ;;  %v626_v27 = vld [vmem:[%s1448_s0 + $0x40] sm:$0xff]   ;;  %v943_v0 = vsel %vm146_vm1, %v816_v63, 0.0  ;;  %v999_v43 = vunpack.c.l.bf16 %v627_v4  ;;  %v1001_v42 = vunpack.c.h.bf16 %v627_v4 }
  0x1a   :  { %1495 = vst [vmem:[#allocation26_spill] sm:$0xff] %v906_v32  ;;  %1496 = vst [vmem:[#allocation27_spill] sm:$0xff] %v910_v60  ;;  %v925_v32 = vsel %vm146_vm1, %v802_v57, 0.0  ;;  %v929_v60 = vsel %vm146_vm1, %v812_v61, 0.0  ;;  %v972_v58 = vunpack.c.l.bf16 %v624_v17  ;;  %v997_v48 = vunpack.c.h.bf16 %v626_v27  ;;  %v633_v4 = vld [vmem:[%s1448_s0 + $0x78] sm:$0xff]  }
  0x1b   :  { %1497 = vst [vmem:[#allocation28_spill] sm:$0xff] %v914_v26  ;;  %1498 = vst [vmem:[#allocation29_spill] sm:$0xff] %v918_v47  ;;  %v933_v26 = vsel %vm146_vm1, %v814_v62, 0.0  ;;  %v625_v47 = vld [vmem:[%s1448_s0 + $0x38] sm:$0xff]   ;;  %v165_v59 = vadd.f32 %v164_v34, %v163_v11  ;;  %v628_v34 = vld [vmem:[%s1448_s0 + $0x50] sm:$0xff]   ;;  %v1036_v63 = vunpack.c.l.bf16 %v633_v4 }
  0x1c   :  { %1499 = vst [vmem:[#allocation30_spill] sm:$0xff] %v925_v32  ;;  %1500 = vst [vmem:[#allocation31_spill] sm:$0xff] %v929_v60  ;;  %v947_v32 = vsel %vm146_vm1, %v818_v1, 0.0  ;;  %v951_v60 = vsel %vm146_vm1, %v820_v2, 0.0  ;;  %v629_v11 = vld [vmem:[%s1448_s0 + $0x58] sm:$0xff]   ;;  %v990_v54 = vunpack.c.h.bf16 %v625_v47  ;;  %v170_v38 = vsel %vm146_vm1, %v972_v58, 0.0 }
  0x1d   :  { %1501 = vst [vmem:[#allocation32_spill] sm:$0xff] %v933_v26  ;;  %1502 = vst [vmem:[#allocation33_spill] sm:$0xff] %v943_v0  ;;  %v955_v26 = vsel %vm146_vm1, %v822_v3, 0.0  ;;  %v962_v0 = vsel %vm146_vm1, %v826_v5, 0.0  ;;  %v167_v49 = vadd.f32 %v166_v35, %v165_v59  ;;  %v1011_v37 = vunpack.c.l.bf16 %v628_v34 }
  0x1e   :  { %1503 = vst [vmem:[#allocation34_spill] sm:$0xff] %v947_v32  ;;  %1504 = vst [vmem:[#allocation35_spill] sm:$0xff] %v951_v60  ;;  %v966_v32 = vsel %vm146_vm1, %v828_v6, 0.0  ;;  %v970_v60 = vsel %vm146_vm1, %v830_v10, 0.0  ;;  %v1013_v35 = vunpack.c.h.bf16 %v628_v34  ;;  %v1015_v59 = vunpack.c.l.bf16 %v629_v11 }
  0x1f   :  { %1505 = vst [vmem:[#allocation36_spill] sm:$0xff] %v955_v26  ;;  %1506 = vst [vmem:[#allocation37_spill] sm:$0xff] %v962_v0  ;;  %v974_v26 = vunpack.c.h.bf16 %v624_v17  ;;  %v168_v0 = vsel %vm146_vm1, %v727_v22, 0.0  ;;  %v992_v17 = vunpack.c.l.bf16 %v626_v27  ;;  %v1020_v36 = vunpack.c.h.bf16 %v629_v11 }
  0x20   :  { %1507 = vst [vmem:[#allocation38_spill] sm:$0xff] %v966_v32  ;;  %1508 = vst [vmem:[#allocation39_spill] sm:$0xff] %v970_v60  ;;  %v986_v32 = vsel %vm146_vm1, %v832_v16, 0.0  ;;  %v988_v60 = vunpack.c.l.bf16 %v625_v47  ;;  %v632_v47 = vld [vmem:[%s1448_s0 + $0x70] sm:$0xff]   ;;  %v169_v27 = vadd.f32 %v168_v0, %v167_v49  ;;  %v1022_v16 = vunpack.c.l.bf16 %v630_v53 }
  0x21   :  { %1509 = vst [vmem:[#allocation40_spill] sm:$0xff] %v986_v32  ;;  %1510 = vst [vmem:[#allocation41_spill] sm:$0xff] %v997_v48  ;;  %v631_v32 = vld [vmem:[%s1448_s0 + $0x68] sm:$0xff]   ;;  %v1024_v10 = vunpack.c.h.bf16 %v630_v53  ;;  %v172_v6 = vsel %vm146_vm1, %v974_v26, 0.0  ;;  %v1032_v3 = vunpack.c.l.bf16 %v632_v47  ;;  %v1034_v1 = vunpack.c.h.bf16 %v632_v47 }
  0x22   :  { %1511 = vst [vmem:[#allocation42_spill] sm:$0xff] %v999_v43  ;;  %1512 = vst [vmem:[#allocation43_spill] sm:$0xff] %v1001_v42  ;;  %v1028_v5 = vunpack.c.l.bf16 %v631_v32  ;;  %v1030_v34 = vunpack.c.h.bf16 %v631_v32  ;;  %v171_v2 = vadd.f32 %v170_v38, %v169_v27  ;;  %v1038_v49 = vunpack.c.h.bf16 %v633_v4 }
  0x23   :  { %1513 = vst [vmem:[#allocation44_spill] sm:$0xff] %v1013_v35  ;;  %1514 = vst [vmem:[#allocation45_spill] sm:$0xff] %v1015_v59  ;;  %v174_v53 = vsel %vm146_vm1, %v988_v60, 0.0  ;;  %v176_v11 = vsel %vm146_vm1, %v990_v54, 0.0  ;;  %v178_v32 = vsel %vm146_vm1, %v992_v17, 0.0  ;;  %v180_v62 = vsel %vm146_vm1, %v997_v48, 0.0 }
  0x24   :  { %1515 = vst [vmem:[#allocation46_spill] sm:$0xff] %v1020_v36  ;;  %1516 = vst [vmem:[#allocation47_spill] sm:$0xff] %v1022_v16  ;;  %v173_v0 = vadd.f32 %v172_v6, %v171_v2  ;;  %v182_v38 = vsel %vm146_vm1, %v999_v43, 0.0  ;;  %v184_v47 = vsel %vm146_vm1, %v1001_v42, 0.0  ;;  %v186_v4 = vsel %vm146_vm1, %v1011_v37, 0.0 }
  0x25   :  { %1517 = vst [vmem:[#allocation48_spill] sm:$0xff] %v1024_v10  ;;  %1518 = vst [vmem:[#allocation49_spill] sm:$0xff] %v1028_v5  ;;  %v188_v2 = vsel %vm146_vm1, %v1013_v35, 0.0  ;;  %v1058_v27 = vsel %vm146_vm1, %v1015_v59, 0.0  ;;  %v1062_v48 = vsel %vm146_vm1, %v1020_v36, 0.0  ;;  %v1066_v43 = vsel %vm146_vm1, %v1022_v16, 0.0 }
  0x26   :  { %1519 = vst [vmem:[#allocation50_spill] sm:$0xff] %v1030_v34  ;;  %1520 = vst [vmem:[#allocation51_spill] sm:$0xff] %v1032_v3  ;;  %v175_v6 = vadd.f32 %v174_v53, %v173_v0  ;;  %v1070_v42 = vsel %vm146_vm1, %v1024_v10, 0.0  ;;  %v1074_v35 = vsel %vm146_vm1, %v1028_v5, 0.0  ;;  %v1078_v53 = vsel %vm146_vm1, %v1030_v34, 0.0 }
  0x27   :  { %1521 = vst [vmem:[#allocation52_spill] sm:$0xff] %v1034_v1  ;;  %1522 = vst [vmem:[#allocation53_spill] sm:$0xff] %v1036_v63  ;;  %v1082_v0 = vsel %vm146_vm1, %v1032_v3, 0.0  ;;  %v1086_v16 = vsel %vm146_vm1, %v1034_v1, 0.0  ;;  %v1090_v10 = vsel %vm146_vm1, %v1036_v63, 0.0  ;;  %v284_v5 = vmul.f32 %v693_v7, %v693_v7 }
  0x28   :  { %v177_v36 = vadd.f32 %v176_v11, %v175_v6  ;;  %v285_v34 = vmul.f32 %v695_v8, %v695_v8  ;;  %v286_v59 = vmul.f32 %v697_v9, %v697_v9  ;;  %v287_v11 = vmul.f32 %v705_v12, %v705_v12 }
  0x29   :  { %v288_v6 = vmul.f32 %v707_v13, %v707_v13  ;;  %v289_v63 = vmul.f32 %v709_v14, %v709_v14  ;;  %v290_v3 = vmul.f32 %v711_v15, %v711_v15  ;;  %v291_v7 = vmul.f32 %v719_v18, %v719_v18 }
  0x2a   :  { %v179_v1 = vadd.f32 %v178_v32, %v177_v36  ;;  %v292_v8 = vmul.f32 %v721_v19, %v721_v19  ;;  %v293_v9 = vmul.f32 %v723_v20, %v723_v20  ;;  %v294_v12 = vmul.f32 %v725_v21, %v725_v21 }
  0x2b   :  { %v295_v13 = vmul.f32 %v727_v22, %v727_v22  ;;  %v296_v14 = vmul.f32 %v972_v58, %v972_v58  ;;  %v1120_v15 = vmul.f32 %v974_v26, %v974_v26  ;;  %v1124_v18 = vmul.f32 %v988_v60, %v988_v60 }
  0x2c   :  { %v181_v36 = vadd.f32 %v180_v62, %v179_v1  ;;  %v318_v19 = vmul.f32 %v729_v23, %v729_v23  ;;  %v319_v20 = vmul.f32 %v731_v24, %v731_v24  ;;  %v320_v21 = vmul.f32 %v733_v25, %v733_v25 }
  0x2d   :  { %v321_v22 = vmul.f32 %v741_v28, %v741_v28  ;;  %v322_v1 = vmul.f32 %v743_v29, %v743_v29  ;;  %v323_v58 = vmul.f32 %v745_v30, %v745_v30  ;;  %v324_v60 = vmul.f32 %v747_v31, %v747_v31 }
  0x2e   :  { %v183_v62 = vadd.f32 %v182_v38, %v181_v36  ;;  %v325_v23 = vmul.f32 %v752_v33, %v752_v33  ;;  %v326_v24 = vmul.f32 %v766_v39, %v766_v39  ;;  %v348_v25 = vsel %vm146_vm1, %v284_v5, 0.0 }
  0x2f   :  { %v349_v28 = vsel %vm146_vm1, %v285_v34, 0.0  ;;  %v327_v29 = vmul.f32 %v768_v40, %v768_v40  ;;  %v351_v30 = vsel %vm146_vm1, %v286_v59, 0.0  ;;  %v328_v31 = vmul.f32 %v770_v41, %v770_v41 }
  0x30   :  { %v185_v26 = vadd.f32 %v184_v47, %v183_v62  ;;  %v350_v32 = vadd.f32 %v349_v28, %v348_v25  ;;  %v329_v33 = vmul.f32 %v775_v44, %v775_v44  ;;  %v330_v39 = vmul.f32 %v777_v45, %v777_v45  ;;  %v1526_v28 = vld [vmem:[#allocation5_spill] sm:$0xff] }
  0x31   :  { %v353_v5 = vsel %vm146_vm1, %v287_v11, 0.0  ;;  %v331_v34 = vmul.f32 %v779_v46, %v779_v46  ;;  %v332_v40 = vmul.f32 %v789_v50, %v789_v50  ;;  %v333_v59 = vmul.f32 %v791_v51, %v791_v51  ;;  %v1523_v51 = vld [vmem:[#allocation2_spill] sm:$0xff] }
  0x32   :  { %v187_v38 = vadd.f32 %v186_v4, %v185_v26  ;;  %v352_v47 = vadd.f32 %v351_v30, %v350_v32  ;;  %v334_v41 = vmul.f32 %v793_v52, %v793_v52  ;;  %v335_v44 = vmul.f32 %v798_v55, %v798_v55  ;;  %v1524_v52 = vld [vmem:[#allocation3_spill] sm:$0xff]  ;;  %v1527_v32 = vld [vmem:[#allocation6_spill] sm:$0xff] }
  0x33   :  { %v355_v45 = vsel %vm146_vm1, %v288_v6, 0.0  ;;  %v336_v4 = vmul.f32 %v800_v56, %v800_v56  ;;  %v337_v46 = vmul.f32 %v802_v57, %v802_v57  ;;  %v338_v36 = vmul.f32 %v812_v61, %v812_v61  ;;  %v1525_v6 = vld [vmem:[#allocation4_spill] sm:$0xff]  ;;  %v1528_v30 = vld [vmem:[#allocation7_spill] sm:$0xff] }
  0x34   :  { %v189_v11 = vadd.f32 %v188_v2, %v187_v38  ;;  %v354_v50 = vadd.f32 %v353_v5, %v352_v47  ;;  %v339_v62 = vmul.f32 %v1523_v51, %v1523_v51  ;;  %v340_v25 = vmul.f32 %v1524_v52, %v1524_v52  ;;  %v1529_v38 = vld [vmem:[#allocation8_spill] sm:$0xff]  ;;  %v1531_v52 = vld [vmem:[#allocation10_spill] sm:$0xff] }
  0x35   :  { %v357_v55 = vsel %vm146_vm1, %v289_v63, 0.0  ;;  %v341_v56 = vmul.f32 %v1525_v6, %v1525_v6  ;;  %v342_v57 = vmul.f32 %v1526_v28, %v1526_v28  ;;  %v343_v61 = vmul.f32 %v1527_v32, %v1527_v32 }
  0x36   :  { %v191_v2 = vadd.f32 %v1058_v27, %v189_v11  ;;  %v356_v26 = vadd.f32 %v355_v45, %v354_v50  ;;  %v344_v5 = vmul.f32 %v1528_v30, %v1528_v30  ;;  %v345_v47 = vmul.f32 %v1529_v38, %v1529_v38  ;;  %v1530_v11 = vld [vmem:[#allocation9_spill] sm:$0xff] }
  0x37   :  { %v359_v63 = vsel %vm146_vm1, %v290_v3, 0.0  ;;  %v346_v51 = vmul.f32 %v1530_v11, %v1530_v11  ;;  %v347_v6 = vmul.f32 %v1531_v52, %v1531_v52  ;;  %v361_v50 = vsel %vm146_vm1, %v291_v7, 0.0 }
  0x38   :  { %v193_v27 = vadd.f32 %v1062_v48, %v191_v2  ;;  %v358_v45 = vadd.f32 %v357_v55, %v356_v26  ;;  %v363_v28 = vsel %vm146_vm1, %v292_v8, 0.0  ;;  %v365_v32 = vsel %vm146_vm1, %v293_v9, 0.0 }
  0x39   :  { %v367_v30 = vsel %vm146_vm1, %v294_v12, 0.0  ;;  %v369_v48 = vsel %vm146_vm1, %v295_v13, 0.0  ;;  %v371_v2 = vsel %vm146_vm1, %v296_v14, 0.0  ;;  %v1203_v11 = vsel %vm146_vm1, %v318_v19, 0.0 }
  0x3a   :  { %v195_v38 = vadd.f32 %v1066_v43, %v193_v27  ;;  %v360_v3 = vadd.f32 %v359_v63, %v358_v45  ;;  %v1206_v55 = vsel %vm146_vm1, %v319_v20, 0.0  ;;  %v1209_v7 = vsel %vm146_vm1, %v320_v21, 0.0 }
  0x3b   :  { %v1212_v8 = vsel %vm146_vm1, %v321_v22, 0.0  ;;  %v1216_v12 = vsel %vm146_vm1, %v322_v1, 0.0  ;;  %v1219_v13 = vsel %vm146_vm1, %v323_v58, 0.0  ;;  %v1222_v14 = vsel %vm146_vm1, %v324_v60, 0.0 }
  0x3c   :  { %v197_v9 = vadd.f32 %v1070_v42, %v195_v38  ;;  %v362_v43 = vadd.f32 %v361_v50, %v360_v3  ;;  %v1225_v19 = vsel %vm146_vm1, %v325_v23, 0.0  ;;  %v1228_v20 = vsel %vm146_vm1, %v326_v24, 0.0 }
  0x3d   :  { %v1231_v21 = vsel %vm146_vm1, %v327_v29, 0.0  ;;  %v1235_v1 = vsel %vm146_vm1, %v328_v31, 0.0  ;;  %v1238_v58 = vsel %vm146_vm1, %v329_v33, 0.0  ;;  %v1241_v60 = vsel %vm146_vm1, %v330_v39, 0.0 }
  0x3e   :  { %v199_v42 = vadd.f32 %v1074_v35, %v197_v9  ;;  %v364_v22 = vadd.f32 %v363_v28, %v362_v43  ;;  %v1244_v23 = vsel %vm146_vm1, %v331_v34, 0.0  ;;  %v1247_v24 = vsel %vm146_vm1, %v332_v40, 0.0 }
  0x3f   :  { %v1250_v29 = vsel %vm146_vm1, %v333_v59, 0.0  ;;  %v1254_v31 = vsel %vm146_vm1, %v334_v41, 0.0  ;;  %v1257_v33 = vsel %vm146_vm1, %v335_v44, 0.0  ;;  %v1260_v39 = vsel %vm146_vm1, %v336_v4, 0.0 }
  0x40   :  { %v201_v35 = vadd.f32 %v1078_v53, %v199_v42  ;;  %v366_v26 = vadd.f32 %v365_v32, %v364_v22  ;;  %v1263_v34 = vsel %vm146_vm1, %v337_v46, 0.0  ;;  %v1266_v40 = vsel %vm146_vm1, %v338_v36, 0.0  ;;  %v634_v53 = vld [vmem:[%s1448_s0 + $0x80] sm:$0xff]  }
  0x41   :  { %v1269_v59 = vsel %vm146_vm1, %v339_v62, 0.0  ;;  %v1276_v63 = vsel %vm146_vm1, %v340_v25, 0.0  ;;  %v1279_v4 = vsel %vm146_vm1, %v341_v56, 0.0  ;;  %v1282_v46 = vsel %vm146_vm1, %v342_v57, 0.0 }
  0x42   :  { %v203_v41 = vadd.f32 %v1082_v0, %v201_v35  ;;  %v368_v44 = vadd.f32 %v367_v30, %v366_v26  ;;  %v1285_v36 = vsel %vm146_vm1, %v343_v61, 0.0  ;;  %v1288_v62 = vsel %vm146_vm1, %v344_v5, 0.0  ;;  %v1535_v26 = vld [vmem:[#allocation11_spill] sm:$0xff] }
  0x43   :  { %v1291_v27 = vsel %vm146_vm1, %v345_v47, 0.0  ;;  %v1295_v25 = vsel %vm146_vm1, %v346_v51, 0.0  ;;  %v1298_v56 = vsel %vm146_vm1, %v347_v6, 0.0  ;;  %v1300_v57 = vunpack.c.l.bf16 %v634_v53 }
  0x44   :  { %v205_v0 = vadd.f32 %v1086_v16, %v203_v41  ;;  %v370_v52 = vadd.f32 %v369_v48, %v368_v44  ;;  %v208_v61 = vsel %vm146_vm1, %v1038_v49, 0.0  ;;  %v299_v5 = vmul.f32 %v990_v54, %v990_v54 }
  0x45   :  { %v373_v47 = vsel %vm146_vm1, %v1120_v15, 0.0  ;;  %v1309_v50 = vunpack.c.h.bf16 %v634_v53  ;;  %v210_v51 = vsel %vm146_vm1, %v1300_v57, 0.0  ;;  %v300_v6 = vmul.f32 %v992_v17, %v992_v17  ;;  %v1532_v15 = vld [vmem:[#allocation41_spill] sm:$0xff] }
  0x46   :  { %v207_v16 = vadd.f32 %v1090_v10, %v205_v0  ;;  %v372_v45 = vadd.f32 %v371_v2, %v370_v52  ;;  %v375_v28 = vsel %vm146_vm1, %v1124_v18, 0.0  ;;  %v301_v10 = vmul.f32 %v1532_v15, %v1532_v15  ;;  %v1533_v2 = vld [vmem:[#allocation42_spill] sm:$0xff]  ;;  %v1534_v18 = vld [vmem:[#allocation43_spill] sm:$0xff]  ;;  %v1536_v52 = vld [vmem:[#allocation12_spill] sm:$0xff] }
  0x47   :  { %v212_v54 = vsel %vm146_vm1, %v1309_v50, 0.0  ;;  %v377_v38 = vsel %vm146_vm1, %v299_v5, 0.0  ;;  %v302_v9 = vmul.f32 %v1533_v2, %v1533_v2  ;;  %v379_v17 = vsel %vm146_vm1, %v300_v6, 0.0  ;;  %v1540_v15 = vld [vmem:[#allocation14_spill] sm:$0xff]  ;;  %v1542_v2 = vld [vmem:[#allocation15_spill] sm:$0xff] }
  0x48   :  { %v209_v32 = vadd.f32 %v208_v61, %v207_v16  ;;  %v374_v30 = vadd.f32 %v373_v47, %v372_v45  ;;  %v303_v22 = vmul.f32 %v1534_v18, %v1534_v18  ;;  %v381_v35 = vsel %vm146_vm1, %v301_v10, 0.0  ;;  %v1537_v47 = vld [vmem:[#allocation44_spill] sm:$0xff] }
  0x49   :  { %v304_v44 = vmul.f32 %v1011_v37, %v1011_v37  ;;  %v383_v0 = vsel %vm146_vm1, %v302_v9, 0.0  ;;  %v305_v16 = vmul.f32 %v1537_v47, %v1537_v47 }
  0x4a   :  { %v211_v3 = vadd.f32 %v210_v51, %v209_v32  ;;  %v376_v48 = vadd.f32 %v375_v28, %v374_v30  ;;  %v385_v45 = vsel %vm146_vm1, %v303_v22, 0.0  ;;  %v1538_v51 = vld [vmem:[#allocation13_spill] sm:$0xff]  ;;  %v1544_v22 = vld [vmem:[#allocation16_spill] sm:$0xff] }
  0x4b   :  { %v1539_v32 = vld [vmem:[#allocation45_spill] sm:$0xff] }
  0x4c   :  { %v213_v43 = vadd.f32 %v212_v54, %v211_v3  ;;  %v378_v42 = vadd.f32 %v377_v38, %v376_v48  ;;  %v306_v30 = vmul.f32 %v1539_v32, %v1539_v32  ;;  %v387_v54 = vsel %vm146_vm1, %v304_v44, 0.0  ;;  %v1541_v38 = vld [vmem:[#allocation46_spill] sm:$0xff] }
  0x4d   :  { %v307_v3 = vmul.f32 %v1541_v38, %v1541_v38  ;;  %v389_v48 = vsel %vm146_vm1, %v305_v16, 0.0 }
  0x4e   :  { %v215_v53 = vadd.f32 %v1535_v26, %v213_v43  ;;  %v380_v41 = vadd.f32 %v379_v17, %v378_v42  ;;  %v1543_v43 = vld [vmem:[#allocation47_spill] sm:$0xff]  ;;  %v391_v18 = vsel %vm146_vm1, %v306_v30, 0.0 }
  0x4f   :  { %v308_v42 = vmul.f32 %v1543_v43, %v1543_v43  ;;  %v393_v44 = vsel %vm146_vm1, %v307_v3, 0.0 }
  0x50   :  { %v217_v61 = vadd.f32 %v1536_v52, %v215_v53  ;;  %v382_v5 = vadd.f32 %v381_v35, %v380_v41  ;;  %v1545_v53 = vld [vmem:[#allocation48_spill] sm:$0xff] }
  0x51   :  { %v309_v41 = vmul.f32 %v1545_v53, %v1545_v53  ;;  %v395_v16 = vsel %vm146_vm1, %v308_v42, 0.0 }
  0x52   :  { %v219_v6 = vadd.f32 %v1538_v51, %v217_v61  ;;  %v384_v28 = vadd.f32 %v383_v0, %v382_v5  ;;  %v1546_v0 = vld [vmem:[#allocation17_spill] sm:$0xff] }
  0x53   :  { %v1547_v5 = vld [vmem:[#allocation49_spill] sm:$0xff]  ;;  %v397_v30 = vsel %vm146_vm1, %v309_v41, 0.0 }
  0x54   :  { %v221_v37 = vadd.f32 %v1540_v15, %v219_v6  ;;  %v386_v10 = vadd.f32 %v385_v45, %v384_v28  ;;  %v310_v47 = vmul.f32 %v1547_v5, %v1547_v5  ;;  %v1548_v45 = vld [vmem:[#allocation18_spill] sm:$0xff] }
  0x55   :  { %v1549_v28 = vld [vmem:[#allocation50_spill] sm:$0xff] }
  0x56   :  { %v223_v9 = vadd.f32 %v1542_v2, %v221_v37  ;;  %v388_v17 = vadd.f32 %v387_v54, %v386_v10  ;;  %v311_v32 = vmul.f32 %v1549_v28, %v1549_v28  ;;  %v1550_v54 = vld [vmem:[#allocation19_spill] sm:$0xff]  ;;  %v399_v3 = vsel %vm146_vm1, %v310_v47, 0.0  ;;  %v1558_v28 = vld [vmem:[#allocation24_spill] sm:$0xff] }
  0x57   :  { %v1551_v10 = vld [vmem:[#allocation51_spill] sm:$0xff] }
  0x58   :  { %v225_v35 = vadd.f32 %v1544_v22, %v223_v9  ;;  %v390_v26 = vadd.f32 %v389_v48, %v388_v17  ;;  %v312_v38 = vmul.f32 %v1551_v10, %v1551_v10  ;;  %v1552_v48 = vld [vmem:[#allocation20_spill] sm:$0xff]  ;;  %v401_v42 = vsel %vm146_vm1, %v311_v32, 0.0  ;;  %v1557_v47 = vld [vmem:[#allocation23_spill] sm:$0xff] }
  0x59   :  { %v1553_v17 = vld [vmem:[#allocation52_spill] sm:$0xff] }
  0x5a   :  { %v227_v52 = vadd.f32 %v1546_v0, %v225_v35  ;;  %v392_v61 = vadd.f32 %v391_v18, %v390_v26  ;;  %v313_v43 = vmul.f32 %v1553_v17, %v1553_v17  ;;  %v1554_v18 = vld [vmem:[#allocation21_spill] sm:$0xff]  ;;  %v403_v41 = vsel %vm146_vm1, %v312_v38, 0.0 }
  0x5b   :  { %v1555_v26 = vld [vmem:[#allocation53_spill] sm:$0xff] }
  0x5c   :  { %v229_v51 = vadd.f32 %v1548_v45, %v227_v52  ;;  %v394_v6 = vadd.f32 %v393_v44, %v392_v61  ;;  %v314_v53 = vmul.f32 %v1555_v26, %v1555_v26  ;;  %v1556_v44 = vld [vmem:[#allocation22_spill] sm:$0xff]  ;;  %v315_v61 = vmul.f32 %v1038_v49, %v1038_v49 }
  0x5d   :  { %v405_v5 = vsel %vm146_vm1, %v313_v43, 0.0 }
  0x5e   :  { %v231_v15 = vadd.f32 %v1550_v54, %v229_v51  ;;  %v396_v37 = vadd.f32 %v395_v16, %v394_v6  ;;  %v316_v51 = vmul.f32 %v1300_v57, %v1300_v57  ;;  %v407_v6 = vsel %vm146_vm1, %v314_v53, 0.0  ;;  %v1564_v53 = vld [vmem:[#allocation30_spill] sm:$0xff] }
  0x5f   :  { %v317_v54 = vmul.f32 %v1309_v50, %v1309_v50 }
  0x60   :  { %v233_v2 = vadd.f32 %v1552_v48, %v231_v15  ;;  %v398_v9 = vadd.f32 %v397_v30, %v396_v37  ;;  %v409_v15 = vsel %vm146_vm1, %v315_v61, 0.0  ;;  %v1559_v37 = vld [vmem:[#allocation25_spill] sm:$0xff]  ;;  %v411_v38 = vsel %vm146_vm1, %v316_v51, 0.0 }
  0x61   :  { %v413_v57 = vsel %vm146_vm1, %v317_v54, 0.0 }
  0x62   :  { %v235_v22 = vadd.f32 %v1554_v18, %v233_v2  ;;  %v400_v35 = vadd.f32 %v399_v3, %v398_v9  ;;  %v1560_v3 = vld [vmem:[#allocation26_spill] sm:$0xff]  ;;  %v1561_v9 = vld [vmem:[#allocation27_spill] sm:$0xff] }
  0x64   :  { %v237_v0 = vadd.f32 %v1556_v44, %v235_v22  ;;  %v402_v52 = vadd.f32 %v401_v42, %v400_v35  ;;  %v1562_v42 = vld [vmem:[#allocation28_spill] sm:$0xff]  ;;  %v1563_v35 = vld [vmem:[#allocation29_spill] sm:$0xff] }
  0x66   :  { %v239_v16 = vadd.f32 %v1557_v47, %v237_v0  ;;  %v404_v45 = vadd.f32 %v403_v41, %v402_v52  ;;  %v1565_v0 = vld [vmem:[#allocation31_spill] sm:$0xff] }
  0x68   :  { %v241_v32 = vadd.f32 %v1558_v28, %v239_v16  ;;  %v406_v30 = vadd.f32 %v405_v5, %v404_v45  ;;  %v1566_v5 = vld [vmem:[#allocation32_spill] sm:$0xff]  ;;  %v1567_v45 = vld [vmem:[#allocation33_spill] sm:$0xff]  ;;  %v1568_v28 = vld [vmem:[#allocation34_spill] sm:$0xff] }
  0x6a   :  { %v243_v49 = vadd.f32 %v1559_v37, %v241_v32  ;;  %v408_v10 = vadd.f32 %v407_v6, %v406_v30  ;;  %v1569_v30 = vld [vmem:[#allocation35_spill] sm:$0xff] }
  0x6c   :  { %v245_v48 = vadd.f32 %v1560_v3, %v243_v49  ;;  %v410_v2 = vadd.f32 %v409_v15, %v408_v10  ;;  %v1570_v15 = vld [vmem:[#allocation36_spill] sm:$0xff]  ;;  %v1571_v49 = vld [vmem:[#allocation37_spill] sm:$0xff] }
  0x6e   :  { %v247_v17 = vadd.f32 %v1561_v9, %v245_v48  ;;  %v412_v43 = vadd.f32 %v411_v38, %v410_v2  ;;  %v1572_v38 = vld [vmem:[#allocation38_spill] sm:$0xff]  ;;  %v1573_v48 = vld [vmem:[#allocation39_spill] sm:$0xff] }
  0x70   :  { %v249_v18 = vadd.f32 %v1562_v42, %v247_v17  ;;  %v414_v22 = vadd.f32 %v413_v57, %v412_v43  ;;  %v1574_v57 = vld [vmem:[#allocation40_spill] sm:$0xff] }
  0x72   :  { %v251_v50 = vadd.f32 %v1563_v35, %v249_v18  ;;  %v416_v26 = vadd.f32 %v1203_v11, %v414_v22 }
  0x74   :  { %v253_v41 = vadd.f32 %v1564_v53, %v251_v50  ;;  %v418_v44 = vadd.f32 %v1206_v55, %v416_v26 }
  0x76   :  { %v255_v52 = vadd.f32 %v1565_v0, %v253_v41  ;;  %v420_v61 = vadd.f32 %v1209_v7, %v418_v44 }
  0x78   :  { %v257_v47 = vadd.f32 %v1566_v5, %v255_v52  ;;  %v422_v16 = vadd.f32 %v1212_v8, %v420_v61 }
  0x7a   :  { %v259_v51 = vadd.f32 %v1567_v45, %v257_v47  ;;  %v424_v6 = vadd.f32 %v1216_v12, %v422_v16 }
  0x7c   :  { %v261_v32 = vadd.f32 %v1568_v28, %v259_v51  ;;  %v426_v11 = vadd.f32 %v1219_v13, %v424_v6 }
  0x7e   :  { %v263_v54 = vadd.f32 %v1569_v30, %v261_v32  ;;  %v428_v55 = vadd.f32 %v1222_v14, %v426_v11 }
  0x80   :  { %v265_v37 = vadd.f32 %v1570_v15, %v263_v54  ;;  %v430_v7 = vadd.f32 %v1225_v19, %v428_v55 }
  0x82   :  { %v267_v10 = vadd.f32 %v1571_v49, %v265_v37  ;;  %v432_v8 = vadd.f32 %v1228_v20, %v430_v7 }
  0x84   :  { %v269_v3 = vadd.f32 %v1572_v38, %v267_v10  ;;  %v434_v12 = vadd.f32 %v1231_v21, %v432_v8 }
  0x86   :  { %v271_v2 = vadd.f32 %v1573_v48, %v269_v3  ;;  %v436_v13 = vadd.f32 %v1235_v1, %v434_v12  ;;  %v145_v1 = vld [vmem:[%s1446_s1] sm:$0x1] }
  0x88   :  { %v273_v9 = vadd.f32 %v1574_v57, %v271_v2  ;;  %v438_v14 = vadd.f32 %v1238_v58, %v436_v13 }
  0x8a   :  { %v274_v17 = vrot.slane %v273_v9, 4  ;;  %v440_v43 = vadd.f32 %v1241_v60, %v438_v14 }
  0x8c   :  { %v275_v19 = vadd.f32 %v274_v17, %v273_v9  ;;  %v442_v42 = vadd.f32 %v1244_v23, %v440_v43 }
  0x8e   :  { %v276_v18 = vrot.slane %v275_v19, 2  ;;  %v444_v20 = vadd.f32 %v1247_v24, %v442_v42 }
  0x90   :  { %v277_v22 = vadd.f32 %v276_v18, %v275_v19  ;;  %v446_v21 = vadd.f32 %v1250_v29, %v444_v20 }
  0x92   :  { %v278_v35 = vrot.slane %v277_v22, 1  ;;  %v448_v50 = vadd.f32 %v1254_v31, %v446_v21 }
  0x94   :  { %v279_v58 = vadd.f32 %v278_v35, %v277_v22  ;;  %v450_v26 = vadd.f32 %v1257_v33, %v448_v50 }
  0x96   :  { %v280_v60 = vadd.f32 %v279_v58, %v145_v1  ;;  %v452_v53 = vadd.f32 %v1260_v39, %v450_v26 }
  0x98   :  { %282 = vst.msk [vmem:[%s1446_s1] sm:$0x1] %vm14_vm0, %v280_v60  ;;  %v454_v23 = vadd.f32 %v1263_v34, %v452_v53 }
  0x9a   :  { %v456_v24 = vadd.f32 %v1266_v40, %v454_v23 }
  0x9c   :  { %v458_v29 = vadd.f32 %v1269_v59, %v456_v24 }
  0x9e   :  { %v460_v31 = vadd.f32 %v1276_v63, %v458_v29  ;;  %v283_v63 = vld [vmem:[%s1447_s2] sm:$0x1] }
  0xa0   :  { %v462_v41 = vadd.f32 %v1279_v4, %v460_v31 }
  0xa2   :  { %v464_v33 = vadd.f32 %v1282_v46, %v462_v41 }
  0xa4   :  { %v466_v44 = vadd.f32 %v1285_v36, %v464_v33 }
  0xa6   :  { %v468_v39 = vadd.f32 %v1288_v62, %v466_v44 }
  0xa8   :  { %v470_v0 = vadd.f32 %v1291_v27, %v468_v39 }
  0xaa   :  { %v472_v52 = vadd.f32 %v1295_v25, %v470_v0 }
  0xac   :  { %v474_v34 = vadd.f32 %v1298_v56, %v472_v52 }
  0xae   :  { %v475_v61 = vrot.slane %v474_v34, 4 }
  0xb0   :  { %v476_v40 = vadd.f32 %v475_v61, %v474_v34 }
  0xb2   :  { %v477_v5 = vrot.slane %v476_v40, 2 }
  0xb4   :  { %v478_v59 = vadd.f32 %v477_v5, %v476_v40 }
  0xb6   :  { %v479_v47 = vrot.slane %v478_v59, 1 }
  0xb8   :  { %v480_v4 = vadd.f32 %v479_v47, %v478_v59 }
  0xba   :  { %v481_v46 = vadd.f32 %v480_v4, %v283_v63 }
  0xbc   :  { %482 = vst.msk [vmem:[%s1447_s2] sm:$0x1] %vm14_vm0, %v481_v46 }

// kernel: generator_forward.18
= control target key start
LH: loop header
LB: loop body
LE: loop exit
PB: predicated region body
PF: predicated region fallthrough
CT: control target
= control target key end

     0   :  { %s1138_s15 = smov 0   ;;  %s1140_s16 = smov 0   ;;  %s1354_s0 = inlined_call_operand.vmem [shape: f32[1,32], index: 0, kind: input, shape index: {}]   ;;  %s1355_s1 = inlined_call_operand.vmem [shape: f32[1,32], index: 1, kind: input, shape index: {}]   ;;  %s1356_s2 = inlined_call_operand.vmem [shape: bf16[512,32], index: 2, kind: input, shape index: {}]   ;;  %s1357_s3 = inlined_call_operand.vmem [shape: bf16[32,256], index: 3, kind: input, shape index: {}]   ;;  %s1358_s4 = inlined_call_operand.vmem [shape: f32[512,256], index: 4, kind: output, shape index: {}]  }
   0x1   :  { %s1142_s17 = smov 0   ;;  %s1144_s18 = smov 0  }
   0x2   :  { %s1146_s19 = smov 0   ;;  %s1148_s20 = smov 0  }
   0x3   :  { %s1150_s21 = smov 0   ;;  %s1152_s22 = smov 0  }
   0x4   :  { %s1154_s23 = smov 0  }
   0x5 LB: > { %s861_s24 = sadd.s32 4294967295, %s1111_s23   ;;  %s29_s25 = sadd.s32 1, %s1103_s21  ;;  %s1111_s23 = sphi %s1154_s23, %s14_s23   ;;  %s1107_s22 = sphi %s1152_s22, %s1367_s22   ;;  %s1103_s21 = sphi %s1150_s21, %s1366_s21   ;;  %s1099_s20 = sphi %s1148_s20, %s1365_s20   ;;  %s1095_s19 = sphi %s1146_s19, %s1364_s19   ;;  %s1091_s18 = sphi %s1144_s18, %s1363_s18   ;;  %s1087_s17 = sphi %s1142_s17, %s1362_s17   ;;  %s1083_s16 = sphi %s1140_s16, %s1361_s16   ;;  %s1079_s15 = sphi %s1138_s15, %s1360_s15  }
   0x6   : > { %p31_p0 = scmp.ge.s32.totalorder %s29_s25, 2  ;;  %s33_s26 = sadd.s32 1, %s1107_s22 }
   0x7   : > { %s122_s27 = sadd.s32 1, %s1091_s18  ;;  %p129_p1 = scmp.ne.s32.totalorder %s1091_s18, %s1087_s17 }
   0x8   : > { %s1369_s25 = smov (%p31_p0, %s29_s25), 0  ;;  %s1371_s26 = smov (!%p31_p0, %s33_s26), %s1107_s22 }
   0x9   : > { %s118_s28 = ssub.s32 %s1103_s21, %s1369_s25  ;;  %p130_p2 = scmp.eq.s32.totalorder %s1111_s23, 0 }
   0xa   : > { %p35_p3 = scmp.ge.s32.totalorder %s1371_s26, 4  ;;  %p120_p4 = scmp.eq.s32.totalorder %s118_s28, 0 }
   0xb   : > { %p131_p5 = por %p130_p2, %p129_p1  ;;  %s150_s29 = sadd.s32 1, %s1083_s16 }
   0xc   : > { %s1373_s26 = smov (%p35_p3, %s1371_s26), 0  ;;  %p160_p6 = scmp.ne.s32.totalorder %s1083_s16, %s1079_s15 }
   0xd   : > { %s1199_s30 = scalar_select %p120_p4, %s1091_s18, %s122_s27  }
   0xe   : > { %s145_s5 = ssub.s32 %s1107_s22, %s1373_s26  ;;  %p161_p7 = scmp.eq.s32.totalorder %s861_s24, 7 }
   0xf   : > { %s147_s6 = sor.u32 %s145_s5, %s118_s28  ;;  %p866_p10 = scmp.ge.s32.totalorder %s1111_s23, 8 }
  0x10   : > { %p148_p8 = scmp.eq.s32.totalorder %s147_s6, 0  ;;  %p1205_p9 = por %p161_p7, %p160_p6 }
  0x11   : > { %195 = sbr.rel (%p866_p10) target bundleno = 31 (0x1f), region = 24 }
  0x12   : > { %s1210_s8 = scalar_select %p148_p8, %s1083_s16, %s150_s29  }
  0x18   : > { %210 = sbr.rel (!%p131_p5) target bundleno = 31 (0x1f), region = 32  ;;  %s212_s9 = sand.u32 (%p131_p5), 1, %s1091_s18  }
  0x19   : > { %s868_s10 = sshll.u32 (%p131_p5), %s1103_s21, 2  ;;  %s867_s11 = sshll.u32 (%p131_p5), %s212_s9, 4 }
  0x1a   : > { %s219_s14 = scalar_lea.vmem (%p131_p5), %s1357_s3, %s868_s10  ;;  %s214_s24 = scalar_lea.vmem (%p131_p5), [#allocation2], %s867_s11 }
  0x1b   : > { %v235_v0 = vld [vmem:[%s219_s14] sm:$0xf] (%p131_p5)  ;;  %v237_v1 = vld [vmem:[%s219_s14 + $0x8] sm:$0xf] (%p131_p5)  ;;  %v239_v2 = vld [vmem:[%s219_s14 + $0x10] sm:$0xf] (%p131_p5) }
  0x1c   : > { %236 = vst [vmem:[%s214_s24] sm:$0xf] (%p131_p5), %v235_v0  ;;  %238 = vst [vmem:[%s214_s24 + $0x4] sm:$0xf] (%p131_p5), %v237_v1  ;;  %v241_v3 = vld [vmem:[%s219_s14 + $0x18] sm:$0xf] (%p131_p5) }
  0x1d   : > { %240 = vst [vmem:[%s214_s24 + $0x8] sm:$0xf] (%p131_p5), %v239_v2  ;;  %242 = vst [vmem:[%s214_s24 + $0xc] sm:$0xf] (%p131_p5), %v241_v3 }
  0x1f PF: > { %p869_p11 = scmp.ge.s32.totalorder %s1111_s23, 1  ;;  %p272_p12 = scmp.lt.s32.totalorder %s1111_s23, 9 }
  0x21   : > { %p273_p13 = pnand %p869_p11, %p272_p12 }
  0x22   : > { %s279_s27 = sand.u32 (!%p273_p13), 1, %s1087_s17   ;;  %s872_s28 = sshll.u32 (!%p273_p13), %s1099_s20, 4  ;;  %v1230_v6 = vld [vmem:[%s1354_s0] ss:$0 sm:$0xff] (!%p273_p13)  ;;  %vm489_vm0 = vcmask (!%p273_p13), 261120  }
  0x23   : > { %276 = sbr.rel (%p273_p13) target bundleno = 292 (0x124), region = 73  ;;  %s870_s29 = sshll.u32 (!%p273_p13), %s279_s27, 4  ;;  %v1240_v16 = vld [vmem:[%s1355_s1] ss:$0 sm:$0xff] (!%p273_p13) }
  0x24   : > { %p324_p0 = scmp.lt.s32.totalorder (!%p273_p13), %s872_s28, 63  ;;  %s281_s5 = scalar_lea.vmem (!%p273_p13), [#allocation2], %s870_s29 }
  0x25   : > { %v1039_v4 = vld [vmem:[%s281_s5] sm:$0xff] (!%p273_p13)   ;;  %v1040_v5 = vld [vmem:[%s281_s5 + $0x8] sm:$0xff] (!%p273_p13)   ;;  %s314_s24 = sand.u32 (!%p273_p13), 1, %s1079_s15  }
  0x26   : > { %942 = vmatprep.subr.bf16.mxu0 (!%p273_p13), %v1039_v4  ;;  %962 = vmatprep.subr.bf16.mxu1 (!%p273_p13), %v1039_v4  ;;  %s871_s27 = sshll.u32 (!%p273_p13), %s314_s24, 7 }
  0x27   : > { %943 = vmatpush3.bf16.msra.mxu0 (!%p273_p13), %v1039_v4  ;;  %964 = vmatpush3.bf16.msra.mxu1 (!%p273_p13), %v1039_v4 }
  0x28   : > { %944 = vmatprep.subr.bf16.mxu0 (!%p273_p13), %v1040_v5  ;;  %963 = vmatprep.subr.bf16.mxu1 (!%p273_p13), %v1040_v5 }
  0x2a   : > { %s1375_s28 = smov (!%p324_p0, %s872_s28), 63  ;;  %s892_s15 = sshll.u32 (%p1205_p9), %s1099_s20, 5 }
  0x2b   : > { %s873_s6 = sshll.u32 %s1375_s28, 2  ;;  %945 = vmatpush3.bf16.msra.mxu0 %v1040_v5  ;;  %965 = vmatpush3.bf16.msra.mxu1 %v1040_v5  ;;  %s1286_s28 = scalar_lea.vmem [#allocation3], %s871_s27 }
  0x2c   : > { %s1225_s11 = scalar_lea.vmem %s1356_s2, %s873_s6  ;;  %s652_s7 = sadd.s32 (%p1205_p9), %s1095_s19, %s892_s15 }
  0x2d   : > { %v894_v7 = vld [vmem:[%s1225_s11] sm:$0xff]   ;;  %v925_v9 = vld [vmem:[%s1225_s11 + $0x8] sm:$0xff]   ;;  %v926_v15 = vld [vmem:[%s1225_s11 + $0x10] sm:$0xff]   ;;  %s889_s29 = sshll.u32 (%p1205_p9), %s652_s7, 3 }
  0x2e   : > { %v928_v8 = vld [vmem:[%s1225_s11 + $0x20] sm:$0xff]   ;;  %v895_v10 = vunpack.c.l.bf16 %v894_v7  ;;  %v896_v11 = vunpack.c.h.bf16 %v894_v7  ;;  %v929_v14 = vld [vmem:[%s1225_s11 + $0x28] sm:$0xff]   ;;  %v899_v17 = vunpack.c.l.bf16 %v925_v9  ;;  %v900_v18 = vunpack.c.h.bf16 %v925_v9  ;;  %v930_v41 = vld [vmem:[%s1225_s11 + $0x30] sm:$0xff]   ;;  %s654_s9 = scalar_lea.vmem (%p1205_p9), %s1358_s4, %s889_s29 }
  0x2f   : > { %v911_v12 = vunpack.c.l.bf16 %v928_v8  ;;  %v912_v13 = vunpack.c.h.bf16 %v928_v8  ;;  %v915_v19 = vunpack.c.l.bf16 %v929_v14  ;;  %v916_v20 = vunpack.c.h.bf16 %v929_v14  ;;  %v927_v46 = vld [vmem:[%s1225_s11 + $0x18] sm:$0xff]  }
  0x30   : > { %v394_v21 = vmul.f32 %v895_v10, %v1230_v6  ;;  %v395_v22 = vmul.f32 %v896_v11, %v1230_v6  ;;  %v903_v24 = vunpack.c.l.bf16 %v926_v15  ;;  %v396_v26 = vmul.f32 %v899_v17, %v1230_v6  ;;  %v931_v51 = vld [vmem:[%s1225_s11 + $0x38] sm:$0xff]  }
  0x31   : > { %v402_v23 = vmul.f32 %v911_v12, %v1230_v6  ;;  %v403_v25 = vmul.f32 %v912_v13, %v1230_v6  ;;  %v397_v27 = vmul.f32 %v900_v18, %v1230_v6  ;;  %v404_v28 = vmul.f32 %v915_v19, %v1230_v6 }
  0x32   : > { %v417_v29 = vadd.f32 %v1240_v16, %v394_v21  ;;  %v418_v30 = vadd.f32 %v1240_v16, %v395_v22  ;;  %v405_v32 = vmul.f32 %v916_v20, %v1230_v6  ;;  %v419_v34 = vadd.f32 %v1240_v16, %v396_v26 }
  0x33   : > { %v425_v31 = vadd.f32 %v1240_v16, %v402_v23  ;;  %v426_v33 = vadd.f32 %v1240_v16, %v403_v25  ;;  %v420_v35 = vadd.f32 %v1240_v16, %v397_v27  ;;  %v427_v36 = vadd.f32 %v1240_v16, %v404_v28 }
  0x34   : > { %v433_v37 = vmax.f32 %v417_v29, 0.0  ;;  %v434_v38 = vmax.f32 %v418_v30, 0.0  ;;  %v428_v40 = vadd.f32 %v1240_v16, %v405_v32  ;;  %v435_v43 = vmax.f32 %v419_v34, 0.0 }
  0x35   : > { %v441_v39 = vmax.f32 %v425_v31, 0.0  ;;  %v442_v42 = vmax.f32 %v426_v33, 0.0  ;;  %v436_v44 = vmax.f32 %v420_v35, 0.0  ;;  %v443_v45 = vmax.f32 %v427_v36, 0.0 }
  0x36   : > { %v449_v47 = vpack.c.bf16 %v434_v38, %v433_v37  ;;  %v444_v48 = vmax.f32 %v428_v40, 0.0  ;;  %v904_v49 = vunpack.c.h.bf16 %v926_v15  ;;  %v398_v50 = vmul.f32 %v903_v24, %v1230_v6 }
  0x37   : > { %v453_v52 = vpack.c.bf16 %v442_v42, %v441_v39  ;;  %v450_v53 = vpack.c.bf16 %v436_v44, %v435_v43  ;;  %v919_v54 = vunpack.c.l.bf16 %v930_v41  ;;  %v920_v55 = vunpack.c.h.bf16 %v930_v41 }
  0x38   : > { %946 = vmatprep.mubr.msk.bf16.mxu0 %vm489_vm0, %v449_v47  ;;  %v454_v56 = vpack.c.bf16 %v444_v48, %v443_v45  ;;  %v399_v57 = vmul.f32 %v904_v49, %v1230_v6  ;;  %v421_v58 = vadd.f32 %v1240_v16, %v398_v50  ;;  %v907_v59 = vunpack.c.l.bf16 %v927_v46 }
  0x39   : > { %954 = vmatprep.mubr.msk.bf16.mxu1 %vm489_vm0, %v453_v52  ;;  %947 = vmatmul.mubr.msk.bf16.vlgmr.msra.gmra.mrb[0].mxu0 %vm489_vm0, %v450_v53  ;;  %v406_v60 = vmul.f32 %v919_v54, %v1230_v6  ;;  %v407_v61 = vmul.f32 %v920_v55, %v1230_v6  ;;  %v908_v62 = vunpack.c.h.bf16 %v927_v46  ;;  %v923_v63 = vunpack.c.l.bf16 %v931_v51 }
  0x3a   : > { %955 = vmatmul.mubr.msk.bf16.vlgmr.msra.gmra.mrb[0].mxu1 %vm489_vm0, %v454_v56  ;;  %v422_v0 = vadd.f32 %v1240_v16, %v399_v57  ;;  %v437_v1 = vmax.f32 %v421_v58, 0.0  ;;  %v400_v2 = vmul.f32 %v907_v59, %v1230_v6  ;;  %v924_v3 = vunpack.c.h.bf16 %v931_v51 }
  0x3b   : > { %v429_v4 = vadd.f32 %v1240_v16, %v406_v60  ;;  %v430_v5 = vadd.f32 %v1240_v16, %v407_v61  ;;  %v401_v7 = vmul.f32 %v908_v62, %v1230_v6  ;;  %v408_v8 = vmul.f32 %v923_v63, %v1230_v6 }
  0x3c   : > { %v438_v9 = vmax.f32 %v422_v0, 0.0  ;;  %v423_v10 = vadd.f32 %v1240_v16, %v400_v2  ;;  %v409_v11 = vmul.f32 %v924_v3, %v1230_v6 }
  0x3d   : > { %v445_v12 = vmax.f32 %v429_v4, 0.0  ;;  %v446_v13 = vmax.f32 %v430_v5, 0.0  ;;  %v424_v14 = vadd.f32 %v1240_v16, %v401_v7  ;;  %v431_v15 = vadd.f32 %v1240_v16, %v408_v8 }
  0x3e   : > { %v451_v17 = vpack.c.bf16 %v438_v9, %v437_v1  ;;  %v439_v18 = vmax.f32 %v423_v10, 0.0  ;;  %v432_v19 = vadd.f32 %v1240_v16, %v409_v11 }
  0x3f   : > { %v455_v20 = vpack.c.bf16 %v446_v13, %v445_v12  ;;  %v440_v21 = vmax.f32 %v424_v14, 0.0  ;;  %v447_v22 = vmax.f32 %v431_v15, 0.0 }
  0x40   : > { %950 = vmatprep.mubr.msk.bf16.mxu0 %vm489_vm0, %v451_v17  ;;  %v448_v23 = vmax.f32 %v432_v19, 0.0 }
  0x41   : > { %958 = vmatprep.mubr.msk.bf16.mxu1 %vm489_vm0, %v455_v20  ;;  %v452_v6 = vpack.c.bf16 %v440_v21, %v439_v18 }
  0x42   : > { %v456_v24 = vpack.c.bf16 %v448_v23, %v447_v22 }
  0x43   : > { %951 = vmatmul.mubr.msk.bf16.gmra.mrb[4].mxu0 %vm489_vm0, %v452_v6 }
  0x44   : > { %959 = vmatmul.mubr.msk.bf16.gmra.mrb[4].mxu1 %vm489_vm0, %v456_v24 }
 0x10c   : > { %v948_v25 = vpop.f32.mrb[0].mxu0 }
 0x10d   : > { %v956_v26 = vpop.f32.mrb[0].mxu1  ;;  %v548_v27 = vpop.f32.mrb[1].mxu0  ;;  %629 = vst [vmem:[%s1286_s28 + $0x10] sm:$0xff] %v948_v25 }
 0x10e   : > { %v580_v16 = vpop.f32.mrb[1].mxu1  ;;  %v949_v28 = vpop.f32.mrb[2].mxu0  ;;  %637 = vst [vmem:[%s1286_s28 + $0x50] sm:$0xff] %v956_v26  ;;  %627 = vst [vmem:[%s1286_s28] sm:$0xff] %v548_v27 }
 0x10f   : > { %v957_v29 = vpop.f32.mrb[2].mxu1  ;;  %v551_v30 = vpop.f32.mrb[3].mxu0  ;;  %635 = vst [vmem:[%s1286_s28 + $0x40] sm:$0xff] %v580_v16  ;;  %630 = vst [vmem:[%s1286_s28 + $0x18] sm:$0xff] %v949_v28 }
 0x110   : > { %v583_v31 = vpop.f32.mrb[3].mxu1  ;;  %638 = vst [vmem:[%s1286_s28 + $0x58] sm:$0xff] %v957_v29  ;;  %628 = vst [vmem:[%s1286_s28 + $0x8] sm:$0xff] %v551_v30 }
 0x111   : > { %636 = vst [vmem:[%s1286_s28 + $0x48] sm:$0xff] %v583_v31 }
 0x114   : > { %v716_v42 = vld [vmem:[%s1286_s28 + $0x10] sm:$0xff] (%p1205_p9) }
 0x115   : > { %649 = sbr.rel (!%p1205_p9) target bundleno = 292 (0x124), region = 85  ;;  %v712_v40 = vld [vmem:[%s1286_s28] sm:$0xff] (%p1205_p9)  ;;  %v732_v50 = vld [vmem:[%s1286_s28 + $0x50] sm:$0xff] (%p1205_p9)  ;;  %717 = vst [vmem:[%s654_s9 + $0x20] sm:$0xff] (%p1205_p9), %v716_v42 }
 0x116   : > { %v952_v32 = vpop.f32.mrb[4].mxu0  ;;  %v718_v43 = vld [vmem:[%s1286_s28 + $0x18] sm:$0xff] (%p1205_p9)  ;;  %v728_v48 = vld [vmem:[%s1286_s28 + $0x40] sm:$0xff] (%p1205_p9)  ;;  %713 = vst [vmem:[%s654_s9] sm:$0xff] (%p1205_p9), %v712_v40  ;;  %733 = vst [vmem:[%s654_s9 + $0xa0] sm:$0xff] (%p1205_p9), %v732_v50 }
 0x117   : > { %v960_v33 = vpop.f32.mrb[4].mxu1  ;;  %v564_v34 = vpop.f32.mrb[5].mxu0  ;;  %633 = vst [vmem:[%s1286_s28 + $0x30] sm:$0xff] %v952_v32  ;;  %v714_v41 = vld [vmem:[%s1286_s28 + $0x8] sm:$0xff] (%p1205_p9)  ;;  %v734_v51 = vld [vmem:[%s1286_s28 + $0x58] sm:$0xff] (%p1205_p9)  ;;  %719 = vst [vmem:[%s654_s9 + $0x30] sm:$0xff] (%p1205_p9), %v718_v43 }
 0x118   : > { %v596_v35 = vpop.f32.mrb[5].mxu1  ;;  %v953_v36 = vpop.f32.mrb[6].mxu0  ;;  %641 = vst [vmem:[%s1286_s28 + $0x70] sm:$0xff] %v960_v33  ;;  %631 = vst [vmem:[%s1286_s28 + $0x20] sm:$0xff] %v564_v34  ;;  %v730_v49 = vld [vmem:[%s1286_s28 + $0x48] sm:$0xff] (%p1205_p9) }
 0x119   : > { %v961_v37 = vpop.f32.mrb[6].mxu1  ;;  %v567_v38 = vpop.f32.mrb[7].mxu0  ;;  %639 = vst [vmem:[%s1286_s28 + $0x60] sm:$0xff] %v596_v35  ;;  %634 = vst [vmem:[%s1286_s28 + $0x38] sm:$0xff] %v953_v36 }
 0x11a   : > { %v599_v39 = vpop.f32.mrb[7].mxu1  ;;  %642 = vst [vmem:[%s1286_s28 + $0x78] sm:$0xff] %v961_v37  ;;  %632 = vst [vmem:[%s1286_s28 + $0x28] sm:$0xff] %v567_v38 }
 0x11b   : > { %640 = vst [vmem:[%s1286_s28 + $0x68] sm:$0xff] %v599_v39  ;;  %715 = vst [vmem:[%s654_s9 + $0x10] sm:$0xff] (%p1205_p9), %v714_v41 }
 0x11c   : > { %729 = vst [vmem:[%s654_s9 + $0x80] sm:$0xff] %v728_v48  ;;  %731 = vst [vmem:[%s654_s9 + $0x90] sm:$0xff] %v730_v49 }
 0x11d   : > { %735 = vst [vmem:[%s654_s9 + $0xb0] sm:$0xff] %v734_v51 }
 0x11e   : > { %v724_v46 = vld [vmem:[%s1286_s28 + $0x30] sm:$0xff] }
 0x11f   : > { %v720_v44 = vld [vmem:[%s1286_s28 + $0x20] sm:$0xff]  ;;  %725 = vst [vmem:[%s654_s9 + $0x60] sm:$0xff] %v724_v46  ;;  %v740_v54 = vld [vmem:[%s1286_s28 + $0x70] sm:$0xff] }
 0x120   : > { %v726_v47 = vld [vmem:[%s1286_s28 + $0x38] sm:$0xff]  ;;  %721 = vst [vmem:[%s654_s9 + $0x40] sm:$0xff] %v720_v44  ;;  %v736_v52 = vld [vmem:[%s1286_s28 + $0x60] sm:$0xff]  ;;  %741 = vst [vmem:[%s654_s9 + $0xe0] sm:$0xff] %v740_v54 }
 0x121   : > { %v722_v45 = vld [vmem:[%s1286_s28 + $0x28] sm:$0xff]  ;;  %727 = vst [vmem:[%s654_s9 + $0x70] sm:$0xff] %v726_v47  ;;  %737 = vst [vmem:[%s654_s9 + $0xc0] sm:$0xff] %v736_v52  ;;  %v742_v55 = vld [vmem:[%s1286_s28 + $0x78] sm:$0xff] }
 0x122   : > { %723 = vst [vmem:[%s654_s9 + $0x50] sm:$0xff] %v722_v45  ;;  %v738_v53 = vld [vmem:[%s1286_s28 + $0x68] sm:$0xff]  ;;  %743 = vst [vmem:[%s654_s9 + $0xf0] sm:$0xff] %v742_v55 }
 0x123   : > { %739 = vst [vmem:[%s654_s9 + $0xd0] sm:$0xff] %v738_v53 }
 0x124 PF: > { %s14_s23 = sadd.s32 1, %s1111_s23   ;;  %s1360_s15 = smov %s1083_s16 }
 0x125   : > { %p11_p1 = scmp.ge.s32.totalorder %s14_s23, 10   ;;  %s1361_s16 = smov %s1210_s8 }
 0x126   : > { %s1362_s17 = smov %s1091_s18  ;;  %s1363_s18 = smov %s1199_s30 }
 0x127   : > { %s1364_s19 = smov %s1103_s21  ;;  %s1365_s20 = smov %s1107_s22 }
 0x128   : > { %s1366_s21 = smov %s1369_s25  ;;  %s1367_s22 = smov %s1373_s26 }
 0x129   :  { %13 = sbr.rel (!%p11_p1) target bundleno = 5 (0x5), region = 163 }

// kernel: generator_forward.19
= control target key start
LH: loop header
LB: loop body
LE: loop exit
PB: predicated region body
PF: predicated region fallthrough
CT: control target
= control target key end

     0   :  { %s837_s9 = smov 0   ;;  %s1353_s0 = inlined_call_operand.vmem [shape: bf16[2048,16], index: 0, kind: input, shape index: {}]   ;;  %s1354_s1 = inlined_call_operand.vmem [shape: f32[1,16], index: 1, kind: output, shape index: {0}]   ;;  %s1355_s2 = inlined_call_operand.vmem [shape: f32[1,16], index: 2, kind: output, shape index: {1}]  }
   0x1 LB: > { %s636_s10 = sadd.s32 4294967295, %s819_s9   ;;  %p639_p0 = scmp.ge.s32.totalorder %s819_s9, 1  ;;  %s819_s9 = sphi %s837_s9, %s13_s9  }
   0x2   : > { %p106_p1 = scmp.lt.s32.totalorder %s819_s9, 5 }
   0x4   : > { %p107_p2 = pnand %p639_p0, %p106_p1 }
   0x5   : > { %s640_s11 = sshll.u32 (!%p107_p2), %s636_s10, 6  ;;  %p642_p4 = scmp.ne.s32.totalorder (!%p107_p2), %s636_s10, 0 }
   0x6   : > { %110 = sbr.rel (%p107_p2) target bundleno = 189 (0xbd), region = 24  ;;  %p124_p3 = scmp.lt.s32.totalorder (!%p107_p2), %s640_s11, 255 }
   0xd   : > { %s1357_s11 = smov (!%p124_p3, %s640_s11), 255  ;;  %132 = sbr.rel (%p642_p4) target bundleno = 20 (0x14), region = 28 }
   0xe   : > { %s641_s12 = sshll.u32 %s1357_s11, 2  ;;  %vm133_vm0 = vcmask (!%p642_p4), 122880   ;;  %v821_v0 = vmov (!%p642_p4), 0.0  }
   0xf   : > { %s848_s15 = scalar_lea.vmem %s1353_s0, %s641_s12  ;;  %134 = vst.msk [vmem:[%s1354_s1] sm:$0x1] (!%p642_p4), %vm133_vm0, %v821_v0  ;;  %135 = vst.msk [vmem:[%s1355_s2] sm:$0x1] (!%p642_p4), %vm133_vm0, %v821_v0 }
  0x14 PF: > { %v646_v1 = vld [vmem:[%s848_s15] sm:$0xff]   ;;  %v773_v2 = vld [vmem:[%s848_s15 + $0x8] sm:$0xff]   ;;  %vm265_vm1 = vcmask 130048   ;;  %v774_v6 = vld [vmem:[%s848_s15 + $0x10] sm:$0xff]   ;;  %vm400_vm2 = vcmask 122880  }
  0x15   : > { %v858_v3 = vunpack.c.l.bf16 %v646_v1  ;;  %v860_v4 = vunpack.c.h.bf16 %v646_v1  ;;  %v862_v5 = vunpack.c.l.bf16 %v773_v2  ;;  %v865_v7 = vunpack.c.h.bf16 %v773_v2  ;;  %v775_v14 = vld [vmem:[%s848_s15 + $0x18] sm:$0xff]   ;;  %v776_v21 = vld [vmem:[%s848_s15 + $0x20] sm:$0xff]   ;;  %v777_v28 = vld [vmem:[%s848_s15 + $0x28] sm:$0xff]  }
  0x16   : > { %v873_v12 = vunpack.c.l.bf16 %v774_v6  ;;  %v878_v16 = vunpack.c.h.bf16 %v774_v6  ;;  %v882_v19 = vunpack.c.l.bf16 %v775_v14  ;;  %v887_v23 = vunpack.c.h.bf16 %v775_v14  ;;  %v778_v35 = vld [vmem:[%s848_s15 + $0x30] sm:$0xff]   ;;  %v779_v42 = vld [vmem:[%s848_s15 + $0x38] sm:$0xff]   ;;  %v780_v49 = vld [vmem:[%s848_s15 + $0x40] sm:$0xff]  }
  0x17   : > { %v266_v8 = vsel %vm265_vm1, %v858_v3, 0.0  ;;  %v267_v9 = vsel %vm265_vm1, %v860_v4, 0.0  ;;  %v269_v10 = vsel %vm265_vm1, %v862_v5, 0.0  ;;  %v271_v13 = vsel %vm265_vm1, %v865_v7, 0.0  ;;  %v781_v56 = vld [vmem:[%s848_s15 + $0x48] sm:$0xff]   ;;  %v782_v63 = vld [vmem:[%s848_s15 + $0x50] sm:$0xff]  }
  0x18   : > { %v268_v11 = vadd.f32 %v267_v9, %v266_v8  ;;  %v273_v17 = vsel %vm265_vm1, %v873_v12, 0.0  ;;  %v275_v20 = vsel %vm265_vm1, %v878_v16, 0.0  ;;  %v277_v24 = vsel %vm265_vm1, %v882_v19, 0.0  ;;  %v783_v14 = vld [vmem:[%s848_s15 + $0x58] sm:$0xff]  }
  0x19   : > { %v891_v26 = vunpack.c.l.bf16 %v776_v21  ;;  %v279_v27 = vsel %vm265_vm1, %v887_v23, 0.0  ;;  %v896_v30 = vunpack.c.h.bf16 %v776_v21  ;;  %v900_v33 = vunpack.c.l.bf16 %v777_v28 }
  0x1a   : > { %v270_v15 = vadd.f32 %v269_v10, %v268_v11  ;;  %v905_v37 = vunpack.c.h.bf16 %v777_v28  ;;  %v909_v40 = vunpack.c.l.bf16 %v778_v35  ;;  %v914_v44 = vunpack.c.h.bf16 %v778_v35 }
  0x1b   : > { %v281_v31 = vsel %vm265_vm1, %v891_v26, 0.0  ;;  %v283_v34 = vsel %vm265_vm1, %v896_v30, 0.0  ;;  %v285_v38 = vsel %vm265_vm1, %v900_v33, 0.0  ;;  %v918_v47 = vunpack.c.l.bf16 %v779_v42 }
  0x1c   : > { %v272_v18 = vadd.f32 %v271_v13, %v270_v15  ;;  %v287_v41 = vsel %vm265_vm1, %v905_v37, 0.0  ;;  %v289_v45 = vsel %vm265_vm1, %v909_v40, 0.0  ;;  %v291_v48 = vsel %vm265_vm1, %v914_v44, 0.0 }
  0x1d   : > { %v923_v51 = vunpack.c.h.bf16 %v779_v42  ;;  %v293_v52 = vsel %vm265_vm1, %v918_v47, 0.0  ;;  %v927_v54 = vunpack.c.l.bf16 %v780_v49  ;;  %v932_v58 = vunpack.c.h.bf16 %v780_v49  ;;  %v785_v42 = vld [vmem:[%s848_s15 + $0x68] sm:$0xff]  }
  0x1e   : > { %v274_v22 = vadd.f32 %v273_v17, %v272_v18  ;;  %v936_v61 = vunpack.c.l.bf16 %v781_v56  ;;  %v941_v1 = vunpack.c.h.bf16 %v781_v56  ;;  %v403_v6 = vmul.f32 %v858_v3, %v858_v3 }
  0x1f   : > { %v295_v55 = vsel %vm265_vm1, %v923_v51, 0.0  ;;  %v297_v59 = vsel %vm265_vm1, %v927_v54, 0.0  ;;  %v299_v62 = vsel %vm265_vm1, %v932_v58, 0.0  ;;  %v404_v9 = vmul.f32 %v860_v4, %v860_v4 }
  0x20   : > { %v276_v25 = vadd.f32 %v275_v20, %v274_v22  ;;  %v301_v2 = vsel %vm265_vm1, %v936_v61, 0.0  ;;  %v405_v10 = vmul.f32 %v862_v5, %v862_v5  ;;  %v951_v11 = vunpack.c.l.bf16 %v782_v63 }
  0x21   : > { %v303_v13 = vsel %vm265_vm1, %v941_v1, 0.0  ;;  %v406_v17 = vmul.f32 %v865_v7, %v865_v7  ;;  %v958_v18 = vunpack.c.h.bf16 %v782_v63  ;;  %v467_v4 = vsel %vm265_vm1, %v403_v6, 0.0 }
  0x22   : > { %v278_v29 = vadd.f32 %v277_v24, %v276_v25  ;;  %v305_v3 = vsel %vm265_vm1, %v951_v11, 0.0  ;;  %v407_v5 = vmul.f32 %v873_v12, %v873_v12  ;;  %v468_v21 = vsel %vm265_vm1, %v404_v9, 0.0 }
  0x23   : > { %v470_v22 = vsel %vm265_vm1, %v405_v10, 0.0  ;;  %v967_v24 = vunpack.c.l.bf16 %v783_v14  ;;  %v307_v7 = vsel %vm265_vm1, %v958_v18, 0.0  ;;  %v469_v25 = vadd.f32 %v468_v21, %v467_v4 }
  0x24   : > { %v280_v32 = vadd.f32 %v279_v27, %v278_v29  ;;  %v784_v27 = vld [vmem:[%s848_s15 + $0x60] sm:$0xff]   ;;  %v408_v29 = vmul.f32 %v878_v16, %v878_v16  ;;  %v1005_v63 = vunpack.c.h.bf16 %v785_v42  ;;  %v413_v6 = vmul.f32 %v900_v33, %v900_v33 }
  0x25   : > { %v309_v12 = vsel %vm265_vm1, %v967_v24, 0.0 }
  0x26   : > { %v282_v36 = vadd.f32 %v281_v31, %v280_v32  ;;  %v472_v31 = vsel %vm265_vm1, %v406_v17, 0.0  ;;  %v975_v32 = vunpack.c.h.bf16 %v783_v14  ;;  %v486_v21 = vsel %vm265_vm1, %v413_v6, 0.0 }
  0x28   : > { %v284_v39 = vadd.f32 %v283_v34, %v282_v36  ;;  %v471_v34 = vadd.f32 %v470_v22, %v469_v25  ;;  %v409_v36 = vmul.f32 %v882_v19, %v882_v19  ;;  %v311_v16 = vsel %vm265_vm1, %v975_v32, 0.0  ;;  %v788_v25 = vld [vmem:[%s848_s15 + $0x80] sm:$0xff]  }
  0x2a   : > { %v286_v43 = vadd.f32 %v285_v38, %v284_v39  ;;  %v474_v38 = vsel %vm265_vm1, %v407_v5, 0.0  ;;  %v982_v39 = vunpack.c.l.bf16 %v784_v27  ;;  %v415_v5 = vmul.f32 %v909_v40, %v909_v40 }
  0x2c   : > { %v288_v46 = vadd.f32 %v287_v41, %v286_v43  ;;  %v473_v41 = vadd.f32 %v472_v31, %v471_v34  ;;  %v313_v19 = vsel %vm265_vm1, %v982_v39, 0.0 }
  0x2e   : > { %v290_v50 = vadd.f32 %v289_v45, %v288_v46  ;;  %v410_v45 = vmul.f32 %v887_v23, %v887_v23  ;;  %v476_v46 = vsel %vm265_vm1, %v408_v29, 0.0  ;;  %v475_v49 = vadd.f32 %v474_v38, %v473_v41  ;;  %v789_v41 = vld [vmem:[%s848_s15 + $0x88] sm:$0xff]  }
  0x2f   : > { %v1042_v38 = vunpack.c.l.bf16 %v788_v25 }
  0x30   : > { %v292_v53 = vadd.f32 %v291_v48, %v290_v50  ;;  %v990_v48 = vunpack.c.h.bf16 %v784_v27  ;;  %v477_v56 = vadd.f32 %v476_v46, %v475_v49  ;;  %v1050_v46 = vunpack.c.h.bf16 %v788_v25 }
  0x32   : > { %v294_v57 = vadd.f32 %v293_v52, %v292_v53  ;;  %v411_v52 = vmul.f32 %v891_v26, %v891_v26  ;;  %v478_v53 = vsel %vm265_vm1, %v409_v36, 0.0  ;;  %v315_v23 = vsel %vm265_vm1, %v990_v48, 0.0 }
  0x33   : > { %v490_v36 = vsel %vm265_vm1, %v415_v5, 0.0 }
  0x34   : > { %v296_v60 = vadd.f32 %v295_v55, %v294_v57  ;;  %v997_v55 = vunpack.c.l.bf16 %v785_v42  ;;  %v786_v57 = vld [vmem:[%s848_s15 + $0x70] sm:$0xff]  }
  0x35   : > { %v1012_v9 = vunpack.c.l.bf16 %v786_v57 }
  0x36   : > { %v298_v0 = vadd.f32 %v297_v59, %v296_v60  ;;  %v412_v60 = vmul.f32 %v896_v30, %v896_v30  ;;  %v317_v26 = vsel %vm265_vm1, %v997_v55, 0.0  ;;  %v319_v30 = vsel %vm265_vm1, %v1005_v63, 0.0 }
  0x37   : > { %v321_v33 = vsel %vm265_vm1, %v1012_v9, 0.0 }
  0x38   : > { %v300_v8 = vadd.f32 %v299_v62, %v298_v0  ;;  %v480_v62 = vsel %vm265_vm1, %v410_v45, 0.0  ;;  %v479_v0 = vadd.f32 %v478_v53, %v477_v56  ;;  %v484_v17 = vsel %vm265_vm1, %v412_v60, 0.0  ;;  %v790_v56 = vld [vmem:[%s848_s15 + $0x90] sm:$0xff]  }
  0x39   : > { %v1057_v53 = vunpack.c.l.bf16 %v789_v41 }
  0x3a   : > { %v302_v15 = vadd.f32 %v301_v2, %v300_v8  ;;  %v482_v8 = vsel %vm265_vm1, %v411_v52, 0.0  ;;  %v481_v10 = vadd.f32 %v480_v62, %v479_v0  ;;  %v1065_v62 = vunpack.c.h.bf16 %v789_v41 }
  0x3c   : > { %v304_v20 = vadd.f32 %v303_v13, %v302_v15  ;;  %v787_v13 = vld [vmem:[%s848_s15 + $0x78] sm:$0xff]   ;;  %v414_v15 = vmul.f32 %v905_v37, %v905_v37  ;;  %v483_v4 = vadd.f32 %v482_v8, %v481_v10  ;;  %v1072_v8 = vunpack.c.l.bf16 %v790_v56 }
  0x3d   : > { %v1027_v22 = vunpack.c.l.bf16 %v787_v13  ;;  %v1035_v31 = vunpack.c.h.bf16 %v787_v13  ;;  %v791_v10 = vld [vmem:[%s848_s15 + $0x98] sm:$0xff]  }
  0x3e   : > { %v306_v28 = vadd.f32 %v305_v3, %v304_v20  ;;  %v1020_v3 = vunpack.c.h.bf16 %v786_v57  ;;  %v488_v29 = vsel %vm265_vm1, %v414_v15, 0.0 }
  0x3f   : > { %v325_v40 = vsel %vm265_vm1, %v1027_v22, 0.0 }
  0x40   : > { %v308_v35 = vadd.f32 %v307_v7, %v306_v28  ;;  %v323_v37 = vsel %vm265_vm1, %v1020_v3, 0.0  ;;  %v485_v7 = vadd.f32 %v484_v17, %v483_v4  ;;  %v416_v28 = vmul.f32 %v914_v44, %v914_v44 }
  0x41   : > { %v327_v44 = vsel %vm265_vm1, %v1035_v31, 0.0  ;;  %v1080_v17 = vunpack.c.h.bf16 %v790_v56 }
  0x42   : > { %v310_v43 = vadd.f32 %v309_v12, %v308_v35  ;;  %v487_v12 = vadd.f32 %v486_v21, %v485_v7  ;;  %v417_v35 = vmul.f32 %v918_v47, %v918_v47  ;;  %v492_v45 = vsel %vm265_vm1, %v416_v28, 0.0  ;;  %v792_v7 = vld [vmem:[%s848_s15 + $0xa0] sm:$0xff]  }
  0x43   : > { %v329_v47 = vsel %vm265_vm1, %v1042_v38, 0.0  ;;  %v1087_v21 = vunpack.c.l.bf16 %v791_v10 }
  0x44   : > { %v312_v50 = vadd.f32 %v311_v16, %v310_v43  ;;  %v489_v16 = vadd.f32 %v488_v29, %v487_v12  ;;  %v418_v43 = vmul.f32 %v923_v51, %v923_v51  ;;  %v494_v52 = vsel %vm265_vm1, %v417_v35, 0.0 }
  0x45   : > { %v331_v51 = vsel %vm265_vm1, %v1050_v46, 0.0  ;;  %v1095_v29 = vunpack.c.h.bf16 %v791_v10 }
  0x46   : > { %v314_v59 = vadd.f32 %v313_v19, %v312_v50  ;;  %v491_v19 = vadd.f32 %v490_v36, %v489_v16  ;;  %v419_v50 = vmul.f32 %v927_v54, %v927_v54  ;;  %v496_v60 = vsel %vm265_vm1, %v418_v43, 0.0  ;;  %v793_v16 = vld [vmem:[%s848_s15 + $0xa8] sm:$0xff]  }
  0x47   : > { %v333_v54 = vsel %vm265_vm1, %v1057_v53, 0.0  ;;  %v1102_v36 = vunpack.c.l.bf16 %v792_v7 }
  0x48   : > { %v316_v2 = vadd.f32 %v315_v23, %v314_v59  ;;  %v493_v23 = vadd.f32 %v492_v45, %v491_v19  ;;  %v420_v59 = vmul.f32 %v932_v58, %v932_v58  ;;  %v498_v6 = vsel %vm265_vm1, %v419_v50, 0.0 }
  0x49   : > { %v335_v58 = vsel %vm265_vm1, %v1065_v62, 0.0  ;;  %v1110_v45 = vunpack.c.h.bf16 %v792_v7 }
  0x4a   : > { %v318_v14 = vadd.f32 %v317_v26, %v316_v2  ;;  %v495_v26 = vadd.f32 %v494_v52, %v493_v23  ;;  %v421_v2 = vmul.f32 %v936_v61, %v936_v61  ;;  %v500_v15 = vsel %vm265_vm1, %v420_v59, 0.0  ;;  %v794_v23 = vld [vmem:[%s848_s15 + $0xb0] sm:$0xff]  }
  0x4b   : > { %v337_v61 = vsel %vm265_vm1, %v1072_v8, 0.0  ;;  %v1117_v52 = vunpack.c.l.bf16 %v793_v16 }
  0x4c   : > { %v320_v20 = vadd.f32 %v319_v30, %v318_v14  ;;  %v497_v30 = vadd.f32 %v496_v60, %v495_v26  ;;  %v422_v14 = vmul.f32 %v941_v1, %v941_v1  ;;  %v502_v5 = vsel %vm265_vm1, %v421_v2, 0.0 }
  0x4d   : > { %v339_v1 = vsel %vm265_vm1, %v1080_v17, 0.0  ;;  %v1125_v60 = vunpack.c.h.bf16 %v793_v16 }
  0x4e   : > { %v322_v27 = vadd.f32 %v321_v33, %v320_v20  ;;  %v499_v33 = vadd.f32 %v498_v6, %v497_v30  ;;  %v423_v20 = vmul.f32 %v951_v11, %v951_v11  ;;  %v504_v28 = vsel %vm265_vm1, %v422_v14, 0.0  ;;  %v795_v30 = vld [vmem:[%s848_s15 + $0xb8] sm:$0xff]  }
  0x4f   : > { %v341_v11 = vsel %vm265_vm1, %v1087_v21, 0.0  ;;  %v1132_v6 = vunpack.c.l.bf16 %v794_v23 }
  0x50   : > { %v324_v34 = vadd.f32 %v323_v37, %v322_v27  ;;  %v501_v37 = vadd.f32 %v500_v15, %v499_v33  ;;  %v424_v27 = vmul.f32 %v958_v18, %v958_v18  ;;  %v506_v35 = vsel %vm265_vm1, %v423_v20, 0.0 }
  0x51   : > { %v343_v18 = vsel %vm265_vm1, %v1095_v29, 0.0  ;;  %v1140_v15 = vunpack.c.h.bf16 %v794_v23 }
  0x52   : > { %v326_v42 = vadd.f32 %v325_v40, %v324_v34  ;;  %v503_v40 = vadd.f32 %v502_v5, %v501_v37  ;;  %v425_v34 = vmul.f32 %v967_v24, %v967_v24  ;;  %v508_v43 = vsel %vm265_vm1, %v424_v27, 0.0  ;;  %v796_v37 = vld [vmem:[%s848_s15 + $0xc0] sm:$0xff]  }
  0x53   : > { %v345_v24 = vsel %vm265_vm1, %v1102_v36, 0.0  ;;  %v1147_v5 = vunpack.c.l.bf16 %v795_v30 }
  0x54   : > { %v328_v49 = vadd.f32 %v327_v44, %v326_v42  ;;  %v505_v44 = vadd.f32 %v504_v28, %v503_v40  ;;  %v426_v42 = vmul.f32 %v975_v32, %v975_v32  ;;  %v510_v50 = vsel %vm265_vm1, %v425_v34, 0.0 }
  0x55   : > { %v347_v32 = vsel %vm265_vm1, %v1110_v45, 0.0  ;;  %v1155_v28 = vunpack.c.h.bf16 %v795_v30 }
  0x56   : > { %v330_v57 = vadd.f32 %v329_v47, %v328_v49  ;;  %v507_v47 = vadd.f32 %v506_v35, %v505_v44  ;;  %v427_v49 = vmul.f32 %v982_v39, %v982_v39  ;;  %v512_v59 = vsel %vm265_vm1, %v426_v42, 0.0  ;;  %v797_v44 = vld [vmem:[%s848_s15 + $0xc8] sm:$0xff]  }
  0x57   : > { %v349_v39 = vsel %vm265_vm1, %v1117_v52, 0.0  ;;  %v1162_v35 = vunpack.c.l.bf16 %v796_v37 }
  0x58   : > { %v332_v0 = vadd.f32 %v331_v51, %v330_v57  ;;  %v509_v51 = vadd.f32 %v508_v43, %v507_v47  ;;  %v428_v57 = vmul.f32 %v990_v48, %v990_v48  ;;  %v514_v2 = vsel %vm265_vm1, %v427_v49, 0.0 }
  0x59   : > { %v351_v48 = vsel %vm265_vm1, %v1125_v60, 0.0  ;;  %v1170_v43 = vunpack.c.h.bf16 %v796_v37 }
  0x5a   : > { %v334_v13 = vadd.f32 %v333_v54, %v332_v0  ;;  %v511_v54 = vadd.f32 %v510_v50, %v509_v51  ;;  %v429_v0 = vmul.f32 %v997_v55, %v997_v55  ;;  %v516_v14 = vsel %vm265_vm1, %v428_v57, 0.0  ;;  %v798_v51 = vld [vmem:[%s848_s15 + $0xd0] sm:$0xff]  }
  0x5b   : > { %v353_v55 = vsel %vm265_vm1, %v1132_v6, 0.0  ;;  %v1177_v50 = vunpack.c.l.bf16 %v797_v44 }
  0x5c   : > { %v336_v4 = vadd.f32 %v335_v58, %v334_v13  ;;  %v513_v58 = vadd.f32 %v512_v59, %v511_v54  ;;  %v430_v13 = vmul.f32 %v1005_v63, %v1005_v63  ;;  %v518_v20 = vsel %vm265_vm1, %v429_v0, 0.0 }
  0x5d   : > { %v355_v63 = vsel %vm265_vm1, %v1140_v15, 0.0  ;;  %v1185_v59 = vunpack.c.h.bf16 %v797_v44 }
  0x5e   : > { %v338_v25 = vadd.f32 %v337_v61, %v336_v4  ;;  %v515_v61 = vadd.f32 %v514_v2, %v513_v58  ;;  %v431_v4 = vmul.f32 %v1012_v9, %v1012_v9  ;;  %v520_v27 = vsel %vm265_vm1, %v430_v13, 0.0  ;;  %v799_v58 = vld [vmem:[%s848_s15 + $0xd8] sm:$0xff]  }
  0x5f   : > { %v357_v9 = vsel %vm265_vm1, %v1147_v5, 0.0  ;;  %v1192_v2 = vunpack.c.l.bf16 %v798_v51 }
  0x60   : > { %v340_v12 = vadd.f32 %v339_v1, %v338_v25  ;;  %v517_v1 = vadd.f32 %v516_v14, %v515_v61  ;;  %v432_v25 = vmul.f32 %v1020_v3, %v1020_v3  ;;  %v522_v34 = vsel %vm265_vm1, %v431_v4, 0.0 }
  0x61   : > { %v359_v3 = vsel %vm265_vm1, %v1155_v28, 0.0  ;;  %v1200_v14 = vunpack.c.h.bf16 %v798_v51 }
  0x62   : > { %v342_v41 = vadd.f32 %v341_v11, %v340_v12  ;;  %v519_v11 = vadd.f32 %v518_v20, %v517_v1  ;;  %v433_v12 = vmul.f32 %v1027_v22, %v1027_v22  ;;  %v524_v42 = vsel %vm265_vm1, %v432_v25, 0.0  ;;  %v800_v1 = vld [vmem:[%s848_s15 + $0xe0] sm:$0xff]  }
  0x63   : > { %v361_v22 = vsel %vm265_vm1, %v1162_v35, 0.0  ;;  %v1207_v20 = vunpack.c.l.bf16 %v799_v58 }
  0x64   : > { %v344_v19 = vadd.f32 %v343_v18, %v342_v41  ;;  %v521_v18 = vadd.f32 %v520_v27, %v519_v11  ;;  %v434_v41 = vmul.f32 %v1035_v31, %v1035_v31  ;;  %v526_v49 = vsel %vm265_vm1, %v433_v12, 0.0 }
  0x65   : > { %v363_v31 = vsel %vm265_vm1, %v1170_v43, 0.0  ;;  %v1215_v27 = vunpack.c.h.bf16 %v799_v58 }
  0x66   : > { %v346_v56 = vadd.f32 %v345_v24, %v344_v19  ;;  %v523_v24 = vadd.f32 %v522_v34, %v521_v18  ;;  %v435_v19 = vmul.f32 %v1042_v38, %v1042_v38  ;;  %v528_v57 = vsel %vm265_vm1, %v434_v41, 0.0  ;;  %v801_v18 = vld [vmem:[%s848_s15 + $0xe8] sm:$0xff]  }
  0x67   : > { %v365_v38 = vsel %vm265_vm1, %v1177_v50, 0.0  ;;  %v1222_v34 = vunpack.c.l.bf16 %v800_v1 }
  0x68   : > { %v348_v26 = vadd.f32 %v347_v32, %v346_v56  ;;  %v525_v32 = vadd.f32 %v524_v42, %v523_v24  ;;  %v436_v56 = vmul.f32 %v1050_v46, %v1050_v46  ;;  %v530_v0 = vsel %vm265_vm1, %v435_v19, 0.0 }
  0x69   : > { %v367_v46 = vsel %vm265_vm1, %v1185_v59, 0.0  ;;  %v1230_v42 = vunpack.c.h.bf16 %v800_v1  ;;  %v448_v1 = vmul.f32 %v1140_v15, %v1140_v15  ;;  %v450_v15 = vmul.f32 %v1155_v28, %v1155_v28 }
  0x6a   : > { %v350_v10 = vadd.f32 %v349_v39, %v348_v26  ;;  %v527_v39 = vadd.f32 %v526_v49, %v525_v32  ;;  %v437_v26 = vmul.f32 %v1057_v53, %v1057_v53  ;;  %v532_v13 = vsel %vm265_vm1, %v436_v56, 0.0  ;;  %v802_v32 = vld [vmem:[%s848_s15 + $0xf0] sm:$0xff]  }
  0x6b   : > { %v369_v53 = vsel %vm265_vm1, %v1192_v2, 0.0  ;;  %v1237_v49 = vunpack.c.l.bf16 %v801_v18  ;;  %v453_v28 = vmul.f32 %v1177_v50, %v1177_v50  ;;  %v456_v50 = vmul.f32 %v1200_v14, %v1200_v14 }
  0x6c   : > { %v352_v33 = vadd.f32 %v351_v48, %v350_v10  ;;  %v529_v48 = vadd.f32 %v528_v57, %v527_v39  ;;  %v438_v10 = vmul.f32 %v1065_v62, %v1065_v62  ;;  %v534_v4 = vsel %vm265_vm1, %v437_v26, 0.0 }
  0x6d   : > { %v371_v62 = vsel %vm265_vm1, %v1200_v14, 0.0  ;;  %v1245_v57 = vunpack.c.h.bf16 %v801_v18  ;;  %v572_v14 = vsel %vm265_vm1, %v456_v50, 0.0 }
  0x6e   : > { %v354_v7 = vadd.f32 %v353_v55, %v352_v33  ;;  %v531_v55 = vadd.f32 %v530_v0, %v529_v48  ;;  %v439_v33 = vmul.f32 %v1072_v8, %v1072_v8  ;;  %v536_v25 = vsel %vm265_vm1, %v438_v10, 0.0  ;;  %v803_v48 = vld [vmem:[%s848_s15 + $0xf8] sm:$0xff]  }
  0x6f   : > { %v373_v8 = vsel %vm265_vm1, %v1207_v20, 0.0  ;;  %v1252_v0 = vunpack.c.l.bf16 %v802_v32 }
  0x70   : > { %v356_v40 = vadd.f32 %v355_v63, %v354_v7  ;;  %v533_v63 = vadd.f32 %v532_v13, %v531_v55  ;;  %v440_v7 = vmul.f32 %v1080_v17, %v1080_v17  ;;  %v538_v12 = vsel %vm265_vm1, %v439_v33, 0.0 }
  0x71   : > { %v375_v17 = vsel %vm265_vm1, %v1215_v27, 0.0  ;;  %v1260_v13 = vunpack.c.h.bf16 %v802_v32 }
  0x72   : > { %v358_v16 = vadd.f32 %v357_v9, %v356_v40  ;;  %v535_v9 = vadd.f32 %v534_v4, %v533_v63  ;;  %v441_v40 = vmul.f32 %v1087_v21, %v1087_v21  ;;  %v540_v41 = vsel %vm265_vm1, %v440_v7, 0.0 }
  0x73   : > { %v377_v21 = vsel %vm265_vm1, %v1222_v34, 0.0  ;;  %v1267_v4 = vunpack.c.l.bf16 %v803_v48  ;;  %v1274_v7 = vunpack.c.h.bf16 %v803_v48 }
  0x74   : > { %v360_v47 = vadd.f32 %v359_v3, %v358_v16  ;;  %v537_v3 = vadd.f32 %v536_v25, %v535_v9  ;;  %v442_v16 = vmul.f32 %v1095_v29, %v1095_v29  ;;  %v542_v19 = vsel %vm265_vm1, %v441_v40, 0.0 }
  0x75   : > { %v379_v29 = vsel %vm265_vm1, %v1230_v42, 0.0  ;;  %v389_v25 = vsel %vm265_vm1, %v1267_v4, 0.0  ;;  %v449_v9 = vmul.f32 %v1147_v5, %v1147_v5  ;;  %v391_v40 = vsel %vm265_vm1, %v1274_v7, 0.0 }
  0x76   : > { %v362_v23 = vadd.f32 %v361_v22, %v360_v47  ;;  %v539_v22 = vadd.f32 %v538_v12, %v537_v3  ;;  %v443_v47 = vmul.f32 %v1102_v36, %v1102_v36  ;;  %v544_v56 = vsel %vm265_vm1, %v442_v16, 0.0 }
  0x77   : > { %v381_v36 = vsel %vm265_vm1, %v1237_v49, 0.0  ;;  %v556_v3 = vsel %vm265_vm1, %v448_v1, 0.0  ;;  %v451_v16 = vmul.f32 %v1162_v35, %v1162_v35  ;;  %v454_v35 = vmul.f32 %v1185_v59, %v1185_v59  ;;  %v264_v59 = vld [vmem:[%s1354_s1] sm:$0x1] }
  0x78   : > { %v364_v54 = vadd.f32 %v363_v31, %v362_v23  ;;  %v541_v31 = vadd.f32 %v540_v41, %v539_v22  ;;  %v444_v23 = vmul.f32 %v1110_v45, %v1110_v45  ;;  %v546_v26 = vsel %vm265_vm1, %v443_v47, 0.0 }
  0x79   : > { %v558_v41 = vsel %vm265_vm1, %v449_v9, 0.0  ;;  %v452_v22 = vmul.f32 %v1170_v43, %v1170_v43  ;;  %v455_v43 = vmul.f32 %v1192_v2, %v1192_v2  ;;  %v465_v9 = vmul.f32 %v1267_v4, %v1267_v4 }
  0x7a   : > { %v366_v30 = vadd.f32 %v365_v38, %v364_v54  ;;  %v543_v38 = vadd.f32 %v542_v19, %v541_v31  ;;  %v445_v54 = vmul.f32 %v1117_v52, %v1117_v52  ;;  %v548_v10 = vsel %vm265_vm1, %v444_v23, 0.0 }
  0x7b   : > { %v385_v52 = vsel %vm265_vm1, %v1252_v0, 0.0  ;;  %v570_v2 = vsel %vm265_vm1, %v455_v43, 0.0 }
  0x7c   : > { %v368_v61 = vadd.f32 %v367_v46, %v366_v30  ;;  %v383_v46 = vsel %vm265_vm1, %v1245_v57, 0.0  ;;  %v545_v45 = vadd.f32 %v544_v56, %v543_v38  ;;  %v446_v30 = vmul.f32 %v1125_v60, %v1125_v60 }
  0x7d   : > { %v550_v33 = vsel %vm265_vm1, %v445_v54, 0.0  ;;  %v568_v54 = vsel %vm265_vm1, %v454_v35, 0.0 }
  0x7e   : > { %v370_v37 = vadd.f32 %v369_v53, %v368_v61  ;;  %v547_v53 = vadd.f32 %v546_v26, %v545_v45  ;;  %v447_v61 = vmul.f32 %v1132_v6, %v1132_v6  ;;  %v457_v45 = vmul.f32 %v1207_v20, %v1207_v20 }
  0x80   : > { %v372_v11 = vadd.f32 %v371_v62, %v370_v37  ;;  %v387_v62 = vsel %vm265_vm1, %v1260_v13, 0.0  ;;  %v549_v60 = vadd.f32 %v548_v10, %v547_v53  ;;  %v552_v37 = vsel %vm265_vm1, %v446_v30, 0.0 }
  0x81   : > { %v458_v30 = vmul.f32 %v1215_v27, %v1215_v27  ;;  %v574_v20 = vsel %vm265_vm1, %v457_v45, 0.0 }
  0x82   : > { %v374_v44 = vadd.f32 %v373_v8, %v372_v11  ;;  %v551_v6 = vadd.f32 %v550_v33, %v549_v60  ;;  %v554_v11 = vsel %vm265_vm1, %v447_v61, 0.0  ;;  %v461_v33 = vmul.f32 %v1237_v49, %v1237_v49 }
  0x83   : > { %v576_v61 = vsel %vm265_vm1, %v458_v30, 0.0 }
  0x84   : > { %v376_v24 = vadd.f32 %v375_v17, %v374_v44  ;;  %v553_v12 = vadd.f32 %v552_v37, %v551_v6  ;;  %v463_v37 = vmul.f32 %v1252_v0, %v1252_v0  ;;  %v464_v6 = vmul.f32 %v1260_v13, %v1260_v13 }
  0x86   : > { %v378_v51 = vadd.f32 %v377_v21, %v376_v24  ;;  %v555_v18 = vadd.f32 %v554_v11, %v553_v12  ;;  %v560_v24 = vsel %vm265_vm1, %v450_v15, 0.0  ;;  %v588_v0 = vsel %vm265_vm1, %v464_v6, 0.0 }
  0x88   : > { %v380_v39 = vadd.f32 %v379_v29, %v378_v51  ;;  %v557_v5 = vadd.f32 %v556_v3, %v555_v18  ;;  %v562_v29 = vsel %vm265_vm1, %v451_v16, 0.0  ;;  %v564_v51 = vsel %vm265_vm1, %v452_v22, 0.0 }
  0x8a   : > { %v382_v58 = vadd.f32 %v381_v36, %v380_v39  ;;  %v559_v47 = vadd.f32 %v558_v41, %v557_v5  ;;  %v566_v36 = vsel %vm265_vm1, %v453_v28, 0.0 }
  0x8c   : > { %v384_v55 = vadd.f32 %v383_v46, %v382_v58  ;;  %v561_v31 = vadd.f32 %v560_v24, %v559_v47 }
  0x8e   : > { %v386_v63 = vadd.f32 %v385_v52, %v384_v55  ;;  %v563_v23 = vadd.f32 %v562_v29, %v561_v31  ;;  %v459_v52 = vmul.f32 %v1222_v34, %v1222_v34  ;;  %v460_v55 = vmul.f32 %v1230_v42, %v1230_v42 }
  0x8f   : > { %v582_v42 = vsel %vm265_vm1, %v461_v33, 0.0 }
  0x90   : > { %v388_v8 = vadd.f32 %v387_v62, %v386_v63  ;;  %v565_v38 = vadd.f32 %v564_v51, %v563_v23  ;;  %v578_v62 = vsel %vm265_vm1, %v459_v52, 0.0  ;;  %v462_v63 = vmul.f32 %v1245_v57, %v1245_v57 }
  0x91   : > { %v580_v34 = vsel %vm265_vm1, %v460_v55, 0.0  ;;  %v586_v57 = vsel %vm265_vm1, %v463_v37, 0.0 }
  0x92   : > { %v390_v17 = vadd.f32 %v389_v25, %v388_v8  ;;  %v567_v26 = vadd.f32 %v566_v36, %v565_v38  ;;  %v584_v49 = vsel %vm265_vm1, %v462_v63, 0.0 }
  0x94   : > { %v392_v44 = vadd.f32 %v391_v40, %v390_v17  ;;  %v569_v48 = vadd.f32 %v568_v54, %v567_v26  ;;  %v466_v40 = vmul.f32 %v1274_v7, %v1274_v7  ;;  %v590_v17 = vsel %vm265_vm1, %v465_v9, 0.0 }
  0x96   : > { %v393_v21 = vrot.slane %v392_v44, 4  ;;  %v571_v10 = vadd.f32 %v570_v2, %v569_v48  ;;  %v592_v13 = vsel %vm265_vm1, %v466_v40, 0.0 }
  0x98   : > { %v394_v19 = vadd.f32 %v393_v21, %v392_v44  ;;  %v573_v53 = vadd.f32 %v572_v14, %v571_v10  ;;  %v402_v21 = vld [vmem:[%s1355_s2] sm:$0x1] }
  0x9a   : > { %v395_v32 = vrot.slane %v394_v19, 2  ;;  %v575_v27 = vadd.f32 %v574_v20, %v573_v53 }
  0x9c   : > { %v396_v56 = vadd.f32 %v395_v32, %v394_v19  ;;  %v577_v60 = vadd.f32 %v576_v61, %v575_v27 }
  0x9e   : > { %v397_v39 = vrot.slane %v396_v56, 1  ;;  %v579_v1 = vadd.f32 %v578_v62, %v577_v60 }
  0xa0   : > { %v398_v46 = vadd.f32 %v397_v39, %v396_v56  ;;  %v581_v25 = vadd.f32 %v580_v34, %v579_v1 }
  0xa2   : > { %v399_v58 = vadd.f32 %v398_v46, %v264_v59  ;;  %v583_v8 = vadd.f32 %v582_v42, %v581_v25 }
  0xa4   : > { %401 = vst.msk [vmem:[%s1354_s1] sm:$0x1] %vm400_vm2, %v399_v58  ;;  %v585_v11 = vadd.f32 %v584_v49, %v583_v8 }
  0xa6   : > { %v587_v12 = vadd.f32 %v586_v57, %v585_v11 }
  0xa8   : > { %v589_v15 = vadd.f32 %v588_v0, %v587_v12 }
  0xaa   : > { %v591_v3 = vadd.f32 %v590_v17, %v589_v15 }
  0xac   : > { %v593_v18 = vadd.f32 %v592_v13, %v591_v3 }
  0xae   : > { %v594_v44 = vrot.slane %v593_v18, 4 }
  0xb0   : > { %v595_v16 = vadd.f32 %v594_v44, %v593_v18 }
  0xb2   : > { %v596_v41 = vrot.slane %v595_v16, 2 }
  0xb4   : > { %v597_v4 = vadd.f32 %v596_v41, %v595_v16 }
  0xb6   : > { %v598_v5 = vrot.slane %v597_v4, 1 }
  0xb8   : > { %v599_v7 = vadd.f32 %v598_v5, %v597_v4 }
  0xba   : > { %v600_v22 = vadd.f32 %v599_v7, %v402_v21 }
  0xbc   : > { %601 = vst.msk [vmem:[%s1355_s2] sm:$0x1] %vm400_vm2, %v600_v22 }
  0xbd PF: > { %s13_s9 = sadd.s32 1, %s819_s9  }
  0xbe   : > { %p10_p5 = scmp.ge.s32.totalorder %s13_s9, 6  }
  0xc0   :  { %12 = sbr.rel (!%p10_p5) target bundleno = 1 (0x1), region = 62 }

// kernel: generator_forward.20
= control target key start
LH: loop header
LB: loop body
LE: loop exit
PB: predicated region body
PF: predicated region fallthrough
CT: control target
= control target key end

     0   :  { %s895_s15 = smov 0   ;;  %s897_s16 = smov 0   ;;  %s1073_s0 = inlined_call_operand.vmem [shape: f32[1,16], index: 0, kind: input, shape index: {}]   ;;  %s1074_s1 = inlined_call_operand.vmem [shape: f32[1,16], index: 1, kind: input, shape index: {}]   ;;  %s1075_s2 = inlined_call_operand.vmem [shape: bf16[2048,16], index: 2, kind: input, shape index: {}]   ;;  %s1076_s3 = inlined_call_operand.vmem [shape: bf16[16,12], index: 3, kind: input, shape index: {}]   ;;  %s1077_s4 = inlined_call_operand.vmem [shape: f32[2048,12], index: 4, kind: output, shape index: {}]  }
   0x1   :  { %s899_s17 = smov 0  }
   0x2 LB: > { %s33_s18 = sadd.s32 1, %s863_s16  ;;  %p733_p0 = scmp.ge.s32.totalorder %s867_s17, 1  ;;  %s867_s17 = sphi %s899_s17, %s14_s17   ;;  %s863_s16 = sphi %s897_s16, %s1079_s16   ;;  %s859_s15 = sphi %s895_s15, %s1078_s15  }
   0x3   : > { %p35_p1 = scmp.ge.s32.totalorder %s33_s18, 16  ;;  %p221_p2 = scmp.lt.s32.totalorder %s867_s17, 17 }
   0x5   : > { %s1081_s18 = smov (%p35_p1, %s33_s18), 0  ;;  %p222_p3 = pnand %p733_p0, %p221_p2 }
   0x6   : > { %v844_v0 = vld [vmem:[%s1076_s3] sm:$0xff] (!%p222_p3)   ;;  %s734_s21 = sshll.u32 (!%p222_p3), %s859_s15, 4  ;;  %vm305_vm0 = vcmask (!%p222_p3), 97280   ;;  %vm448_vm1 = vcmask (!%p222_p3), 130048   ;;  %v869_v5 = vmov (!%p222_p3), 0.0  }
   0x7   : > { %225 = sbr.rel (%p222_p3) target bundleno = 257 (0x101), region = 36  ;;  %p274_p4 = scmp.lt.s32.totalorder (!%p222_p3), %s734_s21, 255  ;;  %799 = vmatprep.subr.bf16.mxu0 (!%p222_p3), %v844_v0  ;;  %817 = vmatprep.subr.bf16.mxu1 (!%p222_p3), %v844_v0  ;;  %v929_v1 = vld [vmem:[%s1073_s0] ss:$0 sm:$0xff] (!%p222_p3) }
   0x8   : > { %800 = vmatpush3.bf16.msra.mxu0 (!%p222_p3), %v844_v0  ;;  %818 = vmatpush3.bf16.msra.mxu1 (!%p222_p3), %v844_v0  ;;  %v970_v11 = vld [vmem:[%s1074_s1] ss:$0 sm:$0xff] (!%p222_p3) }
   0xe   : > { %s1083_s21 = smov (!%p274_p4, %s734_s21), 255 }
   0xf   : > { %s735_s22 = sshll.u32 %s1083_s21, 2  ;;  %s737_s23 = sshll.u32 %s1083_s21, 3 }
  0x10   : > { %s919_s26 = scalar_lea.vmem %s1075_s2, %s735_s22  ;;  %s924_s29 = scalar_lea.vmem %s1077_s4, %s737_s23 }
  0x11   : > { %v752_v2 = vld [vmem:[%s919_s26] sm:$0xff]   ;;  %v783_v4 = vld [vmem:[%s919_s26 + $0x8] sm:$0xff]   ;;  %308 = vst.msk [vmem:[%s924_s29 + $0x10] sm:$0xff] %vm305_vm0, %v869_v5  ;;  %306 = vst.msk [vmem:[%s924_s29] sm:$0xff] %vm305_vm0, %v869_v5 }
  0x12   : > { %v786_v3 = vld [vmem:[%s919_s26 + $0x20] sm:$0xff]   ;;  %307 = vst.msk [vmem:[%s924_s29 + $0x8] sm:$0xff] %vm305_vm0, %v869_v5  ;;  %309 = vst.msk [vmem:[%s924_s29 + $0x18] sm:$0xff] %vm305_vm0, %v869_v5  ;;  %v753_v6 = vunpack.c.l.bf16 %v752_v2  ;;  %v754_v7 = vunpack.c.h.bf16 %v752_v2  ;;  %v787_v10 = vld [vmem:[%s919_s26 + $0x28] sm:$0xff]   ;;  %v757_v12 = vunpack.c.l.bf16 %v783_v4  ;;  %v758_v13 = vunpack.c.h.bf16 %v783_v4 }
  0x13   : > { %310 = vst.msk [vmem:[%s924_s29 + $0x20] sm:$0xff] %vm305_vm0, %v869_v5  ;;  %311 = vst.msk [vmem:[%s924_s29 + $0x28] sm:$0xff] %vm305_vm0, %v869_v5  ;;  %v769_v8 = vunpack.c.l.bf16 %v786_v3  ;;  %v770_v9 = vunpack.c.h.bf16 %v786_v3  ;;  %v773_v14 = vunpack.c.l.bf16 %v787_v10  ;;  %v774_v15 = vunpack.c.h.bf16 %v787_v10  ;;  %v784_v32 = vld [vmem:[%s919_s26 + $0x10] sm:$0xff]   ;;  %v785_v42 = vld [vmem:[%s919_s26 + $0x18] sm:$0xff]  }
  0x14   : > { %312 = vst.msk [vmem:[%s924_s29 + $0x30] sm:$0xff] %vm305_vm0, %v869_v5  ;;  %313 = vst.msk [vmem:[%s924_s29 + $0x38] sm:$0xff] %vm305_vm0, %v869_v5  ;;  %v361_v16 = vmul.f32 %v753_v6, %v929_v1  ;;  %v362_v17 = vmul.f32 %v754_v7, %v929_v1  ;;  %v363_v20 = vmul.f32 %v757_v12, %v929_v1  ;;  %v788_v37 = vld [vmem:[%s919_s26 + $0x30] sm:$0xff]   ;;  %v761_v45 = vunpack.c.l.bf16 %v784_v32  ;;  %v789_v47 = vld [vmem:[%s919_s26 + $0x38] sm:$0xff]  }
  0x15   : > { %314 = vst.msk [vmem:[%s924_s29 + $0x40] sm:$0xff] %vm305_vm0, %v869_v5  ;;  %315 = vst.msk [vmem:[%s924_s29 + $0x48] sm:$0xff] %vm305_vm0, %v869_v5  ;;  %v369_v18 = vmul.f32 %v769_v8, %v929_v1  ;;  %v370_v19 = vmul.f32 %v770_v9, %v929_v1  ;;  %v364_v21 = vmul.f32 %v758_v13, %v929_v1  ;;  %v762_v46 = vunpack.c.h.bf16 %v784_v32 }
  0x16   : > { %316 = vst.msk [vmem:[%s924_s29 + $0x50] sm:$0xff] %vm305_vm0, %v869_v5  ;;  %317 = vst.msk [vmem:[%s924_s29 + $0x58] sm:$0xff] %vm305_vm0, %v869_v5  ;;  %v371_v22 = vmul.f32 %v773_v14, %v929_v1  ;;  %v372_v23 = vmul.f32 %v774_v15, %v929_v1  ;;  %v384_v24 = vadd.f32 %v970_v11, %v361_v16  ;;  %v777_v50 = vunpack.c.l.bf16 %v788_v37 }
  0x17   : > { %318 = vst.msk [vmem:[%s924_s29 + $0x60] sm:$0xff] %vm305_vm0, %v869_v5  ;;  %319 = vst.msk [vmem:[%s924_s29 + $0x68] sm:$0xff] %vm305_vm0, %v869_v5  ;;  %v385_v25 = vadd.f32 %v970_v11, %v362_v17  ;;  %v392_v26 = vadd.f32 %v970_v11, %v369_v18  ;;  %v393_v27 = vadd.f32 %v970_v11, %v370_v19  ;;  %v778_v51 = vunpack.c.h.bf16 %v788_v37 }
  0x18   : > { %320 = vst.msk [vmem:[%s924_s29 + $0x70] sm:$0xff] %vm305_vm0, %v869_v5  ;;  %321 = vst.msk [vmem:[%s924_s29 + $0x78] sm:$0xff] %vm305_vm0, %v869_v5  ;;  %v386_v28 = vadd.f32 %v970_v11, %v363_v20  ;;  %v387_v29 = vadd.f32 %v970_v11, %v364_v21  ;;  %v394_v30 = vadd.f32 %v970_v11, %v371_v22  ;;  %v400_v33 = vmax.f32 %v384_v24, 0.0  ;;  %v424_v22 = vld [vmem:[%s924_s29] sm:$0xff] }
  0x19   : > { %v395_v31 = vadd.f32 %v970_v11, %v372_v23  ;;  %v401_v34 = vmax.f32 %v385_v25, 0.0  ;;  %v408_v35 = vmax.f32 %v392_v26, 0.0  ;;  %v409_v36 = vmax.f32 %v393_v27, 0.0  ;;  %v427_v26 = vld [vmem:[%s924_s29 + $0x18] sm:$0xff]  ;;  %v425_v32 = vld [vmem:[%s924_s29 + $0x8] sm:$0xff] }
  0x1a   : > { %v402_v38 = vmax.f32 %v386_v28, 0.0  ;;  %v403_v39 = vmax.f32 %v387_v29, 0.0  ;;  %v410_v40 = vmax.f32 %v394_v30, 0.0  ;;  %v365_v52 = vmul.f32 %v761_v45, %v929_v1 }
  0x1b   : > { %v411_v41 = vmax.f32 %v395_v31, 0.0  ;;  %v416_v43 = vpack.c.bf16 %v401_v34, %v400_v33  ;;  %v420_v44 = vpack.c.bf16 %v409_v36, %v408_v35  ;;  %v366_v53 = vmul.f32 %v762_v46, %v929_v1  ;;  %v428_v46 = vld [vmem:[%s924_s29 + $0x20] sm:$0xff] }
  0x1c   : > { %v417_v48 = vpack.c.bf16 %v403_v39, %v402_v38  ;;  %v765_v54 = vunpack.c.l.bf16 %v785_v42  ;;  %v766_v55 = vunpack.c.h.bf16 %v785_v42  ;;  %v373_v56 = vmul.f32 %v777_v50, %v929_v1  ;;  %v432_v23 = vld [vmem:[%s924_s29 + $0x40] sm:$0xff]  ;;  %v433_v33 = vld [vmem:[%s924_s29 + $0x48] sm:$0xff] }
  0x1d   : > { %v421_v49 = vpack.c.bf16 %v411_v41, %v410_v40  ;;  %801 = vmatprep.mubr.msk.bf16.mxu0 %vm448_vm1, %v416_v43  ;;  %809 = vmatprep.mubr.msk.bf16.mxu1 %vm448_vm1, %v420_v44  ;;  %v374_v57 = vmul.f32 %v778_v51, %v929_v1  ;;  %v781_v58 = vunpack.c.l.bf16 %v789_v47  ;;  %v782_v59 = vunpack.c.h.bf16 %v789_v47  ;;  %v434_v21 = vld [vmem:[%s924_s29 + $0x50] sm:$0xff]  ;;  %v435_v27 = vld [vmem:[%s924_s29 + $0x58] sm:$0xff] }
  0x1e   : > { %802 = vmatmul.mubr.msk.bf16.vlgmr.msra.gmra.mrb[0].mxu0 %vm448_vm1, %v417_v48  ;;  %v388_v60 = vadd.f32 %v970_v11, %v365_v52  ;;  %v389_v61 = vadd.f32 %v970_v11, %v366_v53  ;;  %v367_v62 = vmul.f32 %v765_v54, %v929_v1  ;;  %v368_v63 = vmul.f32 %v766_v55, %v929_v1  ;;  %v430_v44 = vld [vmem:[%s924_s29 + $0x30] sm:$0xff]  ;;  %v436_v48 = vld [vmem:[%s924_s29 + $0x60] sm:$0xff]  ;;  %v429_v54 = vld [vmem:[%s924_s29 + $0x28] sm:$0xff] }
  0x1f   : > { %810 = vmatmul.mubr.msk.bf16.vlgmr.msra.gmra.mrb[0].mxu1 %vm448_vm1, %v421_v49  ;;  %v396_v0 = vadd.f32 %v970_v11, %v373_v56  ;;  %v397_v2 = vadd.f32 %v970_v11, %v374_v57  ;;  %v375_v3 = vmul.f32 %v781_v58, %v929_v1  ;;  %v376_v4 = vmul.f32 %v782_v59, %v929_v1  ;;  %v438_v45 = vld [vmem:[%s924_s29 + $0x70] sm:$0xff]  ;;  %v431_v49 = vld [vmem:[%s924_s29 + $0x38] sm:$0xff]  ;;  %v437_v59 = vld [vmem:[%s924_s29 + $0x68] sm:$0xff] }
  0x20   : > { %v404_v5 = vmax.f32 %v388_v60, 0.0  ;;  %v405_v6 = vmax.f32 %v389_v61, 0.0  ;;  %v390_v7 = vadd.f32 %v970_v11, %v367_v62  ;;  %v391_v8 = vadd.f32 %v970_v11, %v368_v63  ;;  %v439_v53 = vld [vmem:[%s924_s29 + $0x78] sm:$0xff] }
  0x21   : > { %v412_v9 = vmax.f32 %v396_v0, 0.0  ;;  %v413_v10 = vmax.f32 %v397_v2, 0.0  ;;  %v398_v12 = vadd.f32 %v970_v11, %v375_v3  ;;  %v399_v13 = vadd.f32 %v970_v11, %v376_v4  ;;  %v426_v11 = vld [vmem:[%s924_s29 + $0x10] sm:$0xff] }
  0x22   : > { %v418_v14 = vpack.c.bf16 %v405_v6, %v404_v5  ;;  %v406_v15 = vmax.f32 %v390_v7, 0.0  ;;  %v407_v16 = vmax.f32 %v391_v8, 0.0 }
  0x23   : > { %v422_v1 = vpack.c.bf16 %v413_v10, %v412_v9  ;;  %v414_v17 = vmax.f32 %v398_v12, 0.0  ;;  %v415_v18 = vmax.f32 %v399_v13, 0.0 }
  0x24   : > { %805 = vmatprep.mubr.msk.bf16.mxu0 %vm448_vm1, %v418_v14  ;;  %v419_v19 = vpack.c.bf16 %v407_v16, %v406_v15 }
  0x25   : > { %813 = vmatprep.mubr.msk.bf16.mxu1 %vm448_vm1, %v422_v1  ;;  %v423_v20 = vpack.c.bf16 %v415_v18, %v414_v17 }
  0x26   : > { %806 = vmatmul.mubr.msk.bf16.gmra.mrb[4].mxu0 %vm448_vm1, %v419_v19 }
  0x27   : > { %814 = vmatmul.mubr.msk.bf16.gmra.mrb[4].mxu1 %vm448_vm1, %v423_v20 }
  0xf1   : > { %v803_v24 = vpop.f32.mrb[0].mxu0 }
  0xf2   : > { %v811_v25 = vpop.f32.mrb[0].mxu1  ;;  %v572_v28 = vadd.f32 %v803_v24, %v426_v11  ;;  %v507_v30 = vpop.f32.mrb[1].mxu0 }
  0xf3   : > { %v580_v29 = vadd.f32 %v811_v25, %v434_v21  ;;  %v539_v31 = vpop.f32.mrb[1].mxu1  ;;  %v570_v34 = vadd.f32 %v507_v30, %v424_v22  ;;  %v804_v36 = vpop.f32.mrb[2].mxu0 }
  0xf4   : > { %v578_v35 = vadd.f32 %v539_v31, %v432_v23  ;;  %v812_v37 = vpop.f32.mrb[2].mxu1  ;;  %589 = vst.msk [vmem:[%s924_s29 + $0x10] sm:$0xff] %vm305_vm0, %v572_v28  ;;  %v573_v38 = vadd.f32 %v804_v36, %v427_v26  ;;  %v510_v40 = vpop.f32.mrb[3].mxu0 }
  0xf5   : > { %597 = vst.msk [vmem:[%s924_s29 + $0x50] sm:$0xff] %vm305_vm0, %v580_v29  ;;  %v581_v39 = vadd.f32 %v812_v37, %v435_v27  ;;  %v542_v41 = vpop.f32.mrb[3].mxu1  ;;  %587 = vst.msk [vmem:[%s924_s29] sm:$0xff] %vm305_vm0, %v570_v34  ;;  %v571_v42 = vadd.f32 %v510_v40, %v425_v32 }
  0xf6   : > { %595 = vst.msk [vmem:[%s924_s29 + $0x40] sm:$0xff] %vm305_vm0, %v578_v35  ;;  %v579_v43 = vadd.f32 %v542_v41, %v433_v33  ;;  %590 = vst.msk [vmem:[%s924_s29 + $0x18] sm:$0xff] %vm305_vm0, %v573_v38 }
  0xf7   : > { %598 = vst.msk [vmem:[%s924_s29 + $0x58] sm:$0xff] %vm305_vm0, %v581_v39  ;;  %588 = vst.msk [vmem:[%s924_s29 + $0x8] sm:$0xff] %vm305_vm0, %v571_v42 }
  0xf8   : > { %596 = vst.msk [vmem:[%s924_s29 + $0x48] sm:$0xff] %vm305_vm0, %v579_v43 }
  0xf9   : > { %v807_v47 = vpop.f32.mrb[4].mxu0 }
  0xfa   : > { %v576_v50 = vadd.f32 %v807_v47, %v430_v44  ;;  %v815_v51 = vpop.f32.mrb[4].mxu1  ;;  %v523_v52 = vpop.f32.mrb[5].mxu0 }
  0xfb   : > { %v584_v55 = vadd.f32 %v815_v51, %v438_v45  ;;  %v574_v56 = vadd.f32 %v523_v52, %v428_v46  ;;  %v555_v57 = vpop.f32.mrb[5].mxu1  ;;  %v808_v58 = vpop.f32.mrb[6].mxu0 }
  0xfc   : > { %593 = vst.msk [vmem:[%s924_s29 + $0x30] sm:$0xff] %vm305_vm0, %v576_v50  ;;  %v582_v60 = vadd.f32 %v555_v57, %v436_v48  ;;  %v577_v61 = vadd.f32 %v808_v58, %v431_v49  ;;  %v816_v62 = vpop.f32.mrb[6].mxu1  ;;  %v526_v63 = vpop.f32.mrb[7].mxu0 }
  0xfd   : > { %601 = vst.msk [vmem:[%s924_s29 + $0x70] sm:$0xff] %vm305_vm0, %v584_v55  ;;  %591 = vst.msk [vmem:[%s924_s29 + $0x20] sm:$0xff] %vm305_vm0, %v574_v56  ;;  %v585_v0 = vadd.f32 %v816_v62, %v439_v53  ;;  %v575_v2 = vadd.f32 %v526_v63, %v429_v54  ;;  %v558_v3 = vpop.f32.mrb[7].mxu1 }
  0xfe   : > { %599 = vst.msk [vmem:[%s924_s29 + $0x60] sm:$0xff] %vm305_vm0, %v582_v60  ;;  %594 = vst.msk [vmem:[%s924_s29 + $0x38] sm:$0xff] %vm305_vm0, %v577_v61  ;;  %v583_v4 = vadd.f32 %v558_v3, %v437_v59 }
  0xff   : > { %602 = vst.msk [vmem:[%s924_s29 + $0x78] sm:$0xff] %vm305_vm0, %v585_v0  ;;  %592 = vst.msk [vmem:[%s924_s29 + $0x28] sm:$0xff] %vm305_vm0, %v575_v2 }
 0x100   : > { %600 = vst.msk [vmem:[%s924_s29 + $0x68] sm:$0xff] %vm305_vm0, %v583_v4 }
 0x101 PF: > { %s14_s17 = sadd.s32 1, %s867_s17   ;;  %s1078_s15 = smov %s863_s16 }
 0x102   : > { %p11_p5 = scmp.ge.s32.totalorder %s14_s17, 18   ;;  %s1079_s16 = smov %s1081_s18 }
 0x104   :  { %13 = sbr.rel (!%p11_p5) target bundleno = 2 (0x2), region = 79 }

// kernel: generator_forward.21
= control target key start
LH: loop header
LB: loop body
LE: loop exit
PB: predicated region body
PF: predicated region fallthrough
CT: control target
= control target key end

     0   :  { %s2294_s29 = smov 0   ;;  %s2296_s30 = smov 0   ;;  %s2813_s0 = inlined_call_operand.vmem [shape: bf16[2,1024,16], index: 0, kind: input, shape index: {}]   ;;  %s2814_s1 = inlined_call_operand.vmem [shape: f32[1,16], index: 1, kind: input, shape index: {}]   ;;  %s2815_s2 = inlined_call_operand.vmem [shape: f32[1,16], index: 2, kind: input, shape index: {}]   ;;  %s2816_s3 = inlined_call_operand.<no memory space> [shape: f32[1,1], index: 3, kind: input, shape index: {}]   ;;  %s2817_s4 = inlined_call_operand.vmem [shape: bf16[2,1024,2], index: 4, kind: input, shape index: {}]   ;;  %s2818_s5 = inlined_call_operand.vmem [shape: bf16[2,256,2], index: 5, kind: input, shape index: {}]   ;;  %s2819_s6 = inlined_call_operand.vmem [shape: bf16[2,256,8], index: 6, kind: input, shape index: {}]   ;;  %s2820_s7 = inlined_call_operand.vmem [shape: bf16[8,16], index: 7, kind: input, shape index: {}]   ;;  %s2821_s8 = inlined_call_operand.vmem [shape: bf16[2,1024,16], index: 8, kind: output, shape index: {}]  }
   0x1   :  { %v13_v0 = vstv %s2816_s3  ;;  %s2298_s9 = smov 0   ;;  %s2300_s10 = smov 0  }
   0x2   :  { %14 = vst [vmem:[#allocation2] sm:$0x1] %v13_v0  ;;  %s2302_s11 = smov 0  }
   0x3 LB: > { %s29_s3 = sadd.s32 1, %s2235_s9  ;;  %s32_s12 = sadd.s32 1, %s2239_s10  ;;  %s2243_s11 = sphi %s2302_s11, %s20_s11   ;;  %s2239_s10 = sphi %s2300_s10, %s2825_s10   ;;  %s2235_s9 = sphi %s2298_s9, %s2824_s9   ;;  %s2231_s30 = sphi %s2296_s30, %s2823_s30   ;;  %s2227_s29 = sphi %s2294_s29, %s2822_s29  }
   0x4   : > { %p30_p0 = scmp.ge.s32.totalorder %s29_s3, 8  ;;  %p1747_p1 = scmp.ge.s32.totalorder %s2243_s11, 1 }
   0x5   : > { %p322_p2 = scmp.lt.s32.totalorder %s2243_s11, 17 }
   0x6   : > { %s2827_s3 = smov (%p30_p0, %s29_s3), 0  ;;  %s2829_s12 = smov (!%p30_p0, %s32_s12), %s2239_s10 }
   0x7   : > { %p323_p3 = pnand %p1747_p1, %p322_p2  ;;  %p34_p4 = scmp.ge.s32.totalorder %s2829_s12, 2 }
   0x8   : > { %p384_p5 = scmp.lt.s32.totalorder (!%p323_p3), %s2231_s30, 1  ;;  %s1748_s13 = sshll.u32 (!%p323_p3), %s2227_s29, 4  ;;  %vm592_vm0 = vcmask (!%p323_p3), 15360   ;;  %vm1293_vm1 = vcmask (!%p323_p3), 1043456   ;;  %vm1268_vm2 = vcmask (!%p323_p3), 64512   ;;  %vm1594_vm3 = vcmask (!%p323_p3), 125952  }
   0x9   : > { %s2831_s12 = smov (%p34_p4, %s2829_s12), 0  ;;  %326 = sbr.rel (%p323_p3) target bundleno = 1119 (0x45f), region = 52 }
   0xa   : > { %p386_p6 = scmp.lt.s32.totalorder (!%p323_p3), %s1748_s13, 127 }
  0x10   : > { %s2833_s30 = smov (!%p384_p5, %s2231_s30), 1  ;;  %s2835_s13 = smov (!%p386_p6, %s1748_s13), 127 }
  0x11   : > { %s2324_s14 = sshll.u32 %s2833_s30, 7 }
  0x12   : > { %s2330_s17 = scalar_lea.vmem %s2818_s5, %s2324_s14  ;;  %s389_s18 = sadd.s32 %s2324_s14, %s2835_s13 }
  0x13   : > { %v2069_v1 = vld [vmem:[%s2330_s17 + $0x40] sm:$0xff]   ;;  %v2071_v3 = vld [vmem:[%s2330_s17 + $0x48] sm:$0xff]   ;;  %v2073_v7 = vld [vmem:[%s2330_s17 + $0x50] sm:$0xff]   ;;  %s2342_s19 = sshll.u32 %s389_s18, 2  ;;  %s2497_s25 = scalar_lea.vmem %s2819_s6, %s2324_s14 }
  0x14   : > { %v2070_v2 = vld [vmem:[%s2330_s17] sm:$0xff]   ;;  %2018 = vmatprep.subr.msk.bf16.mxu0 %vm592_vm0, %v2069_v1  ;;  %v2072_v5 = vld [vmem:[%s2330_s17 + $0x8] sm:$0xff]   ;;  %v2074_v8 = vld [vmem:[%s2330_s17 + $0x10] sm:$0xff]   ;;  %s2350_s22 = scalar_lea.vmem %s2817_s4, %s2342_s19  ;;  %s2690_s30 = scalar_lea.vmem %s2813_s0, %s2342_s19 }
  0x15   : > { %v618_v4 = vsel %vm592_vm0, %v2070_v2, 0  ;;  %v621_v6 = vsel %vm592_vm0, %v2072_v5, 0  ;;  %v2085_v9 = vld [vmem:[%s2350_s22] sm:$0xff]   ;;  %v624_v10 = vsel %vm592_vm0, %v2074_v8, 0  ;;  %v2075_v11 = vld [vmem:[%s2330_s17 + $0x58] sm:$0xff]   ;;  %v2079_v17 = vld [vmem:[%s2330_s17 + $0x68] sm:$0xff]   ;;  %s2723_s20 = scalar_lea.vmem %s2821_s8, %s2342_s19 }
  0x16   : > { %1896 = vmatpush3.bf16.xpose.msra.mxu0 %v618_v4  ;;  %1911 = vmatprep.mubr.msk.bf16.mxu0 %vm592_vm0, %v2085_v9  ;;  %v2076_v12 = vld [vmem:[%s2330_s17 + $0x18] sm:$0xff]   ;;  %v2077_v14 = vld [vmem:[%s2330_s17 + $0x60] sm:$0xff]   ;;  %v2080_v18 = vld [vmem:[%s2330_s17 + $0x28] sm:$0xff]  }
  0x17   : > { %2019 = vmatprep.subr.msk.bf16.mxu0 %vm592_vm0, %v2071_v3  ;;  %v627_v13 = vsel %vm592_vm0, %v2076_v12, 0  ;;  %v2078_v15 = vld [vmem:[%s2330_s17 + $0x20] sm:$0xff]   ;;  %v633_v19 = vsel %vm592_vm0, %v2080_v18, 0  ;;  %v2081_v20 = vld [vmem:[%s2330_s17 + $0x70] sm:$0xff]   ;;  %v2083_v23 = vld [vmem:[%s2330_s17 + $0x78] sm:$0xff]  }
  0x18   : > { %v630_v16 = vsel %vm592_vm0, %v2078_v15, 0  ;;  %v2082_v21 = vld [vmem:[%s2330_s17 + $0x30] sm:$0xff]   ;;  %v2084_v24 = vld [vmem:[%s2330_s17 + $0x38] sm:$0xff]   ;;  %v2086_v26 = vld [vmem:[%s2350_s22 + $0x8] sm:$0xff]  }
  0x19   : > { %v636_v22 = vsel %vm592_vm0, %v2082_v21, 0  ;;  %v639_v25 = vsel %vm592_vm0, %v2084_v24, 0  ;;  %v2087_v27 = vld [vmem:[%s2350_s22 + $0x10] sm:$0xff]   ;;  %v2088_v28 = vld [vmem:[%s2350_s22 + $0x18] sm:$0xff]   ;;  %v2089_v29 = vld [vmem:[%s2350_s22 + $0x20] sm:$0xff]  }
  0x1a   : > { %v2090_v30 = vld [vmem:[%s2350_s22 + $0x28] sm:$0xff]   ;;  %v2091_v31 = vld [vmem:[%s2350_s22 + $0x30] sm:$0xff]   ;;  %v2092_v32 = vld [vmem:[%s2350_s22 + $0x38] sm:$0xff]  }
  0x1b   : > { %v2094_v18 = vld [vmem:[%s2497_s25] sm:$0xff]   ;;  %v2097_v21 = vld [vmem:[%s2497_s25 + $0x50] sm:$0xff]  }
  0x1e   : > { %1898 = vmatpush3.bf16.xpose.msra.mxu0 %v621_v6 }
  0x1f   : > { %2020 = vmatprep.subr.msk.bf16.mxu0 %vm592_vm0, %v2073_v7 }
  0x26   : > { %1900 = vmatpush3.bf16.xpose.msra.mxu0 %v624_v10 }
  0x27   : > { %2021 = vmatprep.subr.msk.bf16.mxu0 %vm592_vm0, %v2075_v11 }
  0x2e   : > { %1902 = vmatpush3.bf16.xpose.msra.mxu0 %v627_v13 }
  0x2f   : > { %2022 = vmatprep.subr.msk.bf16.mxu0 %vm592_vm0, %v2077_v14 }
  0x36   : > { %1904 = vmatpush3.bf16.xpose.msra.mxu0 %v630_v16 }
  0x37   : > { %2023 = vmatprep.subr.msk.bf16.mxu0 %vm592_vm0, %v2079_v17  ;;  %v2093_v17 = vld [vmem:[%s2497_s25 + $0x40] sm:$0xff]  }
  0x38   : > { %1927 = vmatprep.subr.bf16.mxu1 %v2093_v17 }
  0x39   : > { %1928 = vmatpush3.bf16.msra.mxu1 %v2094_v18 }
  0x3e   : > { %1906 = vmatpush3.bf16.xpose.msra.mxu0 %v633_v19  ;;  %v2095_v19 = vld [vmem:[%s2497_s25 + $0x48] sm:$0xff]  }
  0x3f   : > { %2024 = vmatprep.subr.msk.bf16.mxu0 %vm592_vm0, %v2081_v20  ;;  %v2096_v20 = vld [vmem:[%s2497_s25 + $0x8] sm:$0xff]   ;;  %1929 = vmatprep.subr.bf16.mxu1 %v2095_v19 }
  0x40   : > { %1930 = vmatpush3.bf16.msra.mxu1 %v2096_v20 }
  0x41   : > { %1931 = vmatprep.subr.bf16.mxu1 %v2097_v21 }
  0x46   : > { %1908 = vmatpush3.bf16.xpose.msra.mxu0 %v636_v22  ;;  %v2098_v22 = vld [vmem:[%s2497_s25 + $0x10] sm:$0xff]  }
  0x47   : > { %2025 = vmatprep.subr.msk.bf16.mxu0 %vm592_vm0, %v2083_v23  ;;  %1932 = vmatpush3.bf16.msra.mxu1 %v2098_v22 }
  0x4e   : > { %1910 = vmatpush3.bf16.xpose.msra.mxu0 %v639_v25 }
  0x55   : > { %1912 = vmatmul.mubr.msk.bf16.vlgmr.msra.gmra.mrb[0].mxu0 %vm592_vm0, %v2085_v9 }
  0x56   : > { %1913 = vmatprep.mubr.msk.bf16.mxu0 %vm592_vm0, %v2086_v26 }
  0x5d   : > { %1914 = vmatmul.mubr.msk.bf16.gmra.mrb[4].mxu0 %vm592_vm0, %v2086_v26 }
  0x5e   : > { %1915 = vmatprep.mubr.msk.bf16.mxu0 %vm592_vm0, %v2087_v27 }
  0x65   : > { %1916 = vmatmul.mubr.msk.bf16.gmra.mrb[8].mxu0 %vm592_vm0, %v2087_v27 }
  0x66   : > { %1917 = vmatprep.mubr.msk.bf16.mxu0 %vm592_vm0, %v2088_v28 }
  0x6d   : > { %1918 = vmatmul.mubr.msk.bf16.gmra.mrb[12].mxu0 %vm592_vm0, %v2088_v28 }
  0x6e   : > { %1919 = vmatprep.mubr.msk.bf16.mxu0 %vm592_vm0, %v2089_v29 }
  0x75   : > { %1920 = vmatmul.mubr.msk.bf16.gmra.mrb[16].mxu0 %vm592_vm0, %v2089_v29 }
  0x76   : > { %1921 = vmatprep.mubr.msk.bf16.mxu0 %vm592_vm0, %v2090_v30 }
  0x7d   : > { %1922 = vmatmul.mubr.msk.bf16.gmra.mrb[20].mxu0 %vm592_vm0, %v2090_v30 }
  0x7e   : > { %1923 = vmatprep.mubr.msk.bf16.mxu0 %vm592_vm0, %v2091_v31 }
  0x85   : > { %1924 = vmatmul.mubr.msk.bf16.gmra.mrb[24].mxu0 %vm592_vm0, %v2091_v31 }
  0x86   : > { %1925 = vmatprep.mubr.msk.bf16.mxu0 %vm592_vm0, %v2092_v32 }
  0x8d   : > { %1926 = vmatmul.mubr.msk.bf16.gmra.mrb[28].mxu0 %vm592_vm0, %v2092_v32 }
 0x128   : > { %v2397_v33 = vpop.f32.mrb[0].mxu0 }
 0x129   : > { %v2399_v34 = vpop.f32.mrb[1].mxu0 }
 0x12a   : > { %v2401_v35 = vpop.f32.mrb[2].mxu0  ;;  %v778_v36 = vmax.f32 %v2397_v33, %v2399_v34 }
 0x12b   : > { %v2405_v37 = vpop.f32.mrb[3].mxu0 }
 0x12c   : > { %779 = vmax.xlane.f32.xlu0 %v778_v36  ;;  %v781_v38 = vmax.f32 %v2401_v35, %v2405_v37 }
 0x130   : > { %782 = vmax.xlane.f32.xlu0 %v781_v38  ;;  %v2409_v39 = vpop.f32.mrb[4].mxu0 }
 0x131   : > { %v2411_v40 = vpop.f32.mrb[5].mxu0 }
 0x132   : > { %v2413_v41 = vpop.f32.mrb[6].mxu0  ;;  %v784_v42 = vmax.f32 %v2409_v39, %v2411_v40 }
 0x133   : > { %v2417_v43 = vpop.f32.mrb[7].mxu0 }
 0x134   : > { %785 = vmax.xlane.f32.xlu1 %v784_v42  ;;  %v787_v44 = vmax.f32 %v2413_v41, %v2417_v43 }
 0x138   : > { %788 = vmax.xlane.f32.xlu1 %v787_v44  ;;  %v2421_v45 = vpop.f32.mrb[8].mxu0 }
 0x139   : > { %v2423_v46 = vpop.f32.mrb[9].mxu0 }
 0x13a   : > { %v2425_v47 = vpop.f32.mrb[10].mxu0  ;;  %v790_v48 = vmax.f32 %v2421_v45, %v2423_v46 }
 0x13b   : > { %v2429_v49 = vpop.f32.mrb[11].mxu0 }
 0x13c   : > { %791 = vmax.xlane.f32.xlu0 %v790_v48  ;;  %v793_v50 = vmax.f32 %v2425_v47, %v2429_v49 }
 0x13e   : > { %794 = vmax.xlane.f32.xlu1 %v793_v50 }
 0x140   : > { %v2433_v51 = vpop.f32.mrb[12].mxu0 }
 0x141   : > { %v2435_v52 = vpop.f32.mrb[13].mxu0 }
 0x142   : > { %v2437_v53 = vpop.f32.mrb[14].mxu0  ;;  %v796_v54 = vmax.f32 %v2433_v51, %v2435_v52 }
 0x143   : > { %v2441_v55 = vpop.f32.mrb[15].mxu0 }
 0x144   : > { %797 = vmax.xlane.f32.xlu0 %v796_v54  ;;  %v799_v56 = vmax.f32 %v2437_v53, %v2441_v55 }
 0x146   : > { %800 = vmax.xlane.f32.xlu1 %v799_v56 }
 0x148   : > { %v2445_v57 = vpop.f32.mrb[16].mxu0 }
 0x149   : > { %v2447_v58 = vpop.f32.mrb[17].mxu0 }
 0x14a   : > { %v2449_v59 = vpop.f32.mrb[18].mxu0  ;;  %v802_v60 = vmax.f32 %v2445_v57, %v2447_v58 }
 0x14b   : > { %v2453_v61 = vpop.f32.mrb[19].mxu0 }
 0x14c   : > { %803 = vmax.xlane.f32.xlu0 %v802_v60  ;;  %v805_v62 = vmax.f32 %v2449_v59, %v2453_v61 }
 0x14e   : > { %806 = vmax.xlane.f32.xlu1 %v805_v62 }
 0x150   : > { %v2457_v63 = vpop.f32.mrb[20].mxu0 }
 0x151   : > { %v2459_v0 = vpop.f32.mrb[21].mxu0 }
 0x152   : > { %v2461_v1 = vpop.f32.mrb[22].mxu0  ;;  %v808_v2 = vmax.f32 %v2457_v63, %v2459_v0 }
 0x153   : > { %v2465_v3 = vpop.f32.mrb[23].mxu0 }
 0x154   : > { %809 = vmax.xlane.f32.xlu0 %v808_v2  ;;  %v811_v4 = vmax.f32 %v2461_v1, %v2465_v3 }
 0x156   : > { %812 = vmax.xlane.f32.xlu1 %v811_v4 }
 0x158   : > { %v2469_v5 = vpop.f32.mrb[24].mxu0 }
 0x159   : > { %v2471_v6 = vpop.f32.mrb[25].mxu0 }
 0x15a   : > { %v2473_v7 = vpop.f32.mrb[26].mxu0  ;;  %v814_v8 = vmax.f32 %v2469_v5, %v2471_v6 }
 0x15b   : > { %v2477_v9 = vpop.f32.mrb[27].mxu0 }
 0x15c   : > { %815 = vmax.xlane.f32.xlu0 %v814_v8  ;;  %v817_v10 = vmax.f32 %v2473_v7, %v2477_v9 }
 0x15e   : > { %818 = vmax.xlane.f32.xlu1 %v817_v10 }
 0x160   : > { %v2481_v11 = vpop.f32.mrb[28].mxu0 }
 0x161   : > { %v2483_v12 = vpop.f32.mrb[29].mxu0 }
 0x162   : > { %v2485_v13 = vpop.f32.mrb[30].mxu0  ;;  %v820_v14 = vmax.f32 %v2481_v11, %v2483_v12 }
 0x163   : > { %v2489_v15 = vpop.f32.mrb[31].mxu0 }
 0x164   : > { %v823_v16 = vmax.f32 %v2485_v13, %v2489_v15  ;;  %821 = vmax.xlane.f32.xlu0 %v820_v14 }
 0x166   : > { %824 = vmax.xlane.f32.xlu1 %v823_v16 }
 0x1b9   : > { %v780_v23 = vpop.xlane.xlu0 %779 }
 0x1ba   : > { %v826_v24 = vsub.f32 %v2397_v33, %v780_v23  ;;  %v827_v25 = vsub.f32 %v2399_v34, %v780_v23 }
 0x1bc   : > { %v858_v26 = vmul.f32 1.442695, %v826_v24  ;;  %v860_v27 = vmul.f32 1.442695, %v827_v25 }
 0x1bd   : > { %v783_v28 = vpop.xlane.xlu0 %782 }
 0x1be   : > { %2109 = vpow2.f32 %v858_v26  ;;  %v828_v29 = vsub.f32 %v2401_v35, %v783_v28  ;;  %v829_v30 = vsub.f32 %v2405_v37, %v783_v28 }
 0x1bf   : > { %2111 = vpow2.f32 %v860_v27 }
 0x1c0   : > { %v862_v31 = vmul.f32 1.442695, %v828_v29  ;;  %v864_v32 = vmul.f32 1.442695, %v829_v30 }
 0x1c1   : > { %v786_v36 = vpop.xlane.xlu1 %785 }
 0x1c2   : > { %2113 = vpow2.f32 %v862_v31  ;;  %v830_v38 = vsub.f32 %v2409_v39, %v786_v36  ;;  %v831_v42 = vsub.f32 %v2411_v40, %v786_v36 }
 0x1c3   : > { %2115 = vpow2.f32 %v864_v32 }
 0x1c4   : > { %v866_v33 = vmul.f32 1.442695, %v830_v38  ;;  %v868_v34 = vmul.f32 1.442695, %v831_v42  ;;  %v2100_v42 = vld [vmem:[%s2497_s25 + $0x18] sm:$0xff]  }
 0x1c5   : > { %v789_v44 = vpop.xlane.xlu1 %788 }
 0x1c6   : > { %2117 = vpow2.f32 %v866_v33  ;;  %v832_v48 = vsub.f32 %v2413_v41, %v789_v44  ;;  %v833_v35 = vsub.f32 %v2417_v43, %v789_v44 }
 0x1c7   : > { %2119 = vpow2.f32 %v868_v34 }
 0x1c8   : > { %v2513_v37 = vpop.eup %2109  ;;  %v870_v50 = vmul.f32 1.442695, %v832_v48  ;;  %v872_v54 = vmul.f32 1.442695, %v833_v35 }
 0x1c9   : > { %v2515_v56 = vpop.eup %2111  ;;  %v792_v60 = vpop.xlane.xlu0 %791 }
 0x1ca   : > { %2121 = vpow2.f32 %v870_v50  ;;  %v834_v39 = vsub.f32 %v2421_v45, %v792_v60  ;;  %v835_v40 = vsub.f32 %v2423_v46, %v792_v60  ;;  %v922_v62 = vadd.f32 %v2515_v56, %v2513_v37 }
 0x1cb   : > { %2123 = vpow2.f32 %v872_v54  ;;  %v795_v41 = vpop.xlane.xlu1 %794 }
 0x1cc   : > { %v2521_v2 = vpop.eup %2113  ;;  %v874_v43 = vmul.f32 1.442695, %v834_v39  ;;  %v876_v4 = vmul.f32 1.442695, %v835_v40  ;;  %v836_v8 = vsub.f32 %v2425_v47, %v795_v41  ;;  %v837_v10 = vsub.f32 %v2429_v49, %v795_v41  ;;  %923 = vadd.xlane.f32.xlu0 %v922_v62  ;;  %v2102_v39 = vld [vmem:[%s2497_s25 + $0x20] sm:$0xff]   ;;  %v2103_v62 = vld [vmem:[%s2497_s25 + $0x68] sm:$0xff]  }
 0x1cd   : > { %v2525_v14 = vpop.eup %2115 }
 0x1ce   : > { %2125 = vpow2.f32 %v874_v43  ;;  %v878_v45 = vmul.f32 1.442695, %v836_v8  ;;  %v880_v16 = vmul.f32 1.442695, %v837_v10  ;;  %v925_v46 = vadd.f32 %v2525_v14, %v2521_v2  ;;  %v2104_v10 = vld [vmem:[%s2497_s25 + $0x28] sm:$0xff]  }
 0x1cf   : > { %2127 = vpow2.f32 %v876_v4 }
 0x1d0   : > { %v2529_v17 = vpop.eup %2117  ;;  %2129 = vpow2.f32 %v878_v45  ;;  %926 = vadd.xlane.f32.xlu1 %v925_v46 }
 0x1d1   : > { %v2531_v18 = vpop.eup %2119  ;;  %2131 = vpow2.f32 %v880_v16  ;;  %v798_v47 = vpop.xlane.xlu0 %797 }
 0x1d2   : > { %v838_v49 = vsub.f32 %v2433_v51, %v798_v47  ;;  %v839_v19 = vsub.f32 %v2435_v52, %v798_v47  ;;  %v928_v20 = vadd.f32 %v2531_v18, %v2529_v17 }
 0x1d3   : > { %v801_v21 = vpop.xlane.xlu1 %800 }
 0x1d4   : > { %v2537_v22 = vpop.eup %2121  ;;  %v882_v23 = vmul.f32 1.442695, %v838_v49  ;;  %v884_v24 = vmul.f32 1.442695, %v839_v19  ;;  %v840_v25 = vsub.f32 %v2437_v53, %v801_v21  ;;  %v841_v26 = vsub.f32 %v2441_v55, %v801_v21  ;;  %929 = vadd.xlane.f32.xlu0 %v928_v20  ;;  %v2099_v55 = vld [vmem:[%s2497_s25 + $0x58] sm:$0xff]  }
 0x1d5   : > { %v2541_v27 = vpop.eup %2123  ;;  %1933 = vmatprep.subr.bf16.mxu1 %v2099_v55 }
 0x1d6   : > { %2133 = vpow2.f32 %v882_v23  ;;  %v886_v51 = vmul.f32 1.442695, %v840_v25  ;;  %v888_v52 = vmul.f32 1.442695, %v841_v26  ;;  %v931_v28 = vadd.f32 %v2541_v27, %v2537_v22  ;;  %1934 = vmatpush3.bf16.msra.mxu1 %v2100_v42  ;;  %v2106_v23 = vld [vmem:[%s2497_s25 + $0x30] sm:$0xff]   ;;  %v2107_v25 = vld [vmem:[%s2497_s25 + $0x78] sm:$0xff]  }
 0x1d7   : > { %2135 = vpow2.f32 %v884_v24 }
 0x1d8   : > { %v2545_v29 = vpop.eup %2125  ;;  %2137 = vpow2.f32 %v886_v51  ;;  %932 = vadd.xlane.f32.xlu1 %v931_v28 }
 0x1d9   : > { %v2547_v30 = vpop.eup %2127  ;;  %2139 = vpow2.f32 %v888_v52  ;;  %v804_v53 = vpop.xlane.xlu0 %803 }
 0x1da   : > { %v2550_v31 = vpop.eup %2129  ;;  %v842_v32 = vsub.f32 %v2445_v57, %v804_v53  ;;  %v843_v36 = vsub.f32 %v2447_v58, %v804_v53  ;;  %v934_v38 = vadd.f32 %v2547_v30, %v2545_v29  ;;  %v2101_v58 = vld [vmem:[%s2497_s25 + $0x60] sm:$0xff]   ;;  %v2108_v53 = vld [vmem:[%s2497_s25 + $0x38] sm:$0xff]  }
 0x1db   : > { %v2557_v33 = vpop.eup %2131  ;;  %v807_v34 = vpop.xlane.xlu1 %806  ;;  %1935 = vmatprep.subr.bf16.mxu1 %v2101_v58 }
 0x1dc   : > { %v890_v44 = vmul.f32 1.442695, %v842_v32  ;;  %v892_v48 = vmul.f32 1.442695, %v843_v36  ;;  %v844_v35 = vsub.f32 %v2449_v59, %v807_v34  ;;  %v845_v50 = vsub.f32 %v2453_v61, %v807_v34  ;;  %935 = vadd.xlane.f32.xlu0 %v934_v38  ;;  %1936 = vmatpush3.bf16.msra.mxu1 %v2102_v39 }
 0x1dd   : > { %v937_v57 = vadd.f32 %v2557_v33, %v2550_v31  ;;  %1937 = vmatprep.subr.bf16.mxu1 %v2103_v62 }
 0x1de   : > { %2141 = vpow2.f32 %v890_v44  ;;  %v894_v54 = vmul.f32 1.442695, %v844_v35  ;;  %v896_v60 = vmul.f32 1.442695, %v845_v50 }
 0x1df   : > { %2143 = vpow2.f32 %v892_v48  ;;  %938 = vadd.xlane.f32.xlu1 %v937_v57 }
 0x1e0   : > { %v2565_v40 = vpop.eup %2133  ;;  %2145 = vpow2.f32 %v894_v54  ;;  %1938 = vmatpush3.bf16.msra.mxu1 %v2104_v10 }
 0x1e1   : > { %v2567_v59 = vpop.eup %2135  ;;  %2147 = vpow2.f32 %v896_v60  ;;  %v810_v61 = vpop.xlane.xlu0 %809 }
 0x1e2   : > { %v2570_v41 = vpop.eup %2137  ;;  %v846_v43 = vsub.f32 %v2457_v63, %v810_v61  ;;  %v847_v4 = vsub.f32 %v2459_v0, %v810_v61  ;;  %v940_v8 = vadd.f32 %v2567_v59, %v2565_v40  ;;  %v2105_v0 = vld [vmem:[%s2497_s25 + $0x70] sm:$0xff]  }
 0x1e3   : > { %v2577_v45 = vpop.eup %2139  ;;  %v813_v16 = vpop.xlane.xlu1 %812  ;;  %1939 = vmatprep.subr.bf16.mxu1 %v2105_v0 }
 0x1e4   : > { %v898_v46 = vmul.f32 1.442695, %v846_v43  ;;  %v900_v47 = vmul.f32 1.442695, %v847_v4  ;;  %v848_v49 = vsub.f32 %v2461_v1, %v813_v16  ;;  %v849_v19 = vsub.f32 %v2465_v3, %v813_v16  ;;  %941 = vadd.xlane.f32.xlu0 %v940_v8  ;;  %1940 = vmatpush3.bf16.msra.mxu1 %v2106_v23 }
 0x1e5   : > { %v943_v63 = vadd.f32 %v2577_v45, %v2570_v41  ;;  %1941 = vmatprep.subr.bf16.mxu1 %v2107_v25 }
 0x1e6   : > { %2149 = vpow2.f32 %v898_v46  ;;  %v902_v20 = vmul.f32 1.442695, %v848_v49  ;;  %v904_v21 = vmul.f32 1.442695, %v849_v19 }
 0x1e7   : > { %2151 = vpow2.f32 %v900_v47  ;;  %944 = vadd.xlane.f32.xlu1 %v943_v63 }
 0x1e8   : > { %v2585_v24 = vpop.eup %2141  ;;  %2153 = vpow2.f32 %v902_v20  ;;  %1942 = vmatpush3.bf16.msra.mxu1 %v2108_v53 }
 0x1e9   : > { %v2587_v1 = vpop.eup %2143  ;;  %2155 = vpow2.f32 %v904_v21  ;;  %v816_v3 = vpop.xlane.xlu0 %815  ;;  %v1267_v21 = vld [vmem:[%s2820_s7] sm:$0xf] }
 0x1ea   : > { %v2590_v26 = vpop.eup %2145  ;;  %v850_v51 = vsub.f32 %v2469_v5, %v816_v3  ;;  %v851_v52 = vsub.f32 %v2471_v6, %v816_v3  ;;  %v946_v28 = vadd.f32 %v2587_v1, %v2585_v24  ;;  %2026 = vmatprep.subr.msk.bf16.mxu1 %vm1293_vm1, %v1267_v21  ;;  %v1295_v23 = vsel %vm1293_vm1, %v1267_v21, 0 }
 0x1eb   : > { %v2597_v55 = vpop.eup %2147  ;;  %v819_v32 = vpop.xlane.xlu1 %818 }
 0x1ec   : > { %v906_v36 = vmul.f32 1.442695, %v850_v51  ;;  %v908_v38 = vmul.f32 1.442695, %v851_v52  ;;  %v852_v42 = vsub.f32 %v2473_v7, %v819_v32  ;;  %v853_v34 = vsub.f32 %v2477_v9, %v819_v32  ;;  %947 = vadd.xlane.f32.xlu0 %v946_v28 }
 0x1ed   : > { %v949_v5 = vadd.f32 %v2597_v55, %v2590_v26 }
 0x1ee   : > { %2157 = vpow2.f32 %v906_v36  ;;  %v910_v6 = vmul.f32 1.442695, %v852_v42  ;;  %v912_v44 = vmul.f32 1.442695, %v853_v34 }
 0x1ef   : > { %2159 = vpow2.f32 %v908_v38  ;;  %950 = vadd.xlane.f32.xlu1 %v949_v5 }
 0x1f0   : > { %v2603_v48 = vpop.eup %2149  ;;  %2161 = vpow2.f32 %v910_v6 }
 0x1f1   : > { %v2605_v35 = vpop.eup %2151  ;;  %2163 = vpow2.f32 %v912_v44  ;;  %v822_v50 = vpop.xlane.xlu0 %821 }
 0x1f2   : > { %v2607_v7 = vpop.eup %2153  ;;  %v854_v9 = vsub.f32 %v2481_v11, %v822_v50  ;;  %v855_v57 = vsub.f32 %v2483_v12, %v822_v50  ;;  %v952_v58 = vadd.f32 %v2605_v35, %v2603_v48 }
 0x1f3   : > { %v2613_v54 = vpop.eup %2155  ;;  %v825_v60 = vpop.xlane.xlu1 %824 }
 0x1f4   : > { %v914_v39 = vmul.f32 1.442695, %v854_v9  ;;  %v916_v61 = vmul.f32 1.442695, %v855_v57  ;;  %953 = vadd.xlane.f32.xlu0 %v952_v58  ;;  %v856_v62 = vsub.f32 %v2485_v13, %v825_v60  ;;  %v857_v43 = vsub.f32 %v2489_v15, %v825_v60 }
 0x1f5   : > { %v955_v4 = vadd.f32 %v2613_v54, %v2607_v7 }
 0x1f6   : > { %2165 = vpow2.f32 %v914_v39  ;;  %v918_v11 = vmul.f32 1.442695, %v856_v62  ;;  %v920_v8 = vmul.f32 1.442695, %v857_v43 }
 0x1f7   : > { %2167 = vpow2.f32 %v916_v61  ;;  %956 = vadd.xlane.f32.xlu1 %v955_v4 }
 0x1f8   : > { %v2619_v12 = vpop.eup %2157  ;;  %2169 = vpow2.f32 %v918_v11 }
 0x1f9   : > { %v2621_v10 = vpop.eup %2159  ;;  %2171 = vpow2.f32 %v920_v8 }
 0x1fa   : > { %v2623_v16 = vpop.eup %2161  ;;  %v958_v13 = vadd.f32 %v2621_v10, %v2619_v12 }
 0x1fb   : > { %v2627_v15 = vpop.eup %2163 }
 0x1fc   : > { %959 = vadd.xlane.f32.xlu0 %v958_v13  ;;  %v961_v46 = vadd.f32 %v2627_v15, %v2623_v16 }
 0x1fe   : > { %962 = vadd.xlane.f32.xlu1 %v961_v46 }
 0x200   : > { %v2631_v47 = vpop.eup %2165 }
 0x201   : > { %v2633_v49 = vpop.eup %2167 }
 0x202   : > { %v2635_v19 = vpop.eup %2169  ;;  %v964_v63 = vadd.f32 %v2633_v49, %v2631_v47 }
 0x203   : > { %v2639_v0 = vpop.eup %2171 }
 0x204   : > { %965 = vadd.xlane.f32.xlu0 %v964_v63  ;;  %v967_v20 = vadd.f32 %v2639_v0, %v2635_v19 }
 0x206   : > { %968 = vadd.xlane.f32.xlu1 %v967_v20 }
 0x259   : > { %v924_v3 = vpop.xlane.xlu0 %923 }
 0x25a   : > { %2173 = vrcp.f32 %v924_v3 }
 0x25d   : > { %v927_v25 = vpop.xlane.xlu1 %926 }
 0x25e   : > { %2175 = vrcp.f32 %v927_v25 }
 0x261   : > { %v930_v51 = vpop.xlane.xlu0 %929 }
 0x262   : > { %2177 = vrcp.f32 %v930_v51 }
 0x264   : > { %v2174_v28 = vpop.eup %2173 }
 0x265   : > { %v933_v52 = vpop.xlane.xlu1 %932  ;;  %v972_v36 = vmul.f32 %v2174_v28, %v2515_v56  ;;  %v971_v42 = vmul.f32 %v2174_v28, %v2513_v37 }
 0x266   : > { %2179 = vrcp.f32 %v933_v52 }
 0x268   : > { %v2176_v53 = vpop.eup %2175 }
 0x269   : > { %v936_v32 = vpop.xlane.xlu0 %935  ;;  %v975_v38 = vmul.f32 %v2176_v53, %v2525_v14  ;;  %v974_v34 = vmul.f32 %v2176_v53, %v2521_v2 }
 0x26a   : > { %2181 = vrcp.f32 %v936_v32 }
 0x26b   : > { %v1019_v5 = vpack.c.bf16 %v975_v38, %v972_v36  ;;  %v1018_v6 = vpack.c.bf16 %v974_v34, %v971_v42 }
 0x26c   : > { %v939_v44 = vpop.xlane.xlu1 %938  ;;  %v2178_v50 = vpop.eup %2177 }
 0x26d   : > { %2183 = vrcp.f32 %v939_v44  ;;  %1194 = vmatprep.mubr.bf16.mxu1 %v1019_v5  ;;  %v978_v58 = vmul.f32 %v2178_v50, %v2531_v18  ;;  %v977_v14 = vmul.f32 %v2178_v50, %v2529_v17 }
 0x26e   : > { %1195 = vmatmul.mubr.bf16.vlgmr.msra.gmra.mrb[0].mxu1 %v1018_v6 }
 0x26f   : > { %2001 = vmatpush3.bf16.msra.mxu1 %v1295_v23 }
 0x270   : > { %v2180_v9 = vpop.eup %2179 }
 0x271   : > { %v942_v57 = vpop.xlane.xlu0 %941  ;;  %v981_v56 = vmul.f32 %v2180_v9, %v2541_v27  ;;  %v980_v37 = vmul.f32 %v2180_v9, %v2537_v22 }
 0x272   : > { %2185 = vrcp.f32 %v942_v57 }
 0x273   : > { %v1021_v2 = vpack.c.bf16 %v981_v56, %v978_v58  ;;  %v1020_v60 = vpack.c.bf16 %v980_v37, %v977_v14 }
 0x274   : > { %v945_v39 = vpop.xlane.xlu1 %944  ;;  %v2182_v61 = vpop.eup %2181 }
 0x275   : > { %2187 = vrcp.f32 %v945_v39  ;;  %1202 = vmatprep.mubr.bf16.mxu1 %v1021_v2  ;;  %v984_v43 = vmul.f32 %v2182_v61, %v2547_v30  ;;  %v983_v17 = vmul.f32 %v2182_v61, %v2545_v29 }
 0x276   : > { %1203 = vmatmul.mubr.bf16.gmra.mrb[4].mxu1 %v1020_v60  ;;  %v2245_v60 = vmov 0  }
 0x277   : > { %v2184_v62 = vpop.eup %2183  ;;  %2068 = vset.pattern.permute.xlu0 %v2245_v60 }
 0x278   : > { %v987_v4 = vmul.f32 %v2184_v62, %v2557_v33  ;;  %v986_v18 = vmul.f32 %v2184_v62, %v2550_v31 }
 0x279   : > { %v948_v27 = vpop.xlane.xlu0 %947 }
 0x27a   : > { %v1023_v11 = vpack.c.bf16 %v987_v4, %v984_v43  ;;  %2189 = vrcp.f32 %v948_v27  ;;  %v1022_v8 = vpack.c.bf16 %v986_v18, %v983_v17 }
 0x27c   : > { %1210 = vmatprep.mubr.bf16.mxu1 %v1023_v11  ;;  %v951_v22 = vpop.xlane.xlu1 %950  ;;  %v2186_v13 = vpop.eup %2185 }
 0x27d   : > { %2191 = vrcp.f32 %v951_v22  ;;  %v990_v63 = vmul.f32 %v2186_v13, %v2567_v59  ;;  %v989_v21 = vmul.f32 %v2186_v13, %v2565_v40 }
 0x27e   : > { %1211 = vmatmul.mubr.bf16.gmra.mrb[8].mxu1 %v1022_v8 }
 0x27f   : > { %v2188_v46 = vpop.eup %2187 }
 0x280   : > { %v993_v30 = vmul.f32 %v2188_v46, %v2577_v45  ;;  %v992_v33 = vmul.f32 %v2188_v46, %v2570_v41 }
 0x281   : > { %v954_v20 = vpop.xlane.xlu0 %953 }
 0x282   : > { %v1025_v31 = vpack.c.bf16 %v993_v30, %v990_v63  ;;  %2193 = vrcp.f32 %v954_v20  ;;  %v1024_v23 = vpack.c.bf16 %v992_v33, %v989_v21 }
 0x284   : > { %1218 = vmatprep.mubr.bf16.mxu1 %v1025_v31  ;;  %v957_v29 = vpop.xlane.xlu1 %956  ;;  %v2190_v3 = vpop.eup %2189 }
 0x285   : > { %2195 = vrcp.f32 %v957_v29  ;;  %v996_v51 = vmul.f32 %v2190_v3, %v2587_v1  ;;  %v995_v28 = vmul.f32 %v2190_v3, %v2585_v24 }
 0x286   : > { %1219 = vmatmul.mubr.bf16.gmra.mrb[12].mxu1 %v1024_v23 }
 0x287   : > { %v2192_v25 = vpop.eup %2191 }
 0x288   : > { %v999_v59 = vmul.f32 %v2192_v25, %v2597_v55  ;;  %v998_v45 = vmul.f32 %v2192_v25, %v2590_v26 }
 0x289   : > { %v960_v52 = vpop.xlane.xlu0 %959 }
 0x28a   : > { %2197 = vrcp.f32 %v960_v52  ;;  %v1027_v41 = vpack.c.bf16 %v999_v59, %v996_v51  ;;  %v1026_v53 = vpack.c.bf16 %v998_v45, %v995_v28 }
 0x28b   : > { %v963_v40 = vpop.xlane.xlu1 %962 }
 0x28c   : > { %1226 = vmatprep.mubr.bf16.mxu1 %v1027_v41  ;;  %2199 = vrcp.f32 %v963_v40  ;;  %v2194_v32 = vpop.eup %2193 }
 0x28d   : > { %v1002_v38 = vmul.f32 %v2194_v32, %v2605_v35  ;;  %v1001_v34 = vmul.f32 %v2194_v32, %v2603_v48 }
 0x28e   : > { %1227 = vmatmul.mubr.bf16.gmra.mrb[16].mxu1 %v1026_v53 }
 0x28f   : > { %v2196_v36 = vpop.eup %2195 }
 0x290   : > { %v1005_v1 = vmul.f32 %v2196_v36, %v2613_v54  ;;  %v1004_v55 = vmul.f32 %v2196_v36, %v2607_v7 }
 0x291   : > { %v966_v42 = vpop.xlane.xlu0 %965 }
 0x292   : > { %2201 = vrcp.f32 %v966_v42  ;;  %v1029_v26 = vpack.c.bf16 %v1005_v1, %v1002_v38  ;;  %v1028_v6 = vpack.c.bf16 %v1004_v55, %v1001_v34 }
 0x293   : > { %v969_v5 = vpop.xlane.xlu1 %968 }
 0x294   : > { %v2198_v24 = vpop.eup %2197  ;;  %1234 = vmatprep.mubr.bf16.mxu1 %v1029_v26  ;;  %2203 = vrcp.f32 %v969_v5 }
 0x295   : > { %v1008_v50 = vmul.f32 %v2198_v24, %v2621_v10  ;;  %v1007_v7 = vmul.f32 %v2198_v24, %v2619_v12 }
 0x296   : > { %v2200_v44 = vpop.eup %2199  ;;  %1235 = vmatmul.mubr.bf16.gmra.mrb[20].mxu1 %v1028_v6 }
 0x297   : > { %v1011_v35 = vmul.f32 %v2200_v44, %v2627_v15  ;;  %v1010_v54 = vmul.f32 %v2200_v44, %v2623_v16  ;;  %v1819_v16 = vld [vmem:[#allocation2] ss:$0 sm:$0xff] }
 0x298   : > { %1495 = vperm.xlu0 %2068, %v1819_v16  }
 0x299   : > { %v1031_v9 = vpack.c.bf16 %v1011_v35, %v1008_v50  ;;  %v1030_v58 = vpack.c.bf16 %v1010_v54, %v1007_v7 }
 0x29b   : > { %1242 = vmatprep.mubr.bf16.mxu1 %v1031_v9 }
 0x29c   : > { %v2202_v57 = vpop.eup %2201 }
 0x29d   : > { %v1014_v56 = vmul.f32 %v2202_v57, %v2633_v49  ;;  %v1013_v10 = vmul.f32 %v2202_v57, %v2631_v47 }
 0x29e   : > { %v2204_v48 = vpop.eup %2203  ;;  %1243 = vmatmul.mubr.bf16.gmra.mrb[24].mxu1 %v1030_v58 }
 0x29f   : > { %v1017_v14 = vmul.f32 %v2204_v48, %v2639_v0  ;;  %v1016_v37 = vmul.f32 %v2204_v48, %v2635_v19 }
 0x2a1   : > { %v1033_v2 = vpack.c.bf16 %v1017_v14, %v1014_v56  ;;  %v1032_v15 = vpack.c.bf16 %v1016_v37, %v1013_v10  ;;  %v1888_v56 = vld [vmem:[%s2690_s30 + $0x8] sm:$0xff]   ;;  %v1857_v14 = vld [vmem:[%s2690_s30] sm:$0xff]  }
 0x2a2   : > { %v1862_v37 = vunpack.c.l.bf16 %v1888_v56  ;;  %v1858_v10 = vunpack.c.l.bf16 %v1857_v14  ;;  %v1859_v16 = vunpack.c.h.bf16 %v1857_v14 }
 0x2a3   : > { %1250 = vmatprep.mubr.bf16.mxu1 %v1033_v2  ;;  %v2697_v2 = vld [vmem:[%s2814_s1] ss:$0 sm:$0xff] }
 0x2a4   : > { %v1435_v60 = vmul.f32 %v1862_v37, %v2697_v2 }
 0x2a6   : > { %1251 = vmatmul.mubr.bf16.gmra.mrb[28].mxu1 %v1032_v15  ;;  %v1863_v15 = vunpack.c.h.bf16 %v1888_v56 }
 0x341   : > { %v1943_v12 = vpop.f32.mrb[0].mxu1 }
 0x342   : > { %v1944_v39 = vpop.f32.mrb[1].mxu1 }
 0x343   : > { %v1945_v61 = vadd.f32 %v1944_v39, %v1943_v12  ;;  %v1946_v62 = vpop.f32.mrb[2].mxu1  ;;  %v2703_v12 = vld [vmem:[%s2815_s2] ss:$0 sm:$0xff]  ;;  %v1433_v39 = vmul.f32 %v1858_v10, %v2697_v2 }
 0x344   : > { %v1947_v43 = vpop.f32.mrb[3].mxu1 }
 0x345   : > { %v1948_v49 = vadd.f32 %v1947_v43, %v1946_v62  ;;  %v1434_v62 = vmul.f32 %v1859_v16, %v2697_v2  ;;  %v1458_v43 = vadd.f32 %v2703_v12, %v1435_v60 }
 0x347   : > { %v1259_v0 = vpack.c.bf16 %v1948_v49, %v1945_v61  ;;  %v1436_v61 = vmul.f32 %v1863_v15, %v2697_v2  ;;  %v1456_v49 = vadd.f32 %v2703_v12, %v1433_v39 }
 0x349   : > { %v1949_v4 = vpop.f32.mrb[4].mxu1  ;;  %2002 = vmatprep.mubr.msk.bf16.mxu1 %vm1268_vm2, %v1259_v0  ;;  %v1459_v0 = vadd.f32 %v2703_v12, %v1436_v61 }
 0x34a   : > { %v1950_v19 = vpop.f32.mrb[5].mxu1 }
 0x34b   : > { %v1951_v47 = vadd.f32 %v1950_v19, %v1949_v4  ;;  %v1952_v18 = vpop.f32.mrb[6].mxu1  ;;  %v2711_v4 = vpop.permute.xlu0 %1495  ;;  %v1457_v19 = vadd.f32 %v2703_v12, %v1434_v62 }
 0x34c   : > { %v1953_v27 = vpop.f32.mrb[7].mxu1 }
 0x34d   : > { %v1954_v11 = vadd.f32 %v1953_v27, %v1952_v18  ;;  %v1472_v27 = vmax.f32 %v1456_v49, 0.0 }
 0x34f   : > { %v1260_v17 = vpack.c.bf16 %v1954_v11, %v1951_v47  ;;  %v1474_v47 = vmax.f32 %v1458_v43, 0.0  ;;  %v1890_v11 = vld [vmem:[%s2690_s30 + $0x18] sm:$0xff]  }
 0x351   : > { %v1955_v22 = vpop.f32.mrb[8].mxu1  ;;  %2003 = vmatmul.mubr.msk.bf16.vlgmr.msra.gmra.mrb[32].mxu1 %vm1268_vm2, %v1260_v17 }
 0x352   : > { %v1956_v8 = vpop.f32.mrb[9].mxu1 }
 0x353   : > { %v1957_v13 = vadd.f32 %v1956_v8, %v1955_v22  ;;  %v1958_v46 = vpop.f32.mrb[10].mxu1  ;;  %v1475_v8 = vmax.f32 %v1459_v0, 0.0 }
 0x354   : > { %v1959_v63 = vpop.f32.mrb[11].mxu1 }
 0x355   : > { %v1960_v30 = vadd.f32 %v1959_v63, %v1958_v46 }
 0x357   : > { %v1261_v33 = vpack.c.bf16 %v1960_v30, %v1957_v13  ;;  %v1889_v13 = vld [vmem:[%s2690_s30 + $0x10] sm:$0xff]   ;;  %v1473_v30 = vmax.f32 %v1457_v19, 0.0 }
 0x359   : > { %v1961_v20 = vpop.f32.mrb[12].mxu1  ;;  %2006 = vmatprep.mubr.msk.bf16.mxu1 %vm1268_vm2, %v1261_v33 }
 0x35a   : > { %v1962_v31 = vpop.f32.mrb[13].mxu1 }
 0x35b   : > { %v1963_v21 = vadd.f32 %v1962_v31, %v1961_v20  ;;  %v1964_v29 = vpop.f32.mrb[14].mxu1 }
 0x35c   : > { %v1965_v23 = vpop.f32.mrb[15].mxu1 }
 0x35d   : > { %v1966_v3 = vadd.f32 %v1965_v23, %v1964_v29 }
 0x35f   : > { %v1262_v25 = vpack.c.bf16 %v1966_v3, %v1963_v21  ;;  %v1870_v21 = vunpack.c.l.bf16 %v1890_v11  ;;  %v1866_v3 = vunpack.c.l.bf16 %v1889_v13 }
 0x361   : > { %v1967_v51 = vpop.f32.mrb[16].mxu1  ;;  %2007 = vmatmul.mubr.msk.bf16.gmra.mrb[36].mxu1 %vm1268_vm2, %v1262_v25 }
 0x362   : > { %v1968_v59 = vpop.f32.mrb[17].mxu1 }
 0x363   : > { %v1969_v45 = vadd.f32 %v1968_v59, %v1967_v51  ;;  %v1970_v52 = vpop.f32.mrb[18].mxu1  ;;  %v1871_v59 = vunpack.c.h.bf16 %v1890_v11 }
 0x364   : > { %v1971_v41 = vpop.f32.mrb[19].mxu1 }
 0x365   : > { %v1972_v28 = vadd.f32 %v1971_v41, %v1970_v52  ;;  %v1867_v41 = vunpack.c.h.bf16 %v1889_v13 }
 0x367   : > { %v1263_v40 = vpack.c.bf16 %v1972_v28, %v1969_v45 }
 0x369   : > { %v1973_v53 = vpop.f32.mrb[20].mxu1  ;;  %2010 = vmatprep.mubr.msk.bf16.mxu1 %vm1268_vm2, %v1263_v40  ;;  %v1439_v40 = vmul.f32 %v1870_v21, %v2697_v2  ;;  %v1893_v21 = vld [vmem:[%s2690_s30 + $0x30] sm:$0xff]  }
 0x36a   : > { %v1974_v32 = vpop.f32.mrb[21].mxu1 }
 0x36b   : > { %v1975_v36 = vadd.f32 %v1974_v32, %v1973_v53  ;;  %v1976_v38 = vpop.f32.mrb[22].mxu1  ;;  %v1437_v32 = vmul.f32 %v1866_v3, %v2697_v2 }
 0x36c   : > { %v1977_v1 = vpop.f32.mrb[23].mxu1 }
 0x36d   : > { %v1978_v55 = vadd.f32 %v1977_v1, %v1976_v38  ;;  %v1438_v38 = vmul.f32 %v1867_v41, %v2697_v2  ;;  %v1462_v1 = vadd.f32 %v2703_v12, %v1439_v40 }
 0x36f   : > { %v1264_v42 = vpack.c.bf16 %v1978_v55, %v1975_v36  ;;  %v1440_v36 = vmul.f32 %v1871_v59, %v2697_v2  ;;  %v1460_v55 = vadd.f32 %v2703_v12, %v1437_v32 }
 0x371   : > { %v1979_v26 = vpop.f32.mrb[24].mxu1  ;;  %2011 = vmatmul.mubr.msk.bf16.gmra.mrb[40].mxu1 %vm1268_vm2, %v1264_v42  ;;  %v1463_v42 = vadd.f32 %v2703_v12, %v1440_v36 }
 0x372   : > { %v1980_v34 = vpop.f32.mrb[25].mxu1 }
 0x373   : > { %v1981_v5 = vadd.f32 %v1980_v34, %v1979_v26  ;;  %v1982_v24 = vpop.f32.mrb[26].mxu1  ;;  %v1461_v26 = vadd.f32 %v2703_v12, %v1438_v38  ;;  %v1478_v34 = vmax.f32 %v1462_v1, 0.0  ;;  %v1883_v1 = vunpack.c.h.bf16 %v1893_v21 }
 0x374   : > { %v1983_v6 = vpop.f32.mrb[27].mxu1 }
 0x375   : > { %v1984_v44 = vadd.f32 %v1983_v6, %v1982_v24  ;;  %v1476_v24 = vmax.f32 %v1460_v55, 0.0  ;;  %v1892_v6 = vld [vmem:[%s2690_s30 + $0x28] sm:$0xff]  }
 0x376   : > { %v1878_v14 = vunpack.c.l.bf16 %v1892_v6  ;;  %v1879_v39 = vunpack.c.h.bf16 %v1892_v6 }
 0x377   : > { %v1265_v50 = vpack.c.bf16 %v1984_v44, %v1981_v5 }
 0x378   : > { %v1443_v0 = vmul.f32 %v1878_v14, %v2697_v2 }
 0x379   : > { %v1985_v35 = vpop.f32.mrb[28].mxu1  ;;  %2014 = vmatprep.mubr.msk.bf16.mxu1 %vm1268_vm2, %v1265_v50 }
 0x37a   : > { %v1986_v54 = vpop.f32.mrb[29].mxu1  ;;  %v1466_v11 = vadd.f32 %v2703_v12, %v1443_v0 }
 0x37b   : > { %v1987_v9 = vadd.f32 %v1986_v54, %v1985_v35  ;;  %v1988_v7 = vpop.f32.mrb[30].mxu1  ;;  %v1479_v35 = vmax.f32 %v1463_v42, 0.0  ;;  %v1891_v54 = vld [vmem:[%s2690_s30 + $0x20] sm:$0xff]  }
 0x37c   : > { %v1989_v57 = vpop.f32.mrb[31].mxu1  ;;  %v1874_v15 = vunpack.c.l.bf16 %v1891_v54  ;;  %v1875_v43 = vunpack.c.h.bf16 %v1891_v54  ;;  %v1482_v13 = vmax.f32 %v1466_v11, 0.0 }
 0x37d   : > { %v1990_v58 = vadd.f32 %v1989_v57, %v1988_v7  ;;  %v1477_v57 = vmax.f32 %v1461_v26, 0.0 }
 0x37f   : > { %v1266_v48 = vpack.c.bf16 %v1990_v58, %v1987_v9 }
 0x381   : > { %2015 = vmatmul.mubr.msk.bf16.gmra.mrb[44].mxu1 %vm1268_vm2, %v1266_v48 }
 0x424   : > { %v2004_v18 = vpop.f32.mrb[32].mxu1 }
 0x425   : > { %v1500_v17 = vmul.f32 %v2004_v18, %v2711_v4  ;;  %v1331_v22 = vpop.f32.mrb[33].mxu1  ;;  %v1444_v18 = vmul.f32 %v1879_v39, %v2697_v2 }
 0x426   : > { %v1498_v46 = vmul.f32 %v2711_v4, %v1331_v22  ;;  %v2005_v63 = vpop.f32.mrb[34].mxu1 }
 0x427   : > { %v1516_v33 = vadd.f32 %v1500_v17, %v1474_v47  ;;  %v1501_v20 = vmul.f32 %v2005_v63, %v2711_v4  ;;  %v1334_v31 = vpop.f32.mrb[35].mxu1  ;;  %v1441_v47 = vmul.f32 %v1874_v15, %v2697_v2  ;;  %v1467_v22 = vadd.f32 %v2703_v12, %v1444_v18 }
 0x428   : > { %v1514_v29 = vadd.f32 %v1498_v46, %v1472_v27  ;;  %v1499_v23 = vmul.f32 %v2711_v4, %v1334_v31  ;;  %v1442_v27 = vmul.f32 %v1875_v43, %v2697_v2 }
 0x429   : > { %v1842_v25 = vpack.c.bf16 %v1516_v33, %v1516_v33  ;;  %v1517_v51 = vadd.f32 %v1501_v20, %v1475_v8  ;;  %v1464_v17 = vadd.f32 %v2703_v12, %v1441_v47  ;;  %v1483_v31 = vmax.f32 %v1467_v22, 0.0 }
 0x42a   : > { %v1840_v45 = vpack.c.bf16 %v1514_v29, %v1514_v29  ;;  %v1515_v52 = vadd.f32 %v1499_v23, %v1473_v30  ;;  %v1465_v8 = vadd.f32 %v2703_v12, %v1442_v27  ;;  %v1894_v30 = vld [vmem:[%s2690_s30 + $0x38] sm:$0xff]  }
 0x42b   : > { %1597 = vst.msk [vmem:[%s2723_s20 + $0x8] sm:$0xf] %vm1594_vm3, %v1842_v25  ;;  %v1843_v28 = vpack.c.bf16 %v1517_v51, %v1517_v51  ;;  %v1480_v63 = vmax.f32 %v1464_v17, 0.0  ;;  %v1887_v32 = vunpack.c.h.bf16 %v1894_v30 }
 0x42c   : > { %1595 = vst.msk [vmem:[%s2723_s20] sm:$0xf] %vm1594_vm3, %v1840_v45  ;;  %v1841_v53 = vpack.c.bf16 %v1515_v52, %v1515_v52  ;;  %v1481_v3 = vmax.f32 %v1465_v8, 0.0  ;;  %v1886_v45 = vunpack.c.l.bf16 %v1894_v30 }
 0x42d   : > { %1598 = vst.msk [vmem:[%s2723_s20 + $0xc] sm:$0xf] %vm1594_vm3, %v1843_v28  ;;  %v1882_v28 = vunpack.c.l.bf16 %v1893_v21 }
 0x42e   : > { %1596 = vst.msk [vmem:[%s2723_s20 + $0x4] sm:$0xf] %vm1594_vm3, %v1841_v53  ;;  %v1447_v42 = vmul.f32 %v1886_v45, %v2697_v2 }
 0x430   : > { %v1470_v6 = vadd.f32 %v2703_v12, %v1447_v42 }
 0x432   : > { %v1486_v54 = vmax.f32 %v1470_v6, 0.0 }
 0x434   : > { %v2008_v5 = vpop.f32.mrb[36].mxu1 }
 0x435   : > { %v1504_v44 = vmul.f32 %v2008_v5, %v2711_v4  ;;  %v1347_v50 = vpop.f32.mrb[37].mxu1  ;;  %v1448_v5 = vmul.f32 %v1887_v32, %v2697_v2 }
 0x436   : > { %v1502_v9 = vmul.f32 %v2711_v4, %v1347_v50  ;;  %v2009_v7 = vpop.f32.mrb[38].mxu1 }
 0x437   : > { %v1520_v58 = vadd.f32 %v1504_v44, %v1478_v34  ;;  %v1505_v48 = vmul.f32 %v2009_v7, %v2711_v4  ;;  %v1350_v56 = vpop.f32.mrb[39].mxu1  ;;  %v1445_v34 = vmul.f32 %v1882_v28, %v2697_v2  ;;  %v1471_v50 = vadd.f32 %v2703_v12, %v1448_v5 }
 0x438   : > { %v1518_v37 = vadd.f32 %v1502_v9, %v1476_v24  ;;  %v1503_v10 = vmul.f32 %v2711_v4, %v1350_v56  ;;  %v1446_v24 = vmul.f32 %v1883_v1, %v2697_v2 }
 0x439   : > { %v1846_v16 = vpack.c.bf16 %v1520_v58, %v1520_v58  ;;  %v1521_v60 = vadd.f32 %v1505_v48, %v1479_v35  ;;  %v1468_v44 = vadd.f32 %v2703_v12, %v1445_v34  ;;  %v1487_v48 = vmax.f32 %v1471_v50, 0.0 }
 0x43a   : > { %v1844_v61 = vpack.c.bf16 %v1518_v37, %v1518_v37  ;;  %v1519_v62 = vadd.f32 %v1503_v10, %v1477_v57  ;;  %v1469_v35 = vadd.f32 %v2703_v12, %v1446_v24 }
 0x43b   : > { %1601 = vst.msk [vmem:[%s2723_s20 + $0x18] sm:$0xf] %vm1594_vm3, %v1846_v16  ;;  %v1847_v49 = vpack.c.bf16 %v1521_v60, %v1521_v60  ;;  %v1484_v7 = vmax.f32 %v1468_v44, 0.0 }
 0x43c   : > { %1599 = vst.msk [vmem:[%s2723_s20 + $0x10] sm:$0xf] %vm1594_vm3, %v1844_v61  ;;  %v1845_v19 = vpack.c.bf16 %v1519_v62, %v1519_v62  ;;  %v1485_v14 = vmax.f32 %v1469_v35, 0.0 }
 0x43d   : > { %1602 = vst.msk [vmem:[%s2723_s20 + $0x1c] sm:$0xf] %vm1594_vm3, %v1847_v49 }
 0x43e   : > { %1600 = vst.msk [vmem:[%s2723_s20 + $0x14] sm:$0xf] %vm1594_vm3, %v1845_v19 }
 0x444   : > { %v2012_v46 = vpop.f32.mrb[40].mxu1 }
 0x445   : > { %v1508_v33 = vmul.f32 %v2012_v46, %v2711_v4  ;;  %v1363_v20 = vpop.f32.mrb[41].mxu1 }
 0x446   : > { %v1506_v29 = vmul.f32 %v2711_v4, %v1363_v20  ;;  %v2013_v23 = vpop.f32.mrb[42].mxu1 }
 0x447   : > { %v1524_v25 = vadd.f32 %v1508_v33, %v1482_v13  ;;  %v1509_v51 = vmul.f32 %v2013_v23, %v2711_v4  ;;  %v1366_v59 = vpop.f32.mrb[43].mxu1 }
 0x448   : > { %v1522_v52 = vadd.f32 %v1506_v29, %v1480_v63  ;;  %v1507_v41 = vmul.f32 %v2711_v4, %v1366_v59 }
 0x449   : > { %v1850_v40 = vpack.c.bf16 %v1524_v25, %v1524_v25  ;;  %v1525_v53 = vadd.f32 %v1509_v51, %v1483_v31 }
 0x44a   : > { %v1848_v36 = vpack.c.bf16 %v1522_v52, %v1522_v52  ;;  %v1523_v38 = vadd.f32 %v1507_v41, %v1481_v3 }
 0x44b   : > { %1605 = vst.msk [vmem:[%s2723_s20 + $0x28] sm:$0xf] %vm1594_vm3, %v1850_v40  ;;  %v1851_v55 = vpack.c.bf16 %v1525_v53, %v1525_v53 }
 0x44c   : > { %1603 = vst.msk [vmem:[%s2723_s20 + $0x20] sm:$0xf] %vm1594_vm3, %v1848_v36  ;;  %v1849_v26 = vpack.c.bf16 %v1523_v38, %v1523_v38 }
 0x44d   : > { %1606 = vst.msk [vmem:[%s2723_s20 + $0x2c] sm:$0xf] %vm1594_vm3, %v1851_v55 }
 0x44e   : > { %1604 = vst.msk [vmem:[%s2723_s20 + $0x24] sm:$0xf] %vm1594_vm3, %v1849_v26 }
 0x454   : > { %v2016_v9 = vpop.f32.mrb[44].mxu1 }
 0x455   : > { %v1512_v57 = vmul.f32 %v2016_v9, %v2711_v4  ;;  %v1379_v58 = vpop.f32.mrb[45].mxu1 }
 0x456   : > { %v1510_v56 = vmul.f32 %v2711_v4, %v1379_v58  ;;  %v2017_v2 = vpop.f32.mrb[46].mxu1 }
 0x457   : > { %v1528_v37 = vadd.f32 %v1512_v57, %v1486_v54  ;;  %v1513_v10 = vmul.f32 %v2017_v2, %v2711_v4  ;;  %v1382_v15 = vpop.f32.mrb[47].mxu1 }
 0x458   : > { %v1526_v12 = vadd.f32 %v1510_v56, %v1484_v7  ;;  %v1511_v16 = vmul.f32 %v2711_v4, %v1382_v15 }
 0x459   : > { %v1854_v60 = vpack.c.bf16 %v1528_v37, %v1528_v37  ;;  %v1529_v39 = vadd.f32 %v1513_v10, %v1487_v48 }
 0x45a   : > { %v1852_v61 = vpack.c.bf16 %v1526_v12, %v1526_v12  ;;  %v1527_v62 = vadd.f32 %v1511_v16, %v1485_v14 }
 0x45b   : > { %1609 = vst.msk [vmem:[%s2723_s20 + $0x38] sm:$0xf] %vm1594_vm3, %v1854_v60  ;;  %v1855_v43 = vpack.c.bf16 %v1529_v39, %v1529_v39 }
 0x45c   : > { %1607 = vst.msk [vmem:[%s2723_s20 + $0x30] sm:$0xf] %vm1594_vm3, %v1852_v61  ;;  %v1853_v49 = vpack.c.bf16 %v1527_v62, %v1527_v62 }
 0x45d   : > { %1610 = vst.msk [vmem:[%s2723_s20 + $0x3c] sm:$0xf] %vm1594_vm3, %v1855_v43 }
 0x45e   : > { %1608 = vst.msk [vmem:[%s2723_s20 + $0x34] sm:$0xf] %vm1594_vm3, %v1853_v49 }
 0x45f PF: > { %s20_s11 = sadd.s32 1, %s2243_s11   ;;  %s2822_s29 = smov %s2235_s9 }
 0x460   : > { %p17_p7 = scmp.ge.s32.totalorder %s20_s11, 18   ;;  %s2823_s30 = smov %s2239_s10 }
 0x461   : > { %s2824_s9 = smov %s2827_s3  ;;  %s2825_s10 = smov %s2831_s12 }
 0x462   :  { %19 = sbr.rel (!%p17_p7) target bundleno = 3 (0x3), region = 91 }

// kernel: generator_forward.22
= control target key start
LH: loop header
LB: loop body
LE: loop exit
PB: predicated region body
PF: predicated region fallthrough
CT: control target
= control target key end

     0   :  { %s706_s9 = smov 0   ;;  %s708_s10 = smov 0   ;;  %s842_s0 = inlined_call_operand.vmem [shape: bf16[2048,16], index: 0, kind: input, shape index: {}]   ;;  %s843_s1 = inlined_call_operand.vmem [shape: bf16[16,48], index: 1, kind: input, shape index: {}]   ;;  %s844_s2 = inlined_call_operand.vmem [shape: f32[2048,48], index: 2, kind: output, shape index: {}]  }
   0x1   :  { %s710_s11 = smov 0  }
   0x2 LB: > { %s31_s12 = sadd.s32 1, %s684_s10  ;;  %p579_p0 = scmp.ge.s32.totalorder %s688_s11, 1  ;;  %s688_s11 = sphi %s710_s11, %s12_s11   ;;  %s684_s10 = sphi %s708_s10, %s846_s10   ;;  %s680_s9 = sphi %s706_s9, %s845_s9  }
   0x3   : > { %p33_p1 = scmp.ge.s32.totalorder %s31_s12, 16  ;;  %p155_p2 = scmp.lt.s32.totalorder %s688_s11, 17 }
   0x5   : > { %s848_s12 = smov (%p33_p1, %s31_s12), 0  ;;  %p156_p3 = pnand %p579_p0, %p155_p2 }
   0x6   : > { %v657_v0 = vld [vmem:[%s843_s1] sm:$0xff] (!%p156_p3)   ;;  %s580_s15 = sshll.u32 (!%p156_p3), %s680_s9, 4  ;;  %vm223_vm0 = vcmask (!%p156_p3), 392192   ;;  %vm320_vm1 = vcmask (!%p156_p3), 130048   ;;  %v690_v2 = vmov (!%p156_p3), 0.0  }
   0x7   : > { %159 = sbr.rel (%p156_p3) target bundleno = 246 (0xf6), region = 28  ;;  %p192_p4 = scmp.lt.s32.totalorder (!%p156_p3), %s580_s15, 255  ;;  %612 = vmatprep.subr.bf16.mxu0 (!%p156_p3), %v657_v0  ;;  %630 = vmatprep.subr.bf16.mxu1 (!%p156_p3), %v657_v0 }
   0x8   : > { %613 = vmatpush3.bf16.msra.mxu0 (!%p156_p3), %v657_v0  ;;  %631 = vmatpush3.bf16.msra.mxu1 (!%p156_p3), %v657_v0 }
   0xe   : > { %s850_s15 = smov (!%p192_p4, %s580_s15), 255 }
   0xf   : > { %s581_s16 = sshll.u32 %s850_s15, 2  ;;  %s583_s17 = sshll.u32 %s850_s15, 3 }
  0x10   : > { %s730_s20 = scalar_lea.vmem %s842_s0, %s581_s16  ;;  %s735_s23 = scalar_lea.vmem %s844_s2, %s583_s17 }
  0x11   : > { %v658_v1 = vld [vmem:[%s730_s20] sm:$0xff]   ;;  %226 = vst.msk [vmem:[%s735_s23 + $0x10] sm:$0xff] %vm223_vm0, %v690_v2  ;;  %224 = vst.msk [vmem:[%s735_s23] sm:$0xff] %vm223_vm0, %v690_v2  ;;  %v660_v4 = vld [vmem:[%s730_s20 + $0x8] sm:$0xff]  }
  0x12   : > { %225 = vst.msk [vmem:[%s735_s23 + $0x8] sm:$0xff] %vm223_vm0, %v690_v2  ;;  %227 = vst.msk [vmem:[%s735_s23 + $0x18] sm:$0xff] %vm223_vm0, %v690_v2  ;;  %v659_v3 = vld [vmem:[%s730_s20 + $0x20] sm:$0xff]   ;;  %614 = vmatprep.mubr.msk.bf16.mxu0 %vm320_vm1, %v658_v1  ;;  %v661_v5 = vld [vmem:[%s730_s20 + $0x28] sm:$0xff]  }
  0x13   : > { %228 = vst.msk [vmem:[%s735_s23 + $0x20] sm:$0xff] %vm223_vm0, %v690_v2  ;;  %229 = vst.msk [vmem:[%s735_s23 + $0x28] sm:$0xff] %vm223_vm0, %v690_v2  ;;  %622 = vmatprep.mubr.msk.bf16.mxu1 %vm320_vm1, %v659_v3  ;;  %615 = vmatmul.mubr.msk.bf16.vlgmr.msra.gmra.mrb[0].mxu0 %vm320_vm1, %v660_v4  ;;  %v662_v6 = vld [vmem:[%s730_s20 + $0x10] sm:$0xff]   ;;  %v664_v8 = vld [vmem:[%s730_s20 + $0x18] sm:$0xff]  }
  0x14   : > { %230 = vst.msk [vmem:[%s735_s23 + $0x30] sm:$0xff] %vm223_vm0, %v690_v2  ;;  %231 = vst.msk [vmem:[%s735_s23 + $0x38] sm:$0xff] %vm223_vm0, %v690_v2  ;;  %623 = vmatmul.mubr.msk.bf16.vlgmr.msra.gmra.mrb[0].mxu1 %vm320_vm1, %v661_v5  ;;  %v663_v7 = vld [vmem:[%s730_s20 + $0x30] sm:$0xff]   ;;  %618 = vmatprep.mubr.msk.bf16.mxu0 %vm320_vm1, %v662_v6  ;;  %v665_v9 = vld [vmem:[%s730_s20 + $0x38] sm:$0xff]  }
  0x15   : > { %232 = vst.msk [vmem:[%s735_s23 + $0x40] sm:$0xff] %vm223_vm0, %v690_v2  ;;  %233 = vst.msk [vmem:[%s735_s23 + $0x48] sm:$0xff] %vm223_vm0, %v690_v2  ;;  %626 = vmatprep.mubr.msk.bf16.mxu1 %vm320_vm1, %v663_v7 }
  0x16   : > { %234 = vst.msk [vmem:[%s735_s23 + $0x50] sm:$0xff] %vm223_vm0, %v690_v2  ;;  %235 = vst.msk [vmem:[%s735_s23 + $0x58] sm:$0xff] %vm223_vm0, %v690_v2 }
  0x17   : > { %236 = vst.msk [vmem:[%s735_s23 + $0x60] sm:$0xff] %vm223_vm0, %v690_v2  ;;  %237 = vst.msk [vmem:[%s735_s23 + $0x68] sm:$0xff] %vm223_vm0, %v690_v2 }
  0x18   : > { %238 = vst.msk [vmem:[%s735_s23 + $0x70] sm:$0xff] %vm223_vm0, %v690_v2  ;;  %239 = vst.msk [vmem:[%s735_s23 + $0x78] sm:$0xff] %vm223_vm0, %v690_v2  ;;  %v242_v10 = vld [vmem:[%s735_s23 + $0x10] sm:$0xff]  ;;  %v240_v12 = vld [vmem:[%s735_s23] sm:$0xff] }
  0x19   : > { %v243_v15 = vld [vmem:[%s735_s23 + $0x18] sm:$0xff]  ;;  %v241_v20 = vld [vmem:[%s735_s23 + $0x8] sm:$0xff] }
  0x1a   : > { %v244_v36 = vld [vmem:[%s735_s23 + $0x20] sm:$0xff]  ;;  %v245_v44 = vld [vmem:[%s735_s23 + $0x28] sm:$0xff] }
  0x1b   : > { %619 = vmatmul.mubr.msk.bf16.gmra.mrb[4].mxu0 %vm320_vm1, %v664_v8  ;;  %v246_v34 = vld [vmem:[%s735_s23 + $0x30] sm:$0xff]  ;;  %v247_v39 = vld [vmem:[%s735_s23 + $0x38] sm:$0xff] }
  0x1c   : > { %627 = vmatmul.mubr.msk.bf16.gmra.mrb[4].mxu1 %vm320_vm1, %v665_v9  ;;  %v248_v14 = vld [vmem:[%s735_s23 + $0x40] sm:$0xff]  ;;  %v249_v25 = vld [vmem:[%s735_s23 + $0x48] sm:$0xff] }
  0x1d   : > { %v250_v11 = vld [vmem:[%s735_s23 + $0x50] sm:$0xff]  ;;  %v251_v19 = vld [vmem:[%s735_s23 + $0x58] sm:$0xff] }
  0x1e   : > { %v252_v38 = vld [vmem:[%s735_s23 + $0x60] sm:$0xff]  ;;  %v253_v49 = vld [vmem:[%s735_s23 + $0x68] sm:$0xff] }
  0x1f   : > { %v254_v35 = vld [vmem:[%s735_s23 + $0x70] sm:$0xff]  ;;  %v255_v43 = vld [vmem:[%s735_s23 + $0x78] sm:$0xff] }
  0xe6   : > { %v616_v13 = vpop.f32.mrb[0].mxu0 }
  0xe7   : > { %v444_v16 = vadd.f32 %v616_v13, %v242_v10  ;;  %v624_v17 = vpop.f32.mrb[0].mxu1  ;;  %v379_v18 = vpop.f32.mrb[1].mxu0 }
  0xe8   : > { %v452_v21 = vadd.f32 %v624_v17, %v250_v11  ;;  %v442_v22 = vadd.f32 %v379_v18, %v240_v12  ;;  %v411_v23 = vpop.f32.mrb[1].mxu1  ;;  %v617_v24 = vpop.f32.mrb[2].mxu0 }
  0xe9   : > { %461 = vst.msk [vmem:[%s735_s23 + $0x10] sm:$0xff] %vm223_vm0, %v444_v16  ;;  %v450_v26 = vadd.f32 %v411_v23, %v248_v14  ;;  %v445_v27 = vadd.f32 %v617_v24, %v243_v15  ;;  %v625_v28 = vpop.f32.mrb[2].mxu1  ;;  %v382_v29 = vpop.f32.mrb[3].mxu0 }
  0xea   : > { %469 = vst.msk [vmem:[%s735_s23 + $0x50] sm:$0xff] %vm223_vm0, %v452_v21  ;;  %459 = vst.msk [vmem:[%s735_s23] sm:$0xff] %vm223_vm0, %v442_v22  ;;  %v453_v30 = vadd.f32 %v625_v28, %v251_v19  ;;  %v443_v31 = vadd.f32 %v382_v29, %v241_v20  ;;  %v414_v32 = vpop.f32.mrb[3].mxu1 }
  0xeb   : > { %467 = vst.msk [vmem:[%s735_s23 + $0x40] sm:$0xff] %vm223_vm0, %v450_v26  ;;  %462 = vst.msk [vmem:[%s735_s23 + $0x18] sm:$0xff] %vm223_vm0, %v445_v27  ;;  %v451_v33 = vadd.f32 %v414_v32, %v249_v25 }
  0xec   : > { %470 = vst.msk [vmem:[%s735_s23 + $0x58] sm:$0xff] %vm223_vm0, %v453_v30  ;;  %460 = vst.msk [vmem:[%s735_s23 + $0x8] sm:$0xff] %vm223_vm0, %v443_v31 }
  0xed   : > { %468 = vst.msk [vmem:[%s735_s23 + $0x48] sm:$0xff] %vm223_vm0, %v451_v33 }
  0xee   : > { %v620_v37 = vpop.f32.mrb[4].mxu0 }
  0xef   : > { %v448_v40 = vadd.f32 %v620_v37, %v246_v34  ;;  %v628_v41 = vpop.f32.mrb[4].mxu1  ;;  %v395_v42 = vpop.f32.mrb[5].mxu0 }
  0xf0   : > { %v456_v45 = vadd.f32 %v628_v41, %v254_v35  ;;  %v446_v46 = vadd.f32 %v395_v42, %v244_v36  ;;  %v427_v47 = vpop.f32.mrb[5].mxu1  ;;  %v621_v48 = vpop.f32.mrb[6].mxu0 }
  0xf1   : > { %465 = vst.msk [vmem:[%s735_s23 + $0x30] sm:$0xff] %vm223_vm0, %v448_v40  ;;  %v454_v50 = vadd.f32 %v427_v47, %v252_v38  ;;  %v449_v51 = vadd.f32 %v621_v48, %v247_v39  ;;  %v629_v52 = vpop.f32.mrb[6].mxu1  ;;  %v398_v53 = vpop.f32.mrb[7].mxu0 }
  0xf2   : > { %473 = vst.msk [vmem:[%s735_s23 + $0x70] sm:$0xff] %vm223_vm0, %v456_v45  ;;  %463 = vst.msk [vmem:[%s735_s23 + $0x20] sm:$0xff] %vm223_vm0, %v446_v46  ;;  %v457_v54 = vadd.f32 %v629_v52, %v255_v43  ;;  %v447_v55 = vadd.f32 %v398_v53, %v245_v44  ;;  %v430_v56 = vpop.f32.mrb[7].mxu1 }
  0xf3   : > { %471 = vst.msk [vmem:[%s735_s23 + $0x60] sm:$0xff] %vm223_vm0, %v454_v50  ;;  %466 = vst.msk [vmem:[%s735_s23 + $0x38] sm:$0xff] %vm223_vm0, %v449_v51  ;;  %v455_v57 = vadd.f32 %v430_v56, %v253_v49 }
  0xf4   : > { %474 = vst.msk [vmem:[%s735_s23 + $0x78] sm:$0xff] %vm223_vm0, %v457_v54  ;;  %464 = vst.msk [vmem:[%s735_s23 + $0x28] sm:$0xff] %vm223_vm0, %v447_v55 }
  0xf5   : > { %472 = vst.msk [vmem:[%s735_s23 + $0x68] sm:$0xff] %vm223_vm0, %v455_v57 }
  0xf6 PF: > { %s12_s11 = sadd.s32 1, %s688_s11   ;;  %s845_s9 = smov %s684_s10 }
  0xf7   : > { %p9_p5 = scmp.ge.s32.totalorder %s12_s11, 18   ;;  %s846_s10 = smov %s848_s12 }
  0xf9   :  { %11 = sbr.rel (!%p9_p5) target bundleno = 2 (0x2), region = 65 }

// kernel: generator_forward.23
= control target key start
LH: loop header
LB: loop body
LE: loop exit
PB: predicated region body
PF: predicated region fallthrough
CT: control target
= control target key end

     0   :  { %s253_s6 = smov 0   ;;  %s270_s0 = inlined_call_operand.vmem [shape: f32[192,128], index: 0, kind: input, shape index: {}]   ;;  %s271_s1 = inlined_call_operand.vmem [shape: f32[192,128], index: 1, kind: output, shape index: {}]  }
   0x1 LB: > { %s200_s7 = sadd.s32 4294967295, %s241_s6   ;;  %p204_p0 = scmp.ge.s32.totalorder %s241_s6, 1  ;;  %s241_s6 = sphi %s253_s6, %s11_s6  }
   0x2   : > { %p88_p1 = scmp.lt.s32.totalorder %s241_s6, 4 }
   0x4   : > { %p89_p2 = pnand %p204_p0, %p88_p1 }
   0x5   : > { %s205_s8 = sshll.u32 (!%p89_p2), %s200_s7, 3 }
   0x6   : > { %92 = sbr.rel (%p89_p2) target bundleno = 36 (0x24), region = 24  ;;  %p109_p3 = scmp.lt.s32.totalorder (!%p89_p2), %s205_s8, 23 }
   0xd   : > { %s273_s8 = smov (!%p109_p3, %s205_s8), 23 }
   0xe   : > { %s206_s9 = sshll.u32 %s273_s8, 3 }
   0xf   : > { %s112_s12 = scalar_lea.vmem %s270_s0, %s206_s9  ;;  %s118_s15 = scalar_lea.vmem %s271_s1, %s206_s9 }
  0x10   : > { %v120_v0 = vld [vmem:[%s112_s12] sm:$0xff]  ;;  %v121_v1 = vld [vmem:[%s112_s12 + $0x8] sm:$0xff]  ;;  %v122_v2 = vld [vmem:[%s112_s12 + $0x10] sm:$0xff] }
  0x11   : > { %219 = vtanh.f32 %v120_v0  ;;  %v123_v3 = vld [vmem:[%s112_s12 + $0x18] sm:$0xff]  ;;  %v124_v4 = vld [vmem:[%s112_s12 + $0x20] sm:$0xff]  ;;  %v125_v5 = vld [vmem:[%s112_s12 + $0x28] sm:$0xff] }
  0x12   : > { %221 = vtanh.f32 %v121_v1  ;;  %v126_v6 = vld [vmem:[%s112_s12 + $0x30] sm:$0xff]  ;;  %v127_v7 = vld [vmem:[%s112_s12 + $0x38] sm:$0xff] }
  0x13   : > { %223 = vtanh.f32 %v122_v2 }
  0x14   : > { %225 = vtanh.f32 %v123_v3 }
  0x15   : > { %227 = vtanh.f32 %v124_v4 }
  0x16   : > { %229 = vtanh.f32 %v125_v5 }
  0x17   : > { %231 = vtanh.f32 %v126_v6 }
  0x18   : > { %233 = vtanh.f32 %v127_v7 }
  0x1b   : > { %v220_v8 = vpop.eup %219 }
  0x1c   : > { %v222_v9 = vpop.eup %221  ;;  %136 = vst [vmem:[%s118_s15] sm:$0xff] %v220_v8 }
  0x1d   : > { %v224_v10 = vpop.eup %223  ;;  %137 = vst [vmem:[%s118_s15 + $0x8] sm:$0xff] %v222_v9 }
  0x1e   : > { %v226_v11 = vpop.eup %225  ;;  %138 = vst [vmem:[%s118_s15 + $0x10] sm:$0xff] %v224_v10 }
  0x1f   : > { %v228_v12 = vpop.eup %227  ;;  %139 = vst [vmem:[%s118_s15 + $0x18] sm:$0xff] %v226_v11 }
  0x20   : > { %v230_v13 = vpop.eup %229  ;;  %140 = vst [vmem:[%s118_s15 + $0x20] sm:$0xff] %v228_v12 }
  0x21   : > { %v232_v14 = vpop.eup %231  ;;  %141 = vst [vmem:[%s118_s15 + $0x28] sm:$0xff] %v230_v13 }
  0x22   : > { %v234_v15 = vpop.eup %233  ;;  %142 = vst [vmem:[%s118_s15 + $0x30] sm:$0xff] %v232_v14 }
  0x23   : > { %143 = vst [vmem:[%s118_s15 + $0x38] sm:$0xff] %v234_v15 }
  0x24 PF: > { %s11_s6 = sadd.s32 1, %s241_s6  }
  0x25   : > { %p8_p4 = scmp.ge.s32.totalorder %s11_s6, 5  }
  0x27   :  { %10 = sbr.rel (!%p8_p4) target bundleno = 1 (0x1), region = 54 }

</bundles_post_ra>
